<compile_context>
chip_gen: v7x
topology: tpu7x:2x2x1
jax: 0.10.0
libtpu: 0.0.40
codegen_flags: <defaults>
</compile_context>

<pallas_src>
import functools

import numpy as np
import jax
import jax.numpy as jnp
from jax.experimental import pallas as pl
from jax.experimental.pallas import tpu as pltpu


# ----------------------------------------------------------------------------
# Bilinear interpolation helpers (PyTorch align_corners=False semantics).
# ----------------------------------------------------------------------------
def bilinear_matrix(n_out, n_in):
    A = np.zeros((n_out, n_in), np.float32)
    scale = n_in / n_out
    for j in range(n_out):
        src = (j + 0.5) * scale - 0.5
        src = max(src, 0.0)
        i0 = min(int(np.floor(src)), n_in - 1)
        i1 = min(i0 + 1, n_in - 1)
        w1 = src - i0
        A[j, i0] += 1.0 - w1
        A[j, i1] += w1
    return A


def bilinear_taps(n_out, n_in):
    """Per output row: tuple of (input_row, weight) pairs (<=2), trace-time constants."""
    taps = []
    scale = n_in / n_out
    for h in range(n_out):
        src = max((h + 0.5) * scale - 0.5, 0.0)
        i0 = min(int(np.floor(src)), n_in - 1)
        i1 = min(i0 + 1, n_in - 1)
        w1 = float(src - i0)
        d = {}
        d[i0] = d.get(i0, 0.0) + (1.0 - w1)
        d[i1] = d.get(i1, 0.0) + w1
        taps.append(tuple((i, w) for i, w in d.items() if w != 0.0))
    return tuple(taps)


def bilinear_2d_matrix(h_out, w_out, h_in, w_in):
    # only used by the pure-JAX reference below
    Ah = bilinear_matrix(h_out, h_in)
    Aw = bilinear_matrix(w_out, w_in)
    return jnp.asarray(np.kron(Ah, Aw), jnp.float32)


# ----------------------------------------------------------------------------
# Fused kernel: resize(p3,p4,p5) + weighted fusion + 3x3 conv + BN/ReLU +
# merged 1x1 heads, all in the lane-dense (C, H*W) layout.
# ----------------------------------------------------------------------------
def _fpn_head_kernel(w_ref,                         # (4,) softmax weights, SMEM
                     p2_ref, c2_ref,                # (1, C, H*W)
                     x3_ref, x4_ref, x5_ref,        # (1, hi*C, wi)  i-major
                     awt3_ref, awt4_ref, awt5_ref,  # (wi, W), softmax wt folded
                     mask_ref,                      # (8, H*W) f32 tap validity
                     wtap_ref,                      # (9, C, C) conv taps
                     bns_ref, bnb_ref,              # (C, 1) folded BN scale/shift(+bias)
                     wh_ref, bh_ref,                # (NC, 2C), (NC, 1) merged heads
                     out_ref,                       # (1, NC, H*W)
                     t3_ref, t4_ref, t5_ref,        # scratch (hi*C, W)
                     fused_ref,                     # scratch (C, H*W)
                     acc_ref,                       # scratch (2C, H*W)
                     *, height, width, taps3, taps4, taps5):
    C = p2_ref.shape[1]
    H, W = height, width
    HW = H * W

    # ---- W-axis resize: one wide MXU matmul per pyramid level ----
    t3_ref[...] = jnp.dot(x3_ref[0], awt3_ref[...], preferred_element_type=jnp.float32)
    t4_ref[...] = jnp.dot(x4_ref[0], awt4_ref[...], preferred_element_type=jnp.float32)
    t5_ref[...] = jnp.dot(x5_ref[0], awt5_ref[...], preferred_element_type=jnp.float32)

    # ---- H-axis resize (<=2 static taps per output row) + weighted fusion,
    #      written straight into the flat lane-dense (C, H*W) layout ----
    w0 = w_ref[0]
    for h in range(H):
        row = w0 * p2_ref[0, :, h * W:(h + 1) * W]                    # (C, W)
        for t_ref, taps in ((t3_ref, taps3), (t4_ref, taps4), (t5_ref, taps5)):
            for i, a in taps[h]:
                row = row + a * t_ref[i * C:(i + 1) * C, :]
        fused_ref[:, h * W:(h + 1) * W] = row

    # ---- 3x3 "SAME" conv: 9 accumulating (C,C)@(C,HW) matmuls (no im2col) ----
    fused = fused_ref[...]                                            # (C, HW)
    acc_ref[C:, :] = c2_ref[0]              # stage c2 for the merged 1x1 heads
    for tap in range(9):
        oy, ox = tap // 3 - 1, tap % 3 - 1
        if oy == 0 and ox == 0:
            opnd = fused
        else:
            sh = oy * W + ox
            midx = tap if tap < 4 else tap - 1
            opnd = pltpu.roll(fused, (-sh) % HW, axis=1) * mask_ref[midx:midx + 1, :]
        contrib = jnp.dot(wtap_ref[tap], opnd, preferred_element_type=jnp.float32)
        if tap == 0:
            acc_ref[:C, :] = contrib
        else:
            acc_ref[:C, :] = acc_ref[:C, :] + contrib

    # folded conv-bias + BatchNorm (inference) + ReLU on the conv half
    # (Dropout2d layers are identity in inference mode.)
    acc_ref[:C, :] = jnp.maximum(acc_ref[:C, :] * bns_ref[...] + bnb_ref[...], 0.0)

    # ---- merged 1x1 heads: one (NC, 2C) @ (2C, HW) matmul, combined bias ----
    out_ref[0] = (jnp.dot(wh_ref[...], acc_ref[...], preferred_element_type=jnp.float32)
                  + bh_ref[...])


# ----------------------------------------------------------------------------
# Wrapper: parameter folding, free layout reshapes, BlockSpecs.
# ----------------------------------------------------------------------------
def fpn_head_forward(pyramid_features_nchw, c2_nchw, params):
    p2, p3, p4, p5 = pyramid_features_nchw
    B, C, H, W = p2.shape
    NC = params["b2"].shape[0]
    HW = H * W

    w_norm = jax.nn.softmax(params["w_logits"]).astype(jnp.float32)

    def level_inputs(f, w_scalar):
        hi, wi = f.shape[2], f.shape[3]
        # i-major flat layout (hi*C, wi): row i*C + c == f[:, c, i, :]
        xf = jnp.transpose(f, (0, 2, 1, 3)).reshape(B, hi * C, wi)
        awt = jnp.asarray(bilinear_matrix(W, wi).T) * w_scalar        # (wi, W)
        return xf, awt, bilinear_taps(H, hi), hi, wi

    x3, awt3, taps3, h3, w3 = level_inputs(p3, w_norm[1])
    x4, awt4, taps4, h4, w4 = level_inputs(p4, w_norm[2])
    x5, awt5, taps5, h5, w5 = level_inputs(p5, w_norm[3])

    # free metadata reshapes to the flat lane-dense pixel layout
    p2f = p2.reshape(B, C, HW)
    c2f = c2_nchw.reshape(B, C, HW)

    # tap-validity masks for the eight non-center 3x3 taps (host-side constants)
    pix = np.arange(HW)
    hrow, wcol = pix // W, pix % W
    mrows = []
    for tap in range(9):
        oy, ox = tap // 3 - 1, tap % 3 - 1
        if oy == 0 and ox == 0:
            continue
        valid = np.ones(HW, bool)
        if oy:
            valid &= (hrow + oy >= 0) & (hrow + oy <= H - 1)
        if ox:
            valid &= (wcol + ox >= 0) & (wcol + ox <= W - 1)
        mrows.append(valid.astype(np.float32))
    masks = jnp.asarray(np.stack(mrows))                              # (8, HW)

    # ---- folded parameters ----
    wtaps = jnp.transpose(params["W1"], (2, 3, 0, 1)).reshape(9, C, C)
    eps = 1e-5
    bn_s = params["gamma"] / jnp.sqrt(params["run_var"] + eps)
    bn_b = (params["b1"] - params["run_mean"]) * bn_s + params["beta"]
    wh = jnp.concatenate([params["W2"].reshape(NC, C),
                          params["Wc2"].reshape(NC, C)], axis=1)      # (NC, 2C)
    bh = params["b2"] + params["bc2"]

    bmap3 = lambda b: (b, 0, 0)
    cmap2 = lambda b: (0, 0)
    cmap3 = lambda b: (0, 0, 0)

    out_flat = pl.pallas_call(
        functools.partial(_fpn_head_kernel, height=H, width=W,
                          taps3=taps3, taps4=taps4, taps5=taps5),
        out_shape=jax.ShapeDtypeStruct((B, NC, HW), jnp.float32),
        grid_spec=pltpu.PrefetchScalarGridSpec(
            num_scalar_prefetch=0,
            grid=(B,),
            in_specs=[
                pl.BlockSpec(memory_space=pltpu.MemorySpace.SMEM),    # w_norm
                pl.BlockSpec((1, C, HW), bmap3),                      # p2 flat
                pl.BlockSpec((1, C, HW), bmap3),                      # c2 flat
                pl.BlockSpec((1, h3 * C, w3), bmap3),                 # p3 (i-major)
                pl.BlockSpec((1, h4 * C, w4), bmap3),                 # p4
                pl.BlockSpec((1, h5 * C, w5), bmap3),                 # p5
                pl.BlockSpec((w3, W), cmap2),                         # Aw3^T (scaled)
                pl.BlockSpec((w4, W), cmap2),                         # Aw4^T (scaled)
                pl.BlockSpec((w5, W), cmap2),                         # Aw5^T (scaled)
                pl.BlockSpec((8, HW), cmap2),                         # tap masks
                pl.BlockSpec((9, C, C), cmap3),                       # conv taps
                pl.BlockSpec((C, 1), cmap2),                          # BN scale
                pl.BlockSpec((C, 1), cmap2),                          # BN shift(+bias)
                pl.BlockSpec((NC, 2 * C), cmap2),                     # merged heads
                pl.BlockSpec((NC, 1), cmap2),                         # combined bias
            ],
            out_specs=pl.BlockSpec((1, NC, HW), bmap3),
            scratch_shapes=[
                pltpu.VMEM((h3 * C, W), jnp.float32),
                pltpu.VMEM((h4 * C, W), jnp.float32),
                pltpu.VMEM((h5 * C, W), jnp.float32),
                pltpu.VMEM((C, HW), jnp.float32),
                pltpu.VMEM((2 * C, HW), jnp.float32),
            ],
        ),
        compiler_params=pltpu.CompilerParams(dimension_semantics=("parallel",)),
    )(w_norm, p2f, c2f, x3, x4, x5, awt3, awt4, awt5,
      masks, wtaps, bn_s[:, None], bn_b[:, None], wh, bh[:, None])

    # free reshape back to (B, NC, H, W) to match the PyTorch convention
    return out_flat.reshape(B, NC, H, W)


# ----------------------------------------------------------------------------
# Pure-JAX reference (same inference semantics) for verification.
# ----------------------------------------------------------------------------
def reference_forward(pyramid_features_nchw, c2_nchw, params):
    p2, p3, p4, p5 = [jnp.transpose(f, (0, 2, 3, 1)) for f in pyramid_features_nchw]
    c2 = jnp.transpose(c2_nchw, (0, 2, 3, 1))
    B, H, W, C = p2.shape
    NC = params["b2"].shape[0]

    def up(f):
        m = bilinear_2d_matrix(H, W, f.shape[1], f.shape[2])
        ff = f.reshape(B, f.shape[1] * f.shape[2], C)
        return jnp.einsum('pq,bqc->bpc', m, ff).reshape(B, H, W, C)

    wn = jax.nn.softmax(params["w_logits"])
    fused = wn[0] * p2 + wn[1] * up(p3) + wn[2] * up(p4) + wn[3] * up(p5)

    w1_hwio = jnp.transpose(params["W1"], (2, 3, 1, 0))
    y = jax.lax.conv_general_dilated(fused, w1_hwio, (1, 1), 'SAME',
                                     dimension_numbers=('NHWC', 'HWIO', 'NHWC'))
    y = y + params["b1"]
    eps = 1e-5
    bn_scale = params["gamma"] / jnp.sqrt(params["run_var"] + eps)
    bn_shift = params["beta"] - params["run_mean"] * bn_scale
    y = jnp.maximum(y * bn_scale + bn_shift, 0.0)

    k2 = params["W2"].reshape(NC, C).T
    kc2 = params["Wc2"].reshape(NC, C).T
    pf = jnp.einsum('bhwc,cn->bhwn', y, k2) + params["b2"]
    pc = jnp.einsum('bhwc,cn->bhwn', c2, kc2) + params["bc2"]
    return jnp.transpose(pf + pc, (0, 3, 1, 2))


# ----------------------------------------------------------------------------
if __name__ == "__main__":
    B, C, NC = 2, 32, 4          # in_channels=32 (small test size), num_classes=4
    H = W = 16

    key = jax.random.PRNGKey(0)
    ks = jax.random.split(key, 16)

    # deterministic parameter init (shapes follow the PyTorch __init__)
    params = {
        "w_logits": jnp.ones((4,), jnp.float32),                           # nn.Parameter(torch.ones(4))
        "W1": jax.random.normal(ks[0], (C, C, 3, 3), jnp.float32) * 0.05,  # fuse conv 3x3
        "b1": jax.random.normal(ks[1], (C,), jnp.float32) * 0.05,
        "gamma": 1.0 + 0.1 * jax.random.normal(ks[2], (C,), jnp.float32),  # BatchNorm weight
        "beta": 0.1 * jax.random.normal(ks[3], (C,), jnp.float32),         # BatchNorm bias
        "run_mean": 0.1 * jax.random.normal(ks[4], (C,), jnp.float32),
        "run_var": jnp.abs(jax.random.normal(ks[5], (C,), jnp.float32)) + 0.5,
        "W2": jax.random.normal(ks[6], (NC, C, 1, 1), jnp.float32) * 0.05,   # fuse conv 1x1
        "b2": jax.random.normal(ks[7], (NC,), jnp.float32) * 0.05,
        "Wc2": jax.random.normal(ks[8], (NC, C, 1, 1), jnp.float32) * 0.05,  # c2_conv 1x1
        "bc2": jax.random.normal(ks[9], (NC,), jnp.float32) * 0.05,
    }

    # inputs in PyTorch NCHW convention (FPN pyramid at decreasing resolutions)
    p2 = jax.random.normal(ks[10], (B, C, H, W), jnp.float32)
    p3 = jax.random.normal(ks[11], (B, C, H // 2, W // 2), jnp.float32)
    p4 = jax.random.normal(ks[12], (B, C, H // 4, W // 4), jnp.float32)
    p5 = jax.random.normal(ks[13], (B, C, H // 8, W // 8), jnp.float32)
    c2 = jax.random.normal(ks[14], (B, C, H, W), jnp.float32)

    out = fpn_head_forward([p2, p3, p4, p5], c2, params)
    out = jax.block_until_ready(out)

    ref = jax.block_until_ready(reference_forward([p2, p3, p4, p5], c2, params))

    assert out.shape == (B, NC, H, W), f"bad output shape {out.shape}"
    if not np.allclose(np.asarray(out), np.asarray(ref), atol=2e-3, rtol=2e-3):
        raise AssertionError("Pallas kernel output does not match JAX reference")

    print("KERNEL_OK")
</pallas_src>

<mosaic_0001>
module attributes {stable_mosaic.version = 11 : i64} {
  func.func @_fpn_head_kernel(%arg0: i32, %arg1: memref<4xf32, #tpu.memory_space<smem>>, %arg2: memref<1x32x256xf32, #tpu.memory_space<vmem>>, %arg3: memref<1x32x256xf32, #tpu.memory_space<vmem>>, %arg4: memref<1x256x8xf32, #tpu.memory_space<vmem>>, %arg5: memref<1x128x4xf32, #tpu.memory_space<vmem>>, %arg6: memref<1x64x2xf32, #tpu.memory_space<vmem>>, %arg7: memref<8x16xf32, #tpu.memory_space<vmem>>, %arg8: memref<4x16xf32, #tpu.memory_space<vmem>>, %arg9: memref<2x16xf32, #tpu.memory_space<vmem>>, %arg10: memref<8x256xf32, #tpu.memory_space<vmem>>, %arg11: memref<9x32x32xf32, #tpu.memory_space<vmem>>, %arg12: memref<32x1xf32, #tpu.memory_space<vmem>>, %arg13: memref<32x1xf32, #tpu.memory_space<vmem>>, %arg14: memref<4x64xf32, #tpu.memory_space<vmem>>, %arg15: memref<4x1xf32, #tpu.memory_space<vmem>>, %arg16: memref<1x4x256xf32, #tpu.memory_space<vmem>>, %arg17: memref<256x16xf32, #tpu.memory_space<vmem>>, %arg18: memref<128x16xf32, #tpu.memory_space<vmem>>, %arg19: memref<64x16xf32, #tpu.memory_space<vmem>>, %arg20: memref<32x256xf32, #tpu.memory_space<vmem>>, %arg21: memref<64x256xf32, #tpu.memory_space<vmem>>) attributes {dimension_semantics = [#tpu.dimension_semantics<parallel>], iteration_bounds = array<i64: 2>, scalar_prefetch = 0 : i64, scratch_operands = 5 : i64, tpu.core_type = #tpu.core_type<tc>, window_params = [{transform_indices = @transform_0, window_bounds = array<i64: 4>}, {transform_indices = @transform_1, window_bounds = array<i64: 1, 32, 256>}, {transform_indices = @transform_2, window_bounds = array<i64: 1, 32, 256>}, {transform_indices = @transform_3, window_bounds = array<i64: 1, 256, 8>}, {transform_indices = @transform_4, window_bounds = array<i64: 1, 128, 4>}, {transform_indices = @transform_5, window_bounds = array<i64: 1, 64, 2>}, {pipeline_mode = #tpu.pipeline_mode<synchronous>, transform_indices = @transform_6, window_bounds = array<i64: 8, 16>}, {pipeline_mode = #tpu.pipeline_mode<synchronous>, transform_indices = @transform_7, window_bounds = array<i64: 4, 16>}, {pipeline_mode = #tpu.pipeline_mode<synchronous>, transform_indices = @transform_8, window_bounds = array<i64: 2, 16>}, {pipeline_mode = #tpu.pipeline_mode<synchronous>, transform_indices = @transform_9, window_bounds = array<i64: 8, 256>}, {pipeline_mode = #tpu.pipeline_mode<synchronous>, transform_indices = @transform_10, window_bounds = array<i64: 9, 32, 32>}, {pipeline_mode = #tpu.pipeline_mode<synchronous>, transform_indices = @transform_11, window_bounds = array<i64: 32, 1>}, {pipeline_mode = #tpu.pipeline_mode<synchronous>, transform_indices = @transform_12, window_bounds = array<i64: 32, 1>}, {pipeline_mode = #tpu.pipeline_mode<synchronous>, transform_indices = @transform_13, window_bounds = array<i64: 4, 64>}, {pipeline_mode = #tpu.pipeline_mode<synchronous>, transform_indices = @transform_14, window_bounds = array<i64: 4, 1>}, {transform_indices = @transform_15, window_bounds = array<i64: 1, 4, 256>}]} {
    %c0 = arith.constant 0 : index
    %c0_0 = arith.constant 0 : index
    %c0_1 = arith.constant 0 : index
    %0 = vector.load %arg4[%c0, %c0_0, %c0_1] : memref<1x256x8xf32, #tpu.memory_space<vmem>>, vector<1x256x8xf32>
    %1 = vector.shape_cast %0 : vector<1x256x8xf32> to vector<256x8xf32>
    %c0_2 = arith.constant 0 : index
    %c0_3 = arith.constant 0 : index
    %2 = vector.load %arg7[%c0_2, %c0_3] : memref<8x16xf32, #tpu.memory_space<vmem>>, vector<8x16xf32>
    %cst = arith.constant dense<0.000000e+00> : vector<256x16xf32>
    %3 = tpu.matmul %1, %2, %cst {dimension_numbers = #tpu.dot_dimension_numbers<[1], [0], [0], [1], [0, 0, 1, 1], [], []>} : vector<256x8xf32>, vector<8x16xf32>, vector<256x16xf32> -> vector<256x16xf32>
    %c0_4 = arith.constant 0 : index
    %c0_5 = arith.constant 0 : index
    %4 = vector.load %arg17[%c0_4, %c0_5] : memref<256x16xf32, #tpu.memory_space<vmem>>, vector<256x16xf32>
    tpu.vector_store %arg17[%c0_4, %c0_5], %3 {strides = array<i32>} : memref<256x16xf32, #tpu.memory_space<vmem>>, vector<256x16xf32>,
    %c0_6 = arith.constant 0 : index
    %c0_7 = arith.constant 0 : index
    %c0_8 = arith.constant 0 : index
    %5 = vector.load %arg5[%c0_6, %c0_7, %c0_8] : memref<1x128x4xf32, #tpu.memory_space<vmem>>, vector<1x128x4xf32>
    %6 = vector.shape_cast %5 : vector<1x128x4xf32> to vector<128x4xf32>
    %c0_9 = arith.constant 0 : index
    %c0_10 = arith.constant 0 : index
    %7 = vector.load %arg8[%c0_9, %c0_10] : memref<4x16xf32, #tpu.memory_space<vmem>>, vector<4x16xf32>
    %cst_11 = arith.constant dense<0.000000e+00> : vector<128x16xf32>
    %8 = tpu.matmul %6, %7, %cst_11 {dimension_numbers = #tpu.dot_dimension_numbers<[1], [0], [0], [1], [0, 0, 1, 1], [], []>} : vector<128x4xf32>, vector<4x16xf32>, vector<128x16xf32> -> vector<128x16xf32>
    %c0_12 = arith.constant 0 : index
    %c0_13 = arith.constant 0 : index
    %9 = vector.load %arg18[%c0_12, %c0_13] : memref<128x16xf32, #tpu.memory_space<vmem>>, vector<128x16xf32>
    tpu.vector_store %arg18[%c0_12, %c0_13], %8 {strides = array<i32>} : memref<128x16xf32, #tpu.memory_space<vmem>>, vector<128x16xf32>,
    %c0_14 = arith.constant 0 : index
    %c0_15 = arith.constant 0 : index
    %c0_16 = arith.constant 0 : index
    %10 = vector.load %arg6[%c0_14, %c0_15, %c0_16] : memref<1x64x2xf32, #tpu.memory_space<vmem>>, vector<1x64x2xf32>
    %11 = vector.shape_cast %10 : vector<1x64x2xf32> to vector<64x2xf32>
    %c0_17 = arith.constant 0 : index
    %c0_18 = arith.constant 0 : index
    %12 = vector.load %arg9[%c0_17, %c0_18] : memref<2x16xf32, #tpu.memory_space<vmem>>, vector<2x16xf32>
    %cst_19 = arith.constant dense<0.000000e+00> : vector<64x16xf32>
    %13 = tpu.matmul %11, %12, %cst_19 {dimension_numbers = #tpu.dot_dimension_numbers<[1], [0], [0], [1], [0, 0, 1, 1], [], []>} : vector<64x2xf32>, vector<2x16xf32>, vector<64x16xf32> -> vector<64x16xf32>
    %c0_20 = arith.constant 0 : index
    %c0_21 = arith.constant 0 : index
    %14 = vector.load %arg19[%c0_20, %c0_21] : memref<64x16xf32, #tpu.memory_space<vmem>>, vector<64x16xf32>
    tpu.vector_store %arg19[%c0_20, %c0_21], %13 {strides = array<i32>} : memref<64x16xf32, #tpu.memory_space<vmem>>, vector<64x16xf32>,
    %c0_22 = arith.constant 0 : index
    %15 = memref.load %arg1[%c0_22] : memref<4xf32, #tpu.memory_space<smem>>
    %c0_23 = arith.constant 0 : index
    %c0_24 = arith.constant 0 : index
    %c0_25 = arith.constant 0 : index
    %16 = vector.load %arg2[%c0_23, %c0_24, %c0_25] : memref<1x32x256xf32, #tpu.memory_space<vmem>>, vector<1x32x16xf32>
    %17 = vector.shape_cast %16 : vector<1x32x16xf32> to vector<32x16xf32>
    %18 = vector.broadcast %15 : f32 to vector<32x16xf32>
    %19 = arith.mulf %18, %17 : vector<32x16xf32>
    %c0_26 = arith.constant 0 : index
    %c0_27 = arith.constant 0 : index
    %20 = vector.load %arg17[%c0_26, %c0_27] : memref<256x16xf32, #tpu.memory_space<vmem>>, vector<32x16xf32>
    %cst_28 = arith.constant 1.000000e+00 : f32
    %21 = vector.broadcast %cst_28 : f32 to vector<32x16xf32>
    %22 = arith.mulf %21, %20 : vector<32x16xf32>
    %23 = arith.addf %19, %22 : vector<32x16xf32>
    %c0_29 = arith.constant 0 : index
    %c0_30 = arith.constant 0 : index
    %24 = vector.load %arg18[%c0_29, %c0_30] : memref<128x16xf32, #tpu.memory_space<vmem>>, vector<32x16xf32>
    %cst_31 = arith.constant 1.000000e+00 : f32
    %25 = vector.broadcast %cst_31 : f32 to vector<32x16xf32>
    %26 = arith.mulf %25, %24 : vector<32x16xf32>
    %27 = arith.addf %23, %26 : vector<32x16xf32>
    %c0_32 = arith.constant 0 : index
    %c0_33 = arith.constant 0 : index
    %28 = vector.load %arg19[%c0_32, %c0_33] : memref<64x16xf32, #tpu.memory_space<vmem>>, vector<32x16xf32>
    %cst_34 = arith.constant 1.000000e+00 : f32
    %29 = vector.broadcast %cst_34 : f32 to vector<32x16xf32>
    %30 = arith.mulf %29, %28 : vector<32x16xf32>
    %31 = arith.addf %27, %30 : vector<32x16xf32>
    %c0_35 = arith.constant 0 : index
    %c0_36 = arith.constant 0 : index
    %32 = vector.load %arg20[%c0_35, %c0_36] : memref<32x256xf32, #tpu.memory_space<vmem>>, vector<32x16xf32>
    tpu.vector_store %arg20[%c0_35, %c0_36], %31 {strides = array<i32>} : memref<32x256xf32, #tpu.memory_space<vmem>>, vector<32x16xf32>,
    %c0_37 = arith.constant 0 : index
    %c0_38 = arith.constant 0 : index
    %c16 = arith.constant 16 : index
    %33 = vector.load %arg2[%c0_37, %c0_38, %c16] : memref<1x32x256xf32, #tpu.memory_space<vmem>>, vector<1x32x16xf32>
    %34 = vector.shape_cast %33 : vector<1x32x16xf32> to vector<32x16xf32>
    %35 = vector.broadcast %15 : f32 to vector<32x16xf32>
    %36 = arith.mulf %35, %34 : vector<32x16xf32>
    %c0_39 = arith.constant 0 : index
    %c0_40 = arith.constant 0 : index
    %37 = vector.load %arg17[%c0_39, %c0_40] : memref<256x16xf32, #tpu.memory_space<vmem>>, vector<32x16xf32>
    %cst_41 = arith.constant 7.500000e-01 : f32
    %38 = vector.broadcast %cst_41 : f32 to vector<32x16xf32>
    %39 = arith.mulf %38, %37 : vector<32x16xf32>
    %40 = arith.addf %36, %39 : vector<32x16xf32>
    %c32 = arith.constant 32 : index
    %c0_42 = arith.constant 0 : index
    %41 = vector.load %arg17[%c32, %c0_42] : memref<256x16xf32, #tpu.memory_space<vmem>>, vector<32x16xf32>
    %cst_43 = arith.constant 2.500000e-01 : f32
    %42 = vector.broadcast %cst_43 : f32 to vector<32x16xf32>
    %43 = arith.mulf %42, %41 : vector<32x16xf32>
    %44 = arith.addf %40, %43 : vector<32x16xf32>
    %c0_44 = arith.constant 0 : index
    %c0_45 = arith.constant 0 : index
    %45 = vector.load %arg18[%c0_44, %c0_45] : memref<128x16xf32, #tpu.memory_space<vmem>>, vector<32x16xf32>
    %cst_46 = arith.constant 1.000000e+00 : f32
    %46 = vector.broadcast %cst_46 : f32 to vector<32x16xf32>
    %47 = arith.mulf %46, %45 : vector<32x16xf32>
    %48 = arith.addf %44, %47 : vector<32x16xf32>
    %c0_47 = arith.constant 0 : index
    %c0_48 = arith.constant 0 : index
    %49 = vector.load %arg19[%c0_47, %c0_48] : memref<64x16xf32, #tpu.memory_space<vmem>>, vector<32x16xf32>
    %cst_49 = arith.constant 1.000000e+00 : f32
    %50 = vector.broadcast %cst_49 : f32 to vector<32x16xf32>
    %51 = arith.mulf %50, %49 : vector<32x16xf32>
    %52 = arith.addf %48, %51 : vector<32x16xf32>
    %c0_50 = arith.constant 0 : index
    %c16_51 = arith.constant 16 : index
    %53 = vector.load %arg20[%c0_50, %c16_51] : memref<32x256xf32, #tpu.memory_space<vmem>>, vector<32x16xf32>
    tpu.vector_store %arg20[%c0_50, %c16_51], %52 {strides = array<i32>} : memref<32x256xf32, #tpu.memory_space<vmem>>, vector<32x16xf32>,
    %c0_52 = arith.constant 0 : index
    %c0_53 = arith.constant 0 : index
    %c32_54 = arith.constant 32 : index
    %54 = vector.load %arg2[%c0_52, %c0_53, %c32_54] : memref<1x32x256xf32, #tpu.memory_space<vmem>>, vector<1x32x16xf32>
    %55 = vector.shape_cast %54 : vector<1x32x16xf32> to vector<32x16xf32>
    %56 = vector.broadcast %15 : f32 to vector<32x16xf32>
    %57 = arith.mulf %56, %55 : vector<32x16xf32>
    %c0_55 = arith.constant 0 : index
    %c0_56 = arith.constant 0 : index
    %58 = vector.load %arg17[%c0_55, %c0_56] : memref<256x16xf32, #tpu.memory_space<vmem>>, vector<32x16xf32>
    %cst_57 = arith.constant 2.500000e-01 : f32
    %59 = vector.broadcast %cst_57 : f32 to vector<32x16xf32>
    %60 = arith.mulf %59, %58 : vector<32x16xf32>
    %61 = arith.addf %57, %60 : vector<32x16xf32>
    %c32_58 = arith.constant 32 : index
    %c0_59 = arith.constant 0 : index
    %62 = vector.load %arg17[%c32_58, %c0_59] : memref<256x16xf32, #tpu.memory_space<vmem>>, vector<32x16xf32>
    %cst_60 = arith.constant 7.500000e-01 : f32
    %63 = vector.broadcast %cst_60 : f32 to vector<32x16xf32>
    %64 = arith.mulf %63, %62 : vector<32x16xf32>
    %65 = arith.addf %61, %64 : vector<32x16xf32>
    %c0_61 = arith.constant 0 : index
    %c0_62 = arith.constant 0 : index
    %66 = vector.load %arg18[%c0_61, %c0_62] : memref<128x16xf32, #tpu.memory_space<vmem>>, vector<32x16xf32>
    %cst_63 = arith.constant 8.750000e-01 : f32
    %67 = vector.broadcast %cst_63 : f32 to vector<32x16xf32>
    %68 = arith.mulf %67, %66 : vector<32x16xf32>
    %69 = arith.addf %65, %68 : vector<32x16xf32>
    %c32_64 = arith.constant 32 : index
    %c0_65 = arith.constant 0 : index
    %70 = vector.load %arg18[%c32_64, %c0_65] : memref<128x16xf32, #tpu.memory_space<vmem>>, vector<32x16xf32>
    %cst_66 = arith.constant 1.250000e-01 : f32
    %71 = vector.broadcast %cst_66 : f32 to vector<32x16xf32>
    %72 = arith.mulf %71, %70 : vector<32x16xf32>
    %73 = arith.addf %69, %72 : vector<32x16xf32>
    %c0_67 = arith.constant 0 : index
    %c0_68 = arith.constant 0 : index
    %74 = vector.load %arg19[%c0_67, %c0_68] : memref<64x16xf32, #tpu.memory_space<vmem>>, vector<32x16xf32>
    %cst_69 = arith.constant 1.000000e+00 : f32
    %75 = vector.broadcast %cst_69 : f32 to vector<32x16xf32>
    %76 = arith.mulf %75, %74 : vector<32x16xf32>
    %77 = arith.addf %73, %76 : vector<32x16xf32>
    %c0_70 = arith.constant 0 : index
    %c32_71 = arith.constant 32 : index
    %78 = vector.load %arg20[%c0_70, %c32_71] : memref<32x256xf32, #tpu.memory_space<vmem>>, vector<32x16xf32>
    tpu.vector_store %arg20[%c0_70, %c32_71], %77 {strides = array<i32>} : memref<32x256xf32, #tpu.memory_space<vmem>>, vector<32x16xf32>,
    %c0_72 = arith.constant 0 : index
    %c0_73 = arith.constant 0 : index
    %c48 = arith.constant 48 : index
    %79 = vector.load %arg2[%c0_72, %c0_73, %c48] : memref<1x32x256xf32, #tpu.memory_space<vmem>>, vector<1x32x16xf32>
    %80 = vector.shape_cast %79 : vector<1x32x16xf32> to vector<32x16xf32>
    %81 = vector.broadcast %15 : f32 to vector<32x16xf32>
    %82 = arith.mulf %81, %80 : vector<32x16xf32>
    %c32_74 = arith.constant 32 : index
    %c0_75 = arith.constant 0 : index
    %83 = vector.load %arg17[%c32_74, %c0_75] : memref<256x16xf32, #tpu.memory_space<vmem>>, vector<32x16xf32>
    %cst_76 = arith.constant 7.500000e-01 : f32
    %84 = vector.broadcast %cst_76 : f32 to vector<32x16xf32>
    %85 = arith.mulf %84, %83 : vector<32x16xf32>
    %86 = arith.addf %82, %85 : vector<32x16xf32>
    %c64 = arith.constant 64 : index
    %c0_77 = arith.constant 0 : index
    %87 = vector.load %arg17[%c64, %c0_77] : memref<256x16xf32, #tpu.memory_space<vmem>>, vector<32x16xf32>
    %cst_78 = arith.constant 2.500000e-01 : f32
    %88 = vector.broadcast %cst_78 : f32 to vector<32x16xf32>
    %89 = arith.mulf %88, %87 : vector<32x16xf32>
    %90 = arith.addf %86, %89 : vector<32x16xf32>
    %c0_79 = arith.constant 0 : index
    %c0_80 = arith.constant 0 : index
    %91 = vector.load %arg18[%c0_79, %c0_80] : memref<128x16xf32, #tpu.memory_space<vmem>>, vector<32x16xf32>
    %cst_81 = arith.constant 6.250000e-01 : f32
    %92 = vector.broadcast %cst_81 : f32 to vector<32x16xf32>
    %93 = arith.mulf %92, %91 : vector<32x16xf32>
    %94 = arith.addf %90, %93 : vector<32x16xf32>
    %c32_82 = arith.constant 32 : index
    %c0_83 = arith.constant 0 : index
    %95 = vector.load %arg18[%c32_82, %c0_83] : memref<128x16xf32, #tpu.memory_space<vmem>>, vector<32x16xf32>
    %cst_84 = arith.constant 3.750000e-01 : f32
    %96 = vector.broadcast %cst_84 : f32 to vector<32x16xf32>
    %97 = arith.mulf %96, %95 : vector<32x16xf32>
    %98 = arith.addf %94, %97 : vector<32x16xf32>
    %c0_85 = arith.constant 0 : index
    %c0_86 = arith.constant 0 : index
    %99 = vector.load %arg19[%c0_85, %c0_86] : memref<64x16xf32, #tpu.memory_space<vmem>>, vector<32x16xf32>
    %cst_87 = arith.constant 1.000000e+00 : f32
    %100 = vector.broadcast %cst_87 : f32 to vector<32x16xf32>
    %101 = arith.mulf %100, %99 : vector<32x16xf32>
    %102 = arith.addf %98, %101 : vector<32x16xf32>
    %c0_88 = arith.constant 0 : index
    %c48_89 = arith.constant 48 : index
    %103 = vector.load %arg20[%c0_88, %c48_89] : memref<32x256xf32, #tpu.memory_space<vmem>>, vector<32x16xf32>
    tpu.vector_store %arg20[%c0_88, %c48_89], %102 {strides = array<i32>} : memref<32x256xf32, #tpu.memory_space<vmem>>, vector<32x16xf32>,
    %c0_90 = arith.constant 0 : index
    %c0_91 = arith.constant 0 : index
    %c64_92 = arith.constant 64 : index
    %104 = vector.load %arg2[%c0_90, %c0_91, %c64_92] : memref<1x32x256xf32, #tpu.memory_space<vmem>>, vector<1x32x16xf32>
    %105 = vector.shape_cast %104 : vector<1x32x16xf32> to vector<32x16xf32>
    %106 = vector.broadcast %15 : f32 to vector<32x16xf32>
    %107 = arith.mulf %106, %105 : vector<32x16xf32>
    %c32_93 = arith.constant 32 : index
    %c0_94 = arith.constant 0 : index
    %108 = vector.load %arg17[%c32_93, %c0_94] : memref<256x16xf32, #tpu.memory_space<vmem>>, vector<32x16xf32>
    %cst_95 = arith.constant 2.500000e-01 : f32
    %109 = vector.broadcast %cst_95 : f32 to vector<32x16xf32>
    %110 = arith.mulf %109, %108 : vector<32x16xf32>
    %111 = arith.addf %107, %110 : vector<32x16xf32>
    %c64_96 = arith.constant 64 : index
    %c0_97 = arith.constant 0 : index
    %112 = vector.load %arg17[%c64_96, %c0_97] : memref<256x16xf32, #tpu.memory_space<vmem>>, vector<32x16xf32>
    %cst_98 = arith.constant 7.500000e-01 : f32
    %113 = vector.broadcast %cst_98 : f32 to vector<32x16xf32>
    %114 = arith.mulf %113, %112 : vector<32x16xf32>
    %115 = arith.addf %111, %114 : vector<32x16xf32>
    %c0_99 = arith.constant 0 : index
    %c0_100 = arith.constant 0 : index
    %116 = vector.load %arg18[%c0_99, %c0_100] : memref<128x16xf32, #tpu.memory_space<vmem>>, vector<32x16xf32>
    %cst_101 = arith.constant 3.750000e-01 : f32
    %117 = vector.broadcast %cst_101 : f32 to vector<32x16xf32>
    %118 = arith.mulf %117, %116 : vector<32x16xf32>
    %119 = arith.addf %115, %118 : vector<32x16xf32>
    %c32_102 = arith.constant 32 : index
    %c0_103 = arith.constant 0 : index
    %120 = vector.load %arg18[%c32_102, %c0_103] : memref<128x16xf32, #tpu.memory_space<vmem>>, vector<32x16xf32>
    %cst_104 = arith.constant 6.250000e-01 : f32
    %121 = vector.broadcast %cst_104 : f32 to vector<32x16xf32>
    %122 = arith.mulf %121, %120 : vector<32x16xf32>
    %123 = arith.addf %119, %122 : vector<32x16xf32>
    %c0_105 = arith.constant 0 : index
    %c0_106 = arith.constant 0 : index
    %124 = vector.load %arg19[%c0_105, %c0_106] : memref<64x16xf32, #tpu.memory_space<vmem>>, vector<32x16xf32>
    %cst_107 = arith.constant 9.375000e-01 : f32
    %125 = vector.broadcast %cst_107 : f32 to vector<32x16xf32>
    %126 = arith.mulf %125, %124 : vector<32x16xf32>
    %127 = arith.addf %123, %126 : vector<32x16xf32>
    %c32_108 = arith.constant 32 : index
    %c0_109 = arith.constant 0 : index
    %128 = vector.load %arg19[%c32_108, %c0_109] : memref<64x16xf32, #tpu.memory_space<vmem>>, vector<32x16xf32>
    %cst_110 = arith.constant 6.250000e-02 : f32
    %129 = vector.broadcast %cst_110 : f32 to vector<32x16xf32>
    %130 = arith.mulf %129, %128 : vector<32x16xf32>
    %131 = arith.addf %127, %130 : vector<32x16xf32>
    %c0_111 = arith.constant 0 : index
    %c64_112 = arith.constant 64 : index
    %132 = vector.load %arg20[%c0_111, %c64_112] : memref<32x256xf32, #tpu.memory_space<vmem>>, vector<32x16xf32>
    tpu.vector_store %arg20[%c0_111, %c64_112], %131 {strides = array<i32>} : memref<32x256xf32, #tpu.memory_space<vmem>>, vector<32x16xf32>,
    %c0_113 = arith.constant 0 : index
    %c0_114 = arith.constant 0 : index
    %c80 = arith.constant 80 : index
    %133 = vector.load %arg2[%c0_113, %c0_114, %c80] : memref<1x32x256xf32, #tpu.memory_space<vmem>>, vector<1x32x16xf32>
    %134 = vector.shape_cast %133 : vector<1x32x16xf32> to vector<32x16xf32>
    %135 = vector.broadcast %15 : f32 to vector<32x16xf32>
    %136 = arith.mulf %135, %134 : vector<32x16xf32>
    %c64_115 = arith.constant 64 : index
    %c0_116 = arith.constant 0 : index
    %137 = vector.load %arg17[%c64_115, %c0_116] : memref<256x16xf32, #tpu.memory_space<vmem>>, vector<32x16xf32>
    %cst_117 = arith.constant 7.500000e-01 : f32
    %138 = vector.broadcast %cst_117 : f32 to vector<32x16xf32>
    %139 = arith.mulf %138, %137 : vector<32x16xf32>
    %140 = arith.addf %136, %139 : vector<32x16xf32>
    %c96 = arith.constant 96 : index
    %c0_118 = arith.constant 0 : index
    %141 = vector.load %arg17[%c96, %c0_118] : memref<256x16xf32, #tpu.memory_space<vmem>>, vector<32x16xf32>
    %cst_119 = arith.constant 2.500000e-01 : f32
    %142 = vector.broadcast %cst_119 : f32 to vector<32x16xf32>
    %143 = arith.mulf %142, %141 : vector<32x16xf32>
    %144 = arith.addf %140, %143 : vector<32x16xf32>
    %c0_120 = arith.constant 0 : index
    %c0_121 = arith.constant 0 : index
    %145 = vector.load %arg18[%c0_120, %c0_121] : memref<128x16xf32, #tpu.memory_space<vmem>>, vector<32x16xf32>
    %cst_122 = arith.constant 1.250000e-01 : f32
    %146 = vector.broadcast %cst_122 : f32 to vector<32x16xf32>
    %147 = arith.mulf %146, %145 : vector<32x16xf32>
    %148 = arith.addf %144, %147 : vector<32x16xf32>
    %c32_123 = arith.constant 32 : index
    %c0_124 = arith.constant 0 : index
    %149 = vector.load %arg18[%c32_123, %c0_124] : memref<128x16xf32, #tpu.memory_space<vmem>>, vector<32x16xf32>
    %cst_125 = arith.constant 8.750000e-01 : f32
    %150 = vector.broadcast %cst_125 : f32 to vector<32x16xf32>
    %151 = arith.mulf %150, %149 : vector<32x16xf32>
    %152 = arith.addf %148, %151 : vector<32x16xf32>
    %c0_126 = arith.constant 0 : index
    %c0_127 = arith.constant 0 : index
    %153 = vector.load %arg19[%c0_126, %c0_127] : memref<64x16xf32, #tpu.memory_space<vmem>>, vector<32x16xf32>
    %cst_128 = arith.constant 8.125000e-01 : f32
    %154 = vector.broadcast %cst_128 : f32 to vector<32x16xf32>
    %155 = arith.mulf %154, %153 : vector<32x16xf32>
    %156 = arith.addf %152, %155 : vector<32x16xf32>
    %c32_129 = arith.constant 32 : index
    %c0_130 = arith.constant 0 : index
    %157 = vector.load %arg19[%c32_129, %c0_130] : memref<64x16xf32, #tpu.memory_space<vmem>>, vector<32x16xf32>
    %cst_131 = arith.constant 1.875000e-01 : f32
    %158 = vector.broadcast %cst_131 : f32 to vector<32x16xf32>
    %159 = arith.mulf %158, %157 : vector<32x16xf32>
    %160 = arith.addf %156, %159 : vector<32x16xf32>
    %c0_132 = arith.constant 0 : index
    %c80_133 = arith.constant 80 : index
    %161 = vector.load %arg20[%c0_132, %c80_133] : memref<32x256xf32, #tpu.memory_space<vmem>>, vector<32x16xf32>
    tpu.vector_store %arg20[%c0_132, %c80_133], %160 {strides = array<i32>} : memref<32x256xf32, #tpu.memory_space<vmem>>, vector<32x16xf32>,
    %c0_134 = arith.constant 0 : index
    %c0_135 = arith.constant 0 : index
    %c96_136 = arith.constant 96 : index
    %162 = vector.load %arg2[%c0_134, %c0_135, %c96_136] : memref<1x32x256xf32, #tpu.memory_space<vmem>>, vector<1x32x16xf32>
    %163 = vector.shape_cast %162 : vector<1x32x16xf32> to vector<32x16xf32>
    %164 = vector.broadcast %15 : f32 to vector<32x16xf32>
    %165 = arith.mulf %164, %163 : vector<32x16xf32>
    %c64_137 = arith.constant 64 : index
    %c0_138 = arith.constant 0 : index
    %166 = vector.load %arg17[%c64_137, %c0_138] : memref<256x16xf32, #tpu.memory_space<vmem>>, vector<32x16xf32>
    %cst_139 = arith.constant 2.500000e-01 : f32
    %167 = vector.broadcast %cst_139 : f32 to vector<32x16xf32>
    %168 = arith.mulf %167, %166 : vector<32x16xf32>
    %169 = arith.addf %165, %168 : vector<32x16xf32>
    %c96_140 = arith.constant 96 : index
    %c0_141 = arith.constant 0 : index
    %170 = vector.load %arg17[%c96_140, %c0_141] : memref<256x16xf32, #tpu.memory_space<vmem>>, vector<32x16xf32>
    %cst_142 = arith.constant 7.500000e-01 : f32
    %171 = vector.broadcast %cst_142 : f32 to vector<32x16xf32>
    %172 = arith.mulf %171, %170 : vector<32x16xf32>
    %173 = arith.addf %169, %172 : vector<32x16xf32>
    %c32_143 = arith.constant 32 : index
    %c0_144 = arith.constant 0 : index
    %174 = vector.load %arg18[%c32_143, %c0_144] : memref<128x16xf32, #tpu.memory_space<vmem>>, vector<32x16xf32>
    %cst_145 = arith.constant 8.750000e-01 : f32
    %175 = vector.broadcast %cst_145 : f32 to vector<32x16xf32>
    %176 = arith.mulf %175, %174 : vector<32x16xf32>
    %177 = arith.addf %173, %176 : vector<32x16xf32>
    %c64_146 = arith.constant 64 : index
    %c0_147 = arith.constant 0 : index
    %178 = vector.load %arg18[%c64_146, %c0_147] : memref<128x16xf32, #tpu.memory_space<vmem>>, vector<32x16xf32>
    %cst_148 = arith.constant 1.250000e-01 : f32
    %179 = vector.broadcast %cst_148 : f32 to vector<32x16xf32>
    %180 = arith.mulf %179, %178 : vector<32x16xf32>
    %181 = arith.addf %177, %180 : vector<32x16xf32>
    %c0_149 = arith.constant 0 : index
    %c0_150 = arith.constant 0 : index
    %182 = vector.load %arg19[%c0_149, %c0_150] : memref<64x16xf32, #tpu.memory_space<vmem>>, vector<32x16xf32>
    %cst_151 = arith.constant 6.875000e-01 : f32
    %183 = vector.broadcast %cst_151 : f32 to vector<32x16xf32>
    %184 = arith.mulf %183, %182 : vector<32x16xf32>
    %185 = arith.addf %181, %184 : vector<32x16xf32>
    %c32_152 = arith.constant 32 : index
    %c0_153 = arith.constant 0 : index
    %186 = vector.load %arg19[%c32_152, %c0_153] : memref<64x16xf32, #tpu.memory_space<vmem>>, vector<32x16xf32>
    %cst_154 = arith.constant 3.125000e-01 : f32
    %187 = vector.broadcast %cst_154 : f32 to vector<32x16xf32>
    %188 = arith.mulf %187, %186 : vector<32x16xf32>
    %189 = arith.addf %185, %188 : vector<32x16xf32>
    %c0_155 = arith.constant 0 : index
    %c96_156 = arith.constant 96 : index
    %190 = vector.load %arg20[%c0_155, %c96_156] : memref<32x256xf32, #tpu.memory_space<vmem>>, vector<32x16xf32>
    tpu.vector_store %arg20[%c0_155, %c96_156], %189 {strides = array<i32>} : memref<32x256xf32, #tpu.memory_space<vmem>>, vector<32x16xf32>,
    %c0_157 = arith.constant 0 : index
    %c0_158 = arith.constant 0 : index
    %c112 = arith.constant 112 : index
    %191 = vector.load %arg2[%c0_157, %c0_158, %c112] : memref<1x32x256xf32, #tpu.memory_space<vmem>>, vector<1x32x16xf32>
    %192 = vector.shape_cast %191 : vector<1x32x16xf32> to vector<32x16xf32>
    %193 = vector.broadcast %15 : f32 to vector<32x16xf32>
    %194 = arith.mulf %193, %192 : vector<32x16xf32>
    %c96_159 = arith.constant 96 : index
    %c0_160 = arith.constant 0 : index
    %195 = vector.load %arg17[%c96_159, %c0_160] : memref<256x16xf32, #tpu.memory_space<vmem>>, vector<32x16xf32>
    %cst_161 = arith.constant 7.500000e-01 : f32
    %196 = vector.broadcast %cst_161 : f32 to vector<32x16xf32>
    %197 = arith.mulf %196, %195 : vector<32x16xf32>
    %198 = arith.addf %194, %197 : vector<32x16xf32>
    %c128 = arith.constant 128 : index
    %c0_162 = arith.constant 0 : index
    %199 = vector.load %arg17[%c128, %c0_162] : memref<256x16xf32, #tpu.memory_space<vmem>>, vector<32x16xf32>
    %cst_163 = arith.constant 2.500000e-01 : f32
    %200 = vector.broadcast %cst_163 : f32 to vector<32x16xf32>
    %201 = arith.mulf %200, %199 : vector<32x16xf32>
    %202 = arith.addf %198, %201 : vector<32x16xf32>
    %c32_164 = arith.constant 32 : index
    %c0_165 = arith.constant 0 : index
    %203 = vector.load %arg18[%c32_164, %c0_165] : memref<128x16xf32, #tpu.memory_space<vmem>>, vector<32x16xf32>
    %cst_166 = arith.constant 6.250000e-01 : f32
    %204 = vector.broadcast %cst_166 : f32 to vector<32x16xf32>
    %205 = arith.mulf %204, %203 : vector<32x16xf32>
    %206 = arith.addf %202, %205 : vector<32x16xf32>
    %c64_167 = arith.constant 64 : index
    %c0_168 = arith.constant 0 : index
    %207 = vector.load %arg18[%c64_167, %c0_168] : memref<128x16xf32, #tpu.memory_space<vmem>>, vector<32x16xf32>
    %cst_169 = arith.constant 3.750000e-01 : f32
    %208 = vector.broadcast %cst_169 : f32 to vector<32x16xf32>
    %209 = arith.mulf %208, %207 : vector<32x16xf32>
    %210 = arith.addf %206, %209 : vector<32x16xf32>
    %c0_170 = arith.constant 0 : index
    %c0_171 = arith.constant 0 : index
    %211 = vector.load %arg19[%c0_170, %c0_171] : memref<64x16xf32, #tpu.memory_space<vmem>>, vector<32x16xf32>
    %cst_172 = arith.constant 5.625000e-01 : f32
    %212 = vector.broadcast %cst_172 : f32 to vector<32x16xf32>
    %213 = arith.mulf %212, %211 : vector<32x16xf32>
    %214 = arith.addf %210, %213 : vector<32x16xf32>
    %c32_173 = arith.constant 32 : index
    %c0_174 = arith.constant 0 : index
    %215 = vector.load %arg19[%c32_173, %c0_174] : memref<64x16xf32, #tpu.memory_space<vmem>>, vector<32x16xf32>
    %cst_175 = arith.constant 4.375000e-01 : f32
    %216 = vector.broadcast %cst_175 : f32 to vector<32x16xf32>
    %217 = arith.mulf %216, %215 : vector<32x16xf32>
    %218 = arith.addf %214, %217 : vector<32x16xf32>
    %c0_176 = arith.constant 0 : index
    %c112_177 = arith.constant 112 : index
    %219 = vector.load %arg20[%c0_176, %c112_177] : memref<32x256xf32, #tpu.memory_space<vmem>>, vector<32x16xf32>
    tpu.vector_store %arg20[%c0_176, %c112_177], %218 {strides = array<i32>} : memref<32x256xf32, #tpu.memory_space<vmem>>, vector<32x16xf32>,
    %c0_178 = arith.constant 0 : index
    %c0_179 = arith.constant 0 : index
    %c128_180 = arith.constant 128 : index
    %220 = vector.load %arg2[%c0_178, %c0_179, %c128_180] : memref<1x32x256xf32, #tpu.memory_space<vmem>>, vector<1x32x16xf32>
    %221 = vector.shape_cast %220 : vector<1x32x16xf32> to vector<32x16xf32>
    %222 = vector.broadcast %15 : f32 to vector<32x16xf32>
    %223 = arith.mulf %222, %221 : vector<32x16xf32>
    %c96_181 = arith.constant 96 : index
    %c0_182 = arith.constant 0 : index
    %224 = vector.load %arg17[%c96_181, %c0_182] : memref<256x16xf32, #tpu.memory_space<vmem>>, vector<32x16xf32>
    %cst_183 = arith.constant 2.500000e-01 : f32
    %225 = vector.broadcast %cst_183 : f32 to vector<32x16xf32>
    %226 = arith.mulf %225, %224 : vector<32x16xf32>
    %227 = arith.addf %223, %226 : vector<32x16xf32>
    %c128_184 = arith.constant 128 : index
    %c0_185 = arith.constant 0 : index
    %228 = vector.load %arg17[%c128_184, %c0_185] : memref<256x16xf32, #tpu.memory_space<vmem>>, vector<32x16xf32>
    %cst_186 = arith.constant 7.500000e-01 : f32
    %229 = vector.broadcast %cst_186 : f32 to vector<32x16xf32>
    %230 = arith.mulf %229, %228 : vector<32x16xf32>
    %231 = arith.addf %227, %230 : vector<32x16xf32>
    %c32_187 = arith.constant 32 : index
    %c0_188 = arith.constant 0 : index
    %232 = vector.load %arg18[%c32_187, %c0_188] : memref<128x16xf32, #tpu.memory_space<vmem>>, vector<32x16xf32>
    %cst_189 = arith.constant 3.750000e-01 : f32
    %233 = vector.broadcast %cst_189 : f32 to vector<32x16xf32>
    %234 = arith.mulf %233, %232 : vector<32x16xf32>
    %235 = arith.addf %231, %234 : vector<32x16xf32>
    %c64_190 = arith.constant 64 : index
    %c0_191 = arith.constant 0 : index
    %236 = vector.load %arg18[%c64_190, %c0_191] : memref<128x16xf32, #tpu.memory_space<vmem>>, vector<32x16xf32>
    %cst_192 = arith.constant 6.250000e-01 : f32
    %237 = vector.broadcast %cst_192 : f32 to vector<32x16xf32>
    %238 = arith.mulf %237, %236 : vector<32x16xf32>
    %239 = arith.addf %235, %238 : vector<32x16xf32>
    %c0_193 = arith.constant 0 : index
    %c0_194 = arith.constant 0 : index
    %240 = vector.load %arg19[%c0_193, %c0_194] : memref<64x16xf32, #tpu.memory_space<vmem>>, vector<32x16xf32>
    %cst_195 = arith.constant 4.375000e-01 : f32
    %241 = vector.broadcast %cst_195 : f32 to vector<32x16xf32>
    %242 = arith.mulf %241, %240 : vector<32x16xf32>
    %243 = arith.addf %239, %242 : vector<32x16xf32>
    %c32_196 = arith.constant 32 : index
    %c0_197 = arith.constant 0 : index
    %244 = vector.load %arg19[%c32_196, %c0_197] : memref<64x16xf32, #tpu.memory_space<vmem>>, vector<32x16xf32>
    %cst_198 = arith.constant 5.625000e-01 : f32
    %245 = vector.broadcast %cst_198 : f32 to vector<32x16xf32>
    %246 = arith.mulf %245, %244 : vector<32x16xf32>
    %247 = arith.addf %243, %246 : vector<32x16xf32>
    %c0_199 = arith.constant 0 : index
    %c128_200 = arith.constant 128 : index
    %248 = vector.load %arg20[%c0_199, %c128_200] : memref<32x256xf32, #tpu.memory_space<vmem>>, vector<32x16xf32>
    tpu.vector_store %arg20[%c0_199, %c128_200], %247 {strides = array<i32>} : memref<32x256xf32, #tpu.memory_space<vmem>>, vector<32x16xf32>,
    %c0_201 = arith.constant 0 : index
    %c0_202 = arith.constant 0 : index
    %c144 = arith.constant 144 : index
    %249 = vector.load %arg2[%c0_201, %c0_202, %c144] : memref<1x32x256xf32, #tpu.memory_space<vmem>>, vector<1x32x16xf32>
    %250 = vector.shape_cast %249 : vector<1x32x16xf32> to vector<32x16xf32>
    %251 = vector.broadcast %15 : f32 to vector<32x16xf32>
    %252 = arith.mulf %251, %250 : vector<32x16xf32>
    %c128_203 = arith.constant 128 : index
    %c0_204 = arith.constant 0 : index
    %253 = vector.load %arg17[%c128_203, %c0_204] : memref<256x16xf32, #tpu.memory_space<vmem>>, vector<32x16xf32>
    %cst_205 = arith.constant 7.500000e-01 : f32
    %254 = vector.broadcast %cst_205 : f32 to vector<32x16xf32>
    %255 = arith.mulf %254, %253 : vector<32x16xf32>
    %256 = arith.addf %252, %255 : vector<32x16xf32>
    %c160 = arith.constant 160 : index
    %c0_206 = arith.constant 0 : index
    %257 = vector.load %arg17[%c160, %c0_206] : memref<256x16xf32, #tpu.memory_space<vmem>>, vector<32x16xf32>
    %cst_207 = arith.constant 2.500000e-01 : f32
    %258 = vector.broadcast %cst_207 : f32 to vector<32x16xf32>
    %259 = arith.mulf %258, %257 : vector<32x16xf32>
    %260 = arith.addf %256, %259 : vector<32x16xf32>
    %c32_208 = arith.constant 32 : index
    %c0_209 = arith.constant 0 : index
    %261 = vector.load %arg18[%c32_208, %c0_209] : memref<128x16xf32, #tpu.memory_space<vmem>>, vector<32x16xf32>
    %cst_210 = arith.constant 1.250000e-01 : f32
    %262 = vector.broadcast %cst_210 : f32 to vector<32x16xf32>
    %263 = arith.mulf %262, %261 : vector<32x16xf32>
    %264 = arith.addf %260, %263 : vector<32x16xf32>
    %c64_211 = arith.constant 64 : index
    %c0_212 = arith.constant 0 : index
    %265 = vector.load %arg18[%c64_211, %c0_212] : memref<128x16xf32, #tpu.memory_space<vmem>>, vector<32x16xf32>
    %cst_213 = arith.constant 8.750000e-01 : f32
    %266 = vector.broadcast %cst_213 : f32 to vector<32x16xf32>
    %267 = arith.mulf %266, %265 : vector<32x16xf32>
    %268 = arith.addf %264, %267 : vector<32x16xf32>
    %c0_214 = arith.constant 0 : index
    %c0_215 = arith.constant 0 : index
    %269 = vector.load %arg19[%c0_214, %c0_215] : memref<64x16xf32, #tpu.memory_space<vmem>>, vector<32x16xf32>
    %cst_216 = arith.constant 3.125000e-01 : f32
    %270 = vector.broadcast %cst_216 : f32 to vector<32x16xf32>
    %271 = arith.mulf %270, %269 : vector<32x16xf32>
    %272 = arith.addf %268, %271 : vector<32x16xf32>
    %c32_217 = arith.constant 32 : index
    %c0_218 = arith.constant 0 : index
    %273 = vector.load %arg19[%c32_217, %c0_218] : memref<64x16xf32, #tpu.memory_space<vmem>>, vector<32x16xf32>
    %cst_219 = arith.constant 6.875000e-01 : f32
    %274 = vector.broadcast %cst_219 : f32 to vector<32x16xf32>
    %275 = arith.mulf %274, %273 : vector<32x16xf32>
    %276 = arith.addf %272, %275 : vector<32x16xf32>
    %c0_220 = arith.constant 0 : index
    %c144_221 = arith.constant 144 : index
    %277 = vector.load %arg20[%c0_220, %c144_221] : memref<32x256xf32, #tpu.memory_space<vmem>>, vector<32x16xf32>
    tpu.vector_store %arg20[%c0_220, %c144_221], %276 {strides = array<i32>} : memref<32x256xf32, #tpu.memory_space<vmem>>, vector<32x16xf32>,
    %c0_222 = arith.constant 0 : index
    %c0_223 = arith.constant 0 : index
    %c160_224 = arith.constant 160 : index
    %278 = vector.load %arg2[%c0_222, %c0_223, %c160_224] : memref<1x32x256xf32, #tpu.memory_space<vmem>>, vector<1x32x16xf32>
    %279 = vector.shape_cast %278 : vector<1x32x16xf32> to vector<32x16xf32>
    %280 = vector.broadcast %15 : f32 to vector<32x16xf32>
    %281 = arith.mulf %280, %279 : vector<32x16xf32>
    %c128_225 = arith.constant 128 : index
    %c0_226 = arith.constant 0 : index
    %282 = vector.load %arg17[%c128_225, %c0_226] : memref<256x16xf32, #tpu.memory_space<vmem>>, vector<32x16xf32>
    %cst_227 = arith.constant 2.500000e-01 : f32
    %283 = vector.broadcast %cst_227 : f32 to vector<32x16xf32>
    %284 = arith.mulf %283, %282 : vector<32x16xf32>
    %285 = arith.addf %281, %284 : vector<32x16xf32>
    %c160_228 = arith.constant 160 : index
    %c0_229 = arith.constant 0 : index
    %286 = vector.load %arg17[%c160_228, %c0_229] : memref<256x16xf32, #tpu.memory_space<vmem>>, vector<32x16xf32>
    %cst_230 = arith.constant 7.500000e-01 : f32
    %287 = vector.broadcast %cst_230 : f32 to vector<32x16xf32>
    %288 = arith.mulf %287, %286 : vector<32x16xf32>
    %289 = arith.addf %285, %288 : vector<32x16xf32>
    %c64_231 = arith.constant 64 : index
    %c0_232 = arith.constant 0 : index
    %290 = vector.load %arg18[%c64_231, %c0_232] : memref<128x16xf32, #tpu.memory_space<vmem>>, vector<32x16xf32>
    %cst_233 = arith.constant 8.750000e-01 : f32
    %291 = vector.broadcast %cst_233 : f32 to vector<32x16xf32>
    %292 = arith.mulf %291, %290 : vector<32x16xf32>
    %293 = arith.addf %289, %292 : vector<32x16xf32>
    %c96_234 = arith.constant 96 : index
    %c0_235 = arith.constant 0 : index
    %294 = vector.load %arg18[%c96_234, %c0_235] : memref<128x16xf32, #tpu.memory_space<vmem>>, vector<32x16xf32>
    %cst_236 = arith.constant 1.250000e-01 : f32
    %295 = vector.broadcast %cst_236 : f32 to vector<32x16xf32>
    %296 = arith.mulf %295, %294 : vector<32x16xf32>
    %297 = arith.addf %293, %296 : vector<32x16xf32>
    %c0_237 = arith.constant 0 : index
    %c0_238 = arith.constant 0 : index
    %298 = vector.load %arg19[%c0_237, %c0_238] : memref<64x16xf32, #tpu.memory_space<vmem>>, vector<32x16xf32>
    %cst_239 = arith.constant 1.875000e-01 : f32
    %299 = vector.broadcast %cst_239 : f32 to vector<32x16xf32>
    %300 = arith.mulf %299, %298 : vector<32x16xf32>
    %301 = arith.addf %297, %300 : vector<32x16xf32>
    %c32_240 = arith.constant 32 : index
    %c0_241 = arith.constant 0 : index
    %302 = vector.load %arg19[%c32_240, %c0_241] : memref<64x16xf32, #tpu.memory_space<vmem>>, vector<32x16xf32>
    %cst_242 = arith.constant 8.125000e-01 : f32
    %303 = vector.broadcast %cst_242 : f32 to vector<32x16xf32>
    %304 = arith.mulf %303, %302 : vector<32x16xf32>
    %305 = arith.addf %301, %304 : vector<32x16xf32>
    %c0_243 = arith.constant 0 : index
    %c160_244 = arith.constant 160 : index
    %306 = vector.load %arg20[%c0_243, %c160_244] : memref<32x256xf32, #tpu.memory_space<vmem>>, vector<32x16xf32>
    tpu.vector_store %arg20[%c0_243, %c160_244], %305 {strides = array<i32>} : memref<32x256xf32, #tpu.memory_space<vmem>>, vector<32x16xf32>,
    %c0_245 = arith.constant 0 : index
    %c0_246 = arith.constant 0 : index
    %c176 = arith.constant 176 : index
    %307 = vector.load %arg2[%c0_245, %c0_246, %c176] : memref<1x32x256xf32, #tpu.memory_space<vmem>>, vector<1x32x16xf32>
    %308 = vector.shape_cast %307 : vector<1x32x16xf32> to vector<32x16xf32>
    %309 = vector.broadcast %15 : f32 to vector<32x16xf32>
    %310 = arith.mulf %309, %308 : vector<32x16xf32>
    %c160_247 = arith.constant 160 : index
    %c0_248 = arith.constant 0 : index
    %311 = vector.load %arg17[%c160_247, %c0_248] : memref<256x16xf32, #tpu.memory_space<vmem>>, vector<32x16xf32>
    %cst_249 = arith.constant 7.500000e-01 : f32
    %312 = vector.broadcast %cst_249 : f32 to vector<32x16xf32>
    %313 = arith.mulf %312, %311 : vector<32x16xf32>
    %314 = arith.addf %310, %313 : vector<32x16xf32>
    %c192 = arith.constant 192 : index
    %c0_250 = arith.constant 0 : index
    %315 = vector.load %arg17[%c192, %c0_250] : memref<256x16xf32, #tpu.memory_space<vmem>>, vector<32x16xf32>
    %cst_251 = arith.constant 2.500000e-01 : f32
    %316 = vector.broadcast %cst_251 : f32 to vector<32x16xf32>
    %317 = arith.mulf %316, %315 : vector<32x16xf32>
    %318 = arith.addf %314, %317 : vector<32x16xf32>
    %c64_252 = arith.constant 64 : index
    %c0_253 = arith.constant 0 : index
    %319 = vector.load %arg18[%c64_252, %c0_253] : memref<128x16xf32, #tpu.memory_space<vmem>>, vector<32x16xf32>
    %cst_254 = arith.constant 6.250000e-01 : f32
    %320 = vector.broadcast %cst_254 : f32 to vector<32x16xf32>
    %321 = arith.mulf %320, %319 : vector<32x16xf32>
    %322 = arith.addf %318, %321 : vector<32x16xf32>
    %c96_255 = arith.constant 96 : index
    %c0_256 = arith.constant 0 : index
    %323 = vector.load %arg18[%c96_255, %c0_256] : memref<128x16xf32, #tpu.memory_space<vmem>>, vector<32x16xf32>
    %cst_257 = arith.constant 3.750000e-01 : f32
    %324 = vector.broadcast %cst_257 : f32 to vector<32x16xf32>
    %325 = arith.mulf %324, %323 : vector<32x16xf32>
    %326 = arith.addf %322, %325 : vector<32x16xf32>
    %c0_258 = arith.constant 0 : index
    %c0_259 = arith.constant 0 : index
    %327 = vector.load %arg19[%c0_258, %c0_259] : memref<64x16xf32, #tpu.memory_space<vmem>>, vector<32x16xf32>
    %cst_260 = arith.constant 6.250000e-02 : f32
    %328 = vector.broadcast %cst_260 : f32 to vector<32x16xf32>
    %329 = arith.mulf %328, %327 : vector<32x16xf32>
    %330 = arith.addf %326, %329 : vector<32x16xf32>
    %c32_261 = arith.constant 32 : index
    %c0_262 = arith.constant 0 : index
    %331 = vector.load %arg19[%c32_261, %c0_262] : memref<64x16xf32, #tpu.memory_space<vmem>>, vector<32x16xf32>
    %cst_263 = arith.constant 9.375000e-01 : f32
    %332 = vector.broadcast %cst_263 : f32 to vector<32x16xf32>
    %333 = arith.mulf %332, %331 : vector<32x16xf32>
    %334 = arith.addf %330, %333 : vector<32x16xf32>
    %c0_264 = arith.constant 0 : index
    %c176_265 = arith.constant 176 : index
    %335 = vector.load %arg20[%c0_264, %c176_265] : memref<32x256xf32, #tpu.memory_space<vmem>>, vector<32x16xf32>
    tpu.vector_store %arg20[%c0_264, %c176_265], %334 {strides = array<i32>} : memref<32x256xf32, #tpu.memory_space<vmem>>, vector<32x16xf32>,
    %c0_266 = arith.constant 0 : index
    %c0_267 = arith.constant 0 : index
    %c192_268 = arith.constant 192 : index
    %336 = vector.load %arg2[%c0_266, %c0_267, %c192_268] : memref<1x32x256xf32, #tpu.memory_space<vmem>>, vector<1x32x16xf32>
    %337 = vector.shape_cast %336 : vector<1x32x16xf32> to vector<32x16xf32>
    %338 = vector.broadcast %15 : f32 to vector<32x16xf32>
    %339 = arith.mulf %338, %337 : vector<32x16xf32>
    %c160_269 = arith.constant 160 : index
    %c0_270 = arith.constant 0 : index
    %340 = vector.load %arg17[%c160_269, %c0_270] : memref<256x16xf32, #tpu.memory_space<vmem>>, vector<32x16xf32>
    %cst_271 = arith.constant 2.500000e-01 : f32
    %341 = vector.broadcast %cst_271 : f32 to vector<32x16xf32>
    %342 = arith.mulf %341, %340 : vector<32x16xf32>
    %343 = arith.addf %339, %342 : vector<32x16xf32>
    %c192_272 = arith.constant 192 : index
    %c0_273 = arith.constant 0 : index
    %344 = vector.load %arg17[%c192_272, %c0_273] : memref<256x16xf32, #tpu.memory_space<vmem>>, vector<32x16xf32>
    %cst_274 = arith.constant 7.500000e-01 : f32
    %345 = vector.broadcast %cst_274 : f32 to vector<32x16xf32>
    %346 = arith.mulf %345, %344 : vector<32x16xf32>
    %347 = arith.addf %343, %346 : vector<32x16xf32>
    %c64_275 = arith.constant 64 : index
    %c0_276 = arith.constant 0 : index
    %348 = vector.load %arg18[%c64_275, %c0_276] : memref<128x16xf32, #tpu.memory_space<vmem>>, vector<32x16xf32>
    %cst_277 = arith.constant 3.750000e-01 : f32
    %349 = vector.broadcast %cst_277 : f32 to vector<32x16xf32>
    %350 = arith.mulf %349, %348 : vector<32x16xf32>
    %351 = arith.addf %347, %350 : vector<32x16xf32>
    %c96_278 = arith.constant 96 : index
    %c0_279 = arith.constant 0 : index
    %352 = vector.load %arg18[%c96_278, %c0_279] : memref<128x16xf32, #tpu.memory_space<vmem>>, vector<32x16xf32>
    %cst_280 = arith.constant 6.250000e-01 : f32
    %353 = vector.broadcast %cst_280 : f32 to vector<32x16xf32>
    %354 = arith.mulf %353, %352 : vector<32x16xf32>
    %355 = arith.addf %351, %354 : vector<32x16xf32>
    %c32_281 = arith.constant 32 : index
    %c0_282 = arith.constant 0 : index
    %356 = vector.load %arg19[%c32_281, %c0_282] : memref<64x16xf32, #tpu.memory_space<vmem>>, vector<32x16xf32>
    %cst_283 = arith.constant 1.000000e+00 : f32
    %357 = vector.broadcast %cst_283 : f32 to vector<32x16xf32>
    %358 = arith.mulf %357, %356 : vector<32x16xf32>
    %359 = arith.addf %355, %358 : vector<32x16xf32>
    %c0_284 = arith.constant 0 : index
    %c192_285 = arith.constant 192 : index
    %360 = vector.load %arg20[%c0_284, %c192_285] : memref<32x256xf32, #tpu.memory_space<vmem>>, vector<32x16xf32>
    tpu.vector_store %arg20[%c0_284, %c192_285], %359 {strides = array<i32>} : memref<32x256xf32, #tpu.memory_space<vmem>>, vector<32x16xf32>,
    %c0_286 = arith.constant 0 : index
    %c0_287 = arith.constant 0 : index
    %c208 = arith.constant 208 : index
    %361 = vector.load %arg2[%c0_286, %c0_287, %c208] : memref<1x32x256xf32, #tpu.memory_space<vmem>>, vector<1x32x16xf32>
    %362 = vector.shape_cast %361 : vector<1x32x16xf32> to vector<32x16xf32>
    %363 = vector.broadcast %15 : f32 to vector<32x16xf32>
    %364 = arith.mulf %363, %362 : vector<32x16xf32>
    %c192_288 = arith.constant 192 : index
    %c0_289 = arith.constant 0 : index
    %365 = vector.load %arg17[%c192_288, %c0_289] : memref<256x16xf32, #tpu.memory_space<vmem>>, vector<32x16xf32>
    %cst_290 = arith.constant 7.500000e-01 : f32
    %366 = vector.broadcast %cst_290 : f32 to vector<32x16xf32>
    %367 = arith.mulf %366, %365 : vector<32x16xf32>
    %368 = arith.addf %364, %367 : vector<32x16xf32>
    %c224 = arith.constant 224 : index
    %c0_291 = arith.constant 0 : index
    %369 = vector.load %arg17[%c224, %c0_291] : memref<256x16xf32, #tpu.memory_space<vmem>>, vector<32x16xf32>
    %cst_292 = arith.constant 2.500000e-01 : f32
    %370 = vector.broadcast %cst_292 : f32 to vector<32x16xf32>
    %371 = arith.mulf %370, %369 : vector<32x16xf32>
    %372 = arith.addf %368, %371 : vector<32x16xf32>
    %c64_293 = arith.constant 64 : index
    %c0_294 = arith.constant 0 : index
    %373 = vector.load %arg18[%c64_293, %c0_294] : memref<128x16xf32, #tpu.memory_space<vmem>>, vector<32x16xf32>
    %cst_295 = arith.constant 1.250000e-01 : f32
    %374 = vector.broadcast %cst_295 : f32 to vector<32x16xf32>
    %375 = arith.mulf %374, %373 : vector<32x16xf32>
    %376 = arith.addf %372, %375 : vector<32x16xf32>
    %c96_296 = arith.constant 96 : index
    %c0_297 = arith.constant 0 : index
    %377 = vector.load %arg18[%c96_296, %c0_297] : memref<128x16xf32, #tpu.memory_space<vmem>>, vector<32x16xf32>
    %cst_298 = arith.constant 8.750000e-01 : f32
    %378 = vector.broadcast %cst_298 : f32 to vector<32x16xf32>
    %379 = arith.mulf %378, %377 : vector<32x16xf32>
    %380 = arith.addf %376, %379 : vector<32x16xf32>
    %c32_299 = arith.constant 32 : index
    %c0_300 = arith.constant 0 : index
    %381 = vector.load %arg19[%c32_299, %c0_300] : memref<64x16xf32, #tpu.memory_space<vmem>>, vector<32x16xf32>
    %cst_301 = arith.constant 1.000000e+00 : f32
    %382 = vector.broadcast %cst_301 : f32 to vector<32x16xf32>
    %383 = arith.mulf %382, %381 : vector<32x16xf32>
    %384 = arith.addf %380, %383 : vector<32x16xf32>
    %c0_302 = arith.constant 0 : index
    %c208_303 = arith.constant 208 : index
    %385 = vector.load %arg20[%c0_302, %c208_303] : memref<32x256xf32, #tpu.memory_space<vmem>>, vector<32x16xf32>
    tpu.vector_store %arg20[%c0_302, %c208_303], %384 {strides = array<i32>} : memref<32x256xf32, #tpu.memory_space<vmem>>, vector<32x16xf32>,
    %c0_304 = arith.constant 0 : index
    %c0_305 = arith.constant 0 : index
    %c224_306 = arith.constant 224 : index
    %386 = vector.load %arg2[%c0_304, %c0_305, %c224_306] : memref<1x32x256xf32, #tpu.memory_space<vmem>>, vector<1x32x16xf32>
    %387 = vector.shape_cast %386 : vector<1x32x16xf32> to vector<32x16xf32>
    %388 = vector.broadcast %15 : f32 to vector<32x16xf32>
    %389 = arith.mulf %388, %387 : vector<32x16xf32>
    %c192_307 = arith.constant 192 : index
    %c0_308 = arith.constant 0 : index
    %390 = vector.load %arg17[%c192_307, %c0_308] : memref<256x16xf32, #tpu.memory_space<vmem>>, vector<32x16xf32>
    %cst_309 = arith.constant 2.500000e-01 : f32
    %391 = vector.broadcast %cst_309 : f32 to vector<32x16xf32>
    %392 = arith.mulf %391, %390 : vector<32x16xf32>
    %393 = arith.addf %389, %392 : vector<32x16xf32>
    %c224_310 = arith.constant 224 : index
    %c0_311 = arith.constant 0 : index
    %394 = vector.load %arg17[%c224_310, %c0_311] : memref<256x16xf32, #tpu.memory_space<vmem>>, vector<32x16xf32>
    %cst_312 = arith.constant 7.500000e-01 : f32
    %395 = vector.broadcast %cst_312 : f32 to vector<32x16xf32>
    %396 = arith.mulf %395, %394 : vector<32x16xf32>
    %397 = arith.addf %393, %396 : vector<32x16xf32>
    %c96_313 = arith.constant 96 : index
    %c0_314 = arith.constant 0 : index
    %398 = vector.load %arg18[%c96_313, %c0_314] : memref<128x16xf32, #tpu.memory_space<vmem>>, vector<32x16xf32>
    %cst_315 = arith.constant 1.000000e+00 : f32
    %399 = vector.broadcast %cst_315 : f32 to vector<32x16xf32>
    %400 = arith.mulf %399, %398 : vector<32x16xf32>
    %401 = arith.addf %397, %400 : vector<32x16xf32>
    %c32_316 = arith.constant 32 : index
    %c0_317 = arith.constant 0 : index
    %402 = vector.load %arg19[%c32_316, %c0_317] : memref<64x16xf32, #tpu.memory_space<vmem>>, vector<32x16xf32>
    %cst_318 = arith.constant 1.000000e+00 : f32
    %403 = vector.broadcast %cst_318 : f32 to vector<32x16xf32>
    %404 = arith.mulf %403, %402 : vector<32x16xf32>
    %405 = arith.addf %401, %404 : vector<32x16xf32>
    %c0_319 = arith.constant 0 : index
    %c224_320 = arith.constant 224 : index
    %406 = vector.load %arg20[%c0_319, %c224_320] : memref<32x256xf32, #tpu.memory_space<vmem>>, vector<32x16xf32>
    tpu.vector_store %arg20[%c0_319, %c224_320], %405 {strides = array<i32>} : memref<32x256xf32, #tpu.memory_space<vmem>>, vector<32x16xf32>,
    %c0_321 = arith.constant 0 : index
    %c0_322 = arith.constant 0 : index
    %c240 = arith.constant 240 : index
    %407 = vector.load %arg2[%c0_321, %c0_322, %c240] : memref<1x32x256xf32, #tpu.memory_space<vmem>>, vector<1x32x16xf32>
    %408 = vector.shape_cast %407 : vector<1x32x16xf32> to vector<32x16xf32>
    %409 = vector.broadcast %15 : f32 to vector<32x16xf32>
    %410 = arith.mulf %409, %408 : vector<32x16xf32>
    %c224_323 = arith.constant 224 : index
    %c0_324 = arith.constant 0 : index
    %411 = vector.load %arg17[%c224_323, %c0_324] : memref<256x16xf32, #tpu.memory_space<vmem>>, vector<32x16xf32>
    %cst_325 = arith.constant 1.000000e+00 : f32
    %412 = vector.broadcast %cst_325 : f32 to vector<32x16xf32>
    %413 = arith.mulf %412, %411 : vector<32x16xf32>
    %414 = arith.addf %410, %413 : vector<32x16xf32>
    %c96_326 = arith.constant 96 : index
    %c0_327 = arith.constant 0 : index
    %415 = vector.load %arg18[%c96_326, %c0_327] : memref<128x16xf32, #tpu.memory_space<vmem>>, vector<32x16xf32>
    %cst_328 = arith.constant 1.000000e+00 : f32
    %416 = vector.broadcast %cst_328 : f32 to vector<32x16xf32>
    %417 = arith.mulf %416, %415 : vector<32x16xf32>
    %418 = arith.addf %414, %417 : vector<32x16xf32>
    %c32_329 = arith.constant 32 : index
    %c0_330 = arith.constant 0 : index
    %419 = vector.load %arg19[%c32_329, %c0_330] : memref<64x16xf32, #tpu.memory_space<vmem>>, vector<32x16xf32>
    %cst_331 = arith.constant 1.000000e+00 : f32
    %420 = vector.broadcast %cst_331 : f32 to vector<32x16xf32>
    %421 = arith.mulf %420, %419 : vector<32x16xf32>
    %422 = arith.addf %418, %421 : vector<32x16xf32>
    %c0_332 = arith.constant 0 : index
    %c240_333 = arith.constant 240 : index
    %423 = vector.load %arg20[%c0_332, %c240_333] : memref<32x256xf32, #tpu.memory_space<vmem>>, vector<32x16xf32>
    tpu.vector_store %arg20[%c0_332, %c240_333], %422 {strides = array<i32>} : memref<32x256xf32, #tpu.memory_space<vmem>>, vector<32x16xf32>,
    %c0_334 = arith.constant 0 : index
    %c0_335 = arith.constant 0 : index
    %424 = vector.load %arg20[%c0_334, %c0_335] : memref<32x256xf32, #tpu.memory_space<vmem>>, vector<32x256xf32>
    %c0_336 = arith.constant 0 : index
    %c0_337 = arith.constant 0 : index
    %c0_338 = arith.constant 0 : index
    %425 = vector.load %arg3[%c0_336, %c0_337, %c0_338] : memref<1x32x256xf32, #tpu.memory_space<vmem>>, vector<1x32x256xf32>
    %426 = vector.shape_cast %425 : vector<1x32x256xf32> to vector<32x256xf32>
    %c32_339 = arith.constant 32 : index
    %c0_340 = arith.constant 0 : index
    %427 = vector.load %arg21[%c32_339, %c0_340] : memref<64x256xf32, #tpu.memory_space<vmem>>, vector<32x256xf32>
    tpu.vector_store %arg21[%c32_339, %c0_340], %426 {strides = array<i32>} : memref<64x256xf32, #tpu.memory_space<vmem>>, vector<32x256xf32>,
    %c17_i32 = arith.constant 17 : i32
    %428 = tpu.dynamic_rotate %424 by %c17_i32 dim 1 : vector<32x256xf32>, i32 -> vector<32x256xf32>
    %c0_341 = arith.constant 0 : index
    %c0_342 = arith.constant 0 : index
    %429 = vector.load %arg10[%c0_341, %c0_342] : memref<8x256xf32, #tpu.memory_space<vmem>>, vector<1x256xf32>
    %430 = vector.broadcast %429 : vector<1x256xf32> to vector<32x256xf32>
    %431 = arith.mulf %428, %430 : vector<32x256xf32>
    %c0_343 = arith.constant 0 : index
    %c0_344 = arith.constant 0 : index
    %c0_345 = arith.constant 0 : index
    %432 = vector.load %arg11[%c0_343, %c0_344, %c0_345] : memref<9x32x32xf32, #tpu.memory_space<vmem>>, vector<1x32x32xf32>
    %433 = vector.shape_cast %432 : vector<1x32x32xf32> to vector<32x32xf32>
    %cst_346 = arith.constant dense<0.000000e+00> : vector<32x256xf32>
    %434 = tpu.matmul %433, %431, %cst_346 {dimension_numbers = #tpu.dot_dimension_numbers<[1], [0], [0], [1], [0, 0, 1, 1], [], []>} : vector<32x32xf32>, vector<32x256xf32>, vector<32x256xf32> -> vector<32x256xf32>
    %c0_347 = arith.constant 0 : index
    %c0_348 = arith.constant 0 : index
    %435 = vector.load %arg21[%c0_347, %c0_348] : memref<64x256xf32, #tpu.memory_space<vmem>>, vector<32x256xf32>
    tpu.vector_store %arg21[%c0_347, %c0_348], %434 {strides = array<i32>} : memref<64x256xf32, #tpu.memory_space<vmem>>, vector<32x256xf32>,
    %c16_i32 = arith.constant 16 : i32
    %436 = tpu.dynamic_rotate %424 by %c16_i32 dim 1 : vector<32x256xf32>, i32 -> vector<32x256xf32>
    %c1 = arith.constant 1 : index
    %c0_349 = arith.constant 0 : index
    %437 = vector.load %arg10[%c1, %c0_349] : memref<8x256xf32, #tpu.memory_space<vmem>>, vector<1x256xf32>
    %438 = vector.broadcast %437 : vector<1x256xf32> to vector<32x256xf32>
    %439 = arith.mulf %436, %438 : vector<32x256xf32>
    %c1_350 = arith.constant 1 : index
    %c0_351 = arith.constant 0 : index
    %c0_352 = arith.constant 0 : index
    %440 = vector.load %arg11[%c1_350, %c0_351, %c0_352] : memref<9x32x32xf32, #tpu.memory_space<vmem>>, vector<1x32x32xf32>
    %441 = vector.shape_cast %440 : vector<1x32x32xf32> to vector<32x32xf32>
    %cst_353 = arith.constant dense<0.000000e+00> : vector<32x256xf32>
    %442 = tpu.matmul %441, %439, %cst_353 {dimension_numbers = #tpu.dot_dimension_numbers<[1], [0], [0], [1], [0, 0, 1, 1], [], []>} : vector<32x32xf32>, vector<32x256xf32>, vector<32x256xf32> -> vector<32x256xf32>
    %c0_354 = arith.constant 0 : index
    %c0_355 = arith.constant 0 : index
    %443 = vector.load %arg21[%c0_354, %c0_355] : memref<64x256xf32, #tpu.memory_space<vmem>>, vector<32x256xf32>
    %444 = arith.addf %443, %442 : vector<32x256xf32>
    %c0_356 = arith.constant 0 : index
    %c0_357 = arith.constant 0 : index
    %445 = vector.load %arg21[%c0_356, %c0_357] : memref<64x256xf32, #tpu.memory_space<vmem>>, vector<32x256xf32>
    tpu.vector_store %arg21[%c0_356, %c0_357], %444 {strides = array<i32>} : memref<64x256xf32, #tpu.memory_space<vmem>>, vector<32x256xf32>,
    %c15_i32 = arith.constant 15 : i32
    %446 = tpu.dynamic_rotate %424 by %c15_i32 dim 1 : vector<32x256xf32>, i32 -> vector<32x256xf32>
    %c2 = arith.constant 2 : index
    %c0_358 = arith.constant 0 : index
    %447 = vector.load %arg10[%c2, %c0_358] : memref<8x256xf32, #tpu.memory_space<vmem>>, vector<1x256xf32>
    %448 = vector.broadcast %447 : vector<1x256xf32> to vector<32x256xf32>
    %449 = arith.mulf %446, %448 : vector<32x256xf32>
    %c2_359 = arith.constant 2 : index
    %c0_360 = arith.constant 0 : index
    %c0_361 = arith.constant 0 : index
    %450 = vector.load %arg11[%c2_359, %c0_360, %c0_361] : memref<9x32x32xf32, #tpu.memory_space<vmem>>, vector<1x32x32xf32>
    %451 = vector.shape_cast %450 : vector<1x32x32xf32> to vector<32x32xf32>
    %cst_362 = arith.constant dense<0.000000e+00> : vector<32x256xf32>
    %452 = tpu.matmul %451, %449, %cst_362 {dimension_numbers = #tpu.dot_dimension_numbers<[1], [0], [0], [1], [0, 0, 1, 1], [], []>} : vector<32x32xf32>, vector<32x256xf32>, vector<32x256xf32> -> vector<32x256xf32>
    %c0_363 = arith.constant 0 : index
    %c0_364 = arith.constant 0 : index
    %453 = vector.load %arg21[%c0_363, %c0_364] : memref<64x256xf32, #tpu.memory_space<vmem>>, vector<32x256xf32>
    %454 = arith.addf %453, %452 : vector<32x256xf32>
    %c0_365 = arith.constant 0 : index
    %c0_366 = arith.constant 0 : index
    %455 = vector.load %arg21[%c0_365, %c0_366] : memref<64x256xf32, #tpu.memory_space<vmem>>, vector<32x256xf32>
    tpu.vector_store %arg21[%c0_365, %c0_366], %454 {strides = array<i32>} : memref<64x256xf32, #tpu.memory_space<vmem>>, vector<32x256xf32>,
    %c1_i32 = arith.constant 1 : i32
    %456 = tpu.dynamic_rotate %424 by %c1_i32 dim 1 : vector<32x256xf32>, i32 -> vector<32x256xf32>
    %c3 = arith.constant 3 : index
    %c0_367 = arith.constant 0 : index
    %457 = vector.load %arg10[%c3, %c0_367] : memref<8x256xf32, #tpu.memory_space<vmem>>, vector<1x256xf32>
    %458 = vector.broadcast %457 : vector<1x256xf32> to vector<32x256xf32>
    %459 = arith.mulf %456, %458 : vector<32x256xf32>
    %c3_368 = arith.constant 3 : index
    %c0_369 = arith.constant 0 : index
    %c0_370 = arith.constant 0 : index
    %460 = vector.load %arg11[%c3_368, %c0_369, %c0_370] : memref<9x32x32xf32, #tpu.memory_space<vmem>>, vector<1x32x32xf32>
    %461 = vector.shape_cast %460 : vector<1x32x32xf32> to vector<32x32xf32>
    %cst_371 = arith.constant dense<0.000000e+00> : vector<32x256xf32>
    %462 = tpu.matmul %461, %459, %cst_371 {dimension_numbers = #tpu.dot_dimension_numbers<[1], [0], [0], [1], [0, 0, 1, 1], [], []>} : vector<32x32xf32>, vector<32x256xf32>, vector<32x256xf32> -> vector<32x256xf32>
    %c0_372 = arith.constant 0 : index
    %c0_373 = arith.constant 0 : index
    %463 = vector.load %arg21[%c0_372, %c0_373] : memref<64x256xf32, #tpu.memory_space<vmem>>, vector<32x256xf32>
    %464 = arith.addf %463, %462 : vector<32x256xf32>
    %c0_374 = arith.constant 0 : index
    %c0_375 = arith.constant 0 : index
    %465 = vector.load %arg21[%c0_374, %c0_375] : memref<64x256xf32, #tpu.memory_space<vmem>>, vector<32x256xf32>
    tpu.vector_store %arg21[%c0_374, %c0_375], %464 {strides = array<i32>} : memref<64x256xf32, #tpu.memory_space<vmem>>, vector<32x256xf32>,
    %c4 = arith.constant 4 : index
    %c0_376 = arith.constant 0 : index
    %c0_377 = arith.constant 0 : index
    %466 = vector.load %arg11[%c4, %c0_376, %c0_377] : memref<9x32x32xf32, #tpu.memory_space<vmem>>, vector<1x32x32xf32>
    %467 = vector.shape_cast %466 : vector<1x32x32xf32> to vector<32x32xf32>
    %cst_378 = arith.constant dense<0.000000e+00> : vector<32x256xf32>
    %468 = tpu.matmul %467, %424, %cst_378 {dimension_numbers = #tpu.dot_dimension_numbers<[1], [0], [0], [1], [0, 0, 1, 1], [], []>} : vector<32x32xf32>, vector<32x256xf32>, vector<32x256xf32> -> vector<32x256xf32>
    %c0_379 = arith.constant 0 : index
    %c0_380 = arith.constant 0 : index
    %469 = vector.load %arg21[%c0_379, %c0_380] : memref<64x256xf32, #tpu.memory_space<vmem>>, vector<32x256xf32>
    %470 = arith.addf %469, %468 : vector<32x256xf32>
    %c0_381 = arith.constant 0 : index
    %c0_382 = arith.constant 0 : index
    %471 = vector.load %arg21[%c0_381, %c0_382] : memref<64x256xf32, #tpu.memory_space<vmem>>, vector<32x256xf32>
    tpu.vector_store %arg21[%c0_381, %c0_382], %470 {strides = array<i32>} : memref<64x256xf32, #tpu.memory_space<vmem>>, vector<32x256xf32>,
    %c255_i32 = arith.constant 255 : i32
    %472 = tpu.dynamic_rotate %424 by %c255_i32 dim 1 : vector<32x256xf32>, i32 -> vector<32x256xf32>
    %c4_383 = arith.constant 4 : index
    %c0_384 = arith.constant 0 : index
    %473 = vector.load %arg10[%c4_383, %c0_384] : memref<8x256xf32, #tpu.memory_space<vmem>>, vector<1x256xf32>
    %474 = vector.broadcast %473 : vector<1x256xf32> to vector<32x256xf32>
    %475 = arith.mulf %472, %474 : vector<32x256xf32>
    %c5 = arith.constant 5 : index
    %c0_385 = arith.constant 0 : index
    %c0_386 = arith.constant 0 : index
    %476 = vector.load %arg11[%c5, %c0_385, %c0_386] : memref<9x32x32xf32, #tpu.memory_space<vmem>>, vector<1x32x32xf32>
    %477 = vector.shape_cast %476 : vector<1x32x32xf32> to vector<32x32xf32>
    %cst_387 = arith.constant dense<0.000000e+00> : vector<32x256xf32>
    %478 = tpu.matmul %477, %475, %cst_387 {dimension_numbers = #tpu.dot_dimension_numbers<[1], [0], [0], [1], [0, 0, 1, 1], [], []>} : vector<32x32xf32>, vector<32x256xf32>, vector<32x256xf32> -> vector<32x256xf32>
    %c0_388 = arith.constant 0 : index
    %c0_389 = arith.constant 0 : index
    %479 = vector.load %arg21[%c0_388, %c0_389] : memref<64x256xf32, #tpu.memory_space<vmem>>, vector<32x256xf32>
    %480 = arith.addf %479, %478 : vector<32x256xf32>
    %c0_390 = arith.constant 0 : index
    %c0_391 = arith.constant 0 : index
    %481 = vector.load %arg21[%c0_390, %c0_391] : memref<64x256xf32, #tpu.memory_space<vmem>>, vector<32x256xf32>
    tpu.vector_store %arg21[%c0_390, %c0_391], %480 {strides = array<i32>} : memref<64x256xf32, #tpu.memory_space<vmem>>, vector<32x256xf32>,
    %c241_i32 = arith.constant 241 : i32
    %482 = tpu.dynamic_rotate %424 by %c241_i32 dim 1 : vector<32x256xf32>, i32 -> vector<32x256xf32>
    %c5_392 = arith.constant 5 : index
    %c0_393 = arith.constant 0 : index
    %483 = vector.load %arg10[%c5_392, %c0_393] : memref<8x256xf32, #tpu.memory_space<vmem>>, vector<1x256xf32>
    %484 = vector.broadcast %483 : vector<1x256xf32> to vector<32x256xf32>
    %485 = arith.mulf %482, %484 : vector<32x256xf32>
    %c6 = arith.constant 6 : index
    %c0_394 = arith.constant 0 : index
    %c0_395 = arith.constant 0 : index
    %486 = vector.load %arg11[%c6, %c0_394, %c0_395] : memref<9x32x32xf32, #tpu.memory_space<vmem>>, vector<1x32x32xf32>
    %487 = vector.shape_cast %486 : vector<1x32x32xf32> to vector<32x32xf32>
    %cst_396 = arith.constant dense<0.000000e+00> : vector<32x256xf32>
    %488 = tpu.matmul %487, %485, %cst_396 {dimension_numbers = #tpu.dot_dimension_numbers<[1], [0], [0], [1], [0, 0, 1, 1], [], []>} : vector<32x32xf32>, vector<32x256xf32>, vector<32x256xf32> -> vector<32x256xf32>
    %c0_397 = arith.constant 0 : index
    %c0_398 = arith.constant 0 : index
    %489 = vector.load %arg21[%c0_397, %c0_398] : memref<64x256xf32, #tpu.memory_space<vmem>>, vector<32x256xf32>
    %490 = arith.addf %489, %488 : vector<32x256xf32>
    %c0_399 = arith.constant 0 : index
    %c0_400 = arith.constant 0 : index
    %491 = vector.load %arg21[%c0_399, %c0_400] : memref<64x256xf32, #tpu.memory_space<vmem>>, vector<32x256xf32>
    tpu.vector_store %arg21[%c0_399, %c0_400], %490 {strides = array<i32>} : memref<64x256xf32, #tpu.memory_space<vmem>>, vector<32x256xf32>,
    %c240_i32 = arith.constant 240 : i32
    %492 = tpu.dynamic_rotate %424 by %c240_i32 dim 1 : vector<32x256xf32>, i32 -> vector<32x256xf32>
    %c6_401 = arith.constant 6 : index
    %c0_402 = arith.constant 0 : index
    %493 = vector.load %arg10[%c6_401, %c0_402] : memref<8x256xf32, #tpu.memory_space<vmem>>, vector<1x256xf32>
    %494 = vector.broadcast %493 : vector<1x256xf32> to vector<32x256xf32>
    %495 = arith.mulf %492, %494 : vector<32x256xf32>
    %c7 = arith.constant 7 : index
    %c0_403 = arith.constant 0 : index
    %c0_404 = arith.constant 0 : index
    %496 = vector.load %arg11[%c7, %c0_403, %c0_404] : memref<9x32x32xf32, #tpu.memory_space<vmem>>, vector<1x32x32xf32>
    %497 = vector.shape_cast %496 : vector<1x32x32xf32> to vector<32x32xf32>
    %cst_405 = arith.constant dense<0.000000e+00> : vector<32x256xf32>
    %498 = tpu.matmul %497, %495, %cst_405 {dimension_numbers = #tpu.dot_dimension_numbers<[1], [0], [0], [1], [0, 0, 1, 1], [], []>} : vector<32x32xf32>, vector<32x256xf32>, vector<32x256xf32> -> vector<32x256xf32>
    %c0_406 = arith.constant 0 : index
    %c0_407 = arith.constant 0 : index
    %499 = vector.load %arg21[%c0_406, %c0_407] : memref<64x256xf32, #tpu.memory_space<vmem>>, vector<32x256xf32>
    %500 = arith.addf %499, %498 : vector<32x256xf32>
    %c0_408 = arith.constant 0 : index
    %c0_409 = arith.constant 0 : index
    %501 = vector.load %arg21[%c0_408, %c0_409] : memref<64x256xf32, #tpu.memory_space<vmem>>, vector<32x256xf32>
    tpu.vector_store %arg21[%c0_408, %c0_409], %500 {strides = array<i32>} : memref<64x256xf32, #tpu.memory_space<vmem>>, vector<32x256xf32>,
    %c239_i32 = arith.constant 239 : i32
    %502 = tpu.dynamic_rotate %424 by %c239_i32 dim 1 : vector<32x256xf32>, i32 -> vector<32x256xf32>
    %c7_410 = arith.constant 7 : index
    %c0_411 = arith.constant 0 : index
    %503 = vector.load %arg10[%c7_410, %c0_411] : memref<8x256xf32, #tpu.memory_space<vmem>>, vector<1x256xf32>
    %504 = vector.broadcast %503 : vector<1x256xf32> to vector<32x256xf32>
    %505 = arith.mulf %502, %504 : vector<32x256xf32>
    %c8 = arith.constant 8 : index
    %c0_412 = arith.constant 0 : index
    %c0_413 = arith.constant 0 : index
    %506 = vector.load %arg11[%c8, %c0_412, %c0_413] : memref<9x32x32xf32, #tpu.memory_space<vmem>>, vector<1x32x32xf32>
    %507 = vector.shape_cast %506 : vector<1x32x32xf32> to vector<32x32xf32>
    %cst_414 = arith.constant dense<0.000000e+00> : vector<32x256xf32>
    %508 = tpu.matmul %507, %505, %cst_414 {dimension_numbers = #tpu.dot_dimension_numbers<[1], [0], [0], [1], [0, 0, 1, 1], [], []>} : vector<32x32xf32>, vector<32x256xf32>, vector<32x256xf32> -> vector<32x256xf32>
    %c0_415 = arith.constant 0 : index
    %c0_416 = arith.constant 0 : index
    %509 = vector.load %arg21[%c0_415, %c0_416] : memref<64x256xf32, #tpu.memory_space<vmem>>, vector<32x256xf32>
    %510 = arith.addf %509, %508 : vector<32x256xf32>
    %c0_417 = arith.constant 0 : index
    %c0_418 = arith.constant 0 : index
    %511 = vector.load %arg21[%c0_417, %c0_418] : memref<64x256xf32, #tpu.memory_space<vmem>>, vector<32x256xf32>
    tpu.vector_store %arg21[%c0_417, %c0_418], %510 {strides = array<i32>} : memref<64x256xf32, #tpu.memory_space<vmem>>, vector<32x256xf32>,
    %c0_419 = arith.constant 0 : index
    %c0_420 = arith.constant 0 : index
    %512 = vector.load %arg21[%c0_419, %c0_420] : memref<64x256xf32, #tpu.memory_space<vmem>>, vector<32x256xf32>
    %c0_421 = arith.constant 0 : index
    %c0_422 = arith.constant 0 : index
    %513 = vector.load %arg12[%c0_421, %c0_422] : memref<32x1xf32, #tpu.memory_space<vmem>>, vector<32x1xf32>
    %514 = vector.broadcast %513 : vector<32x1xf32> to vector<32x256xf32>
    %515 = arith.mulf %512, %514 : vector<32x256xf32>
    %c0_423 = arith.constant 0 : index
    %c0_424 = arith.constant 0 : index
    %516 = vector.load %arg13[%c0_423, %c0_424] : memref<32x1xf32, #tpu.memory_space<vmem>>, vector<32x1xf32>
    %517 = vector.broadcast %516 : vector<32x1xf32> to vector<32x256xf32>
    %518 = arith.addf %515, %517 : vector<32x256xf32>
    %cst_425 = arith.constant 0.000000e+00 : f32
    %519 = vector.broadcast %cst_425 : f32 to vector<32x256xf32>
    %520 = arith.maximumf %518, %519 : vector<32x256xf32>
    %c0_426 = arith.constant 0 : index
    %c0_427 = arith.constant 0 : index
    %521 = vector.load %arg21[%c0_426, %c0_427] : memref<64x256xf32, #tpu.memory_space<vmem>>, vector<32x256xf32>
    tpu.vector_store %arg21[%c0_426, %c0_427], %520 {strides = array<i32>} : memref<64x256xf32, #tpu.memory_space<vmem>>, vector<32x256xf32>,
    %c0_428 = arith.constant 0 : index
    %c0_429 = arith.constant 0 : index
    %522 = vector.load %arg14[%c0_428, %c0_429] : memref<4x64xf32, #tpu.memory_space<vmem>>, vector<4x64xf32>
    %c0_430 = arith.constant 0 : index
    %c0_431 = arith.constant 0 : index
    %523 = vector.load %arg21[%c0_430, %c0_431] : memref<64x256xf32, #tpu.memory_space<vmem>>, vector<64x256xf32>
    %cst_432 = arith.constant dense<0.000000e+00> : vector<4x256xf32>
    %524 = tpu.matmul %522, %523, %cst_432 {dimension_numbers = #tpu.dot_dimension_numbers<[1], [0], [0], [1], [0, 0, 1, 1], [], []>} : vector<4x64xf32>, vector<64x256xf32>, vector<4x256xf32> -> vector<4x256xf32>
    %c0_433 = arith.constant 0 : index
    %c0_434 = arith.constant 0 : index
    %525 = vector.load %arg15[%c0_433, %c0_434] : memref<4x1xf32, #tpu.memory_space<vmem>>, vector<4x1xf32>
    %526 = vector.broadcast %525 : vector<4x1xf32> to vector<4x256xf32>
    %527 = arith.addf %524, %526 : vector<4x256xf32>
    %c0_435 = arith.constant 0 : index
    %c0_436 = arith.constant 0 : index
    %c0_437 = arith.constant 0 : index
    %528 = vector.load %arg16[%c0_435, %c0_436, %c0_437] : memref<1x4x256xf32, #tpu.memory_space<vmem>>, vector<1x4x256xf32>
    %529 = vector.shape_cast %528 : vector<1x4x256xf32> to vector<4x256xf32>
    %530 = vector.shape_cast %527 : vector<4x256xf32> to vector<1x4x256xf32>
    tpu.vector_store %arg16[%c0_435, %c0_436, %c0_437], %530 {strides = array<i32>} : memref<1x4x256xf32, #tpu.memory_space<vmem>>, vector<1x4x256xf32>,
    return
  }
  func.func @transform_0(%arg0: i32) -> i32 {
    %c0_i32 = arith.constant 0 : i32
    %c0_i32_0 = arith.constant 0 : i32
    return %c0_i32 : i32
  }
  func.func @transform_1(%arg0: i32) -> (i32, i32, i32) {
    %c0_i32 = arith.constant 0 : i32
    %c0_i32_0 = arith.constant 0 : i32
    %c0_i32_1 = arith.constant 0 : i32
    return %arg0, %c0_i32, %c0_i32_0 : i32, i32, i32
  }
  func.func @transform_2(%arg0: i32) -> (i32, i32, i32) {
    %c0_i32 = arith.constant 0 : i32
    %c0_i32_0 = arith.constant 0 : i32
    %c0_i32_1 = arith.constant 0 : i32
    return %arg0, %c0_i32, %c0_i32_0 : i32, i32, i32
  }
  func.func @transform_3(%arg0: i32) -> (i32, i32, i32) {
    %c0_i32 = arith.constant 0 : i32
    %c0_i32_0 = arith.constant 0 : i32
    %c0_i32_1 = arith.constant 0 : i32
    return %arg0, %c0_i32, %c0_i32_0 : i32, i32, i32
  }
  func.func @transform_4(%arg0: i32) -> (i32, i32, i32) {
    %c0_i32 = arith.constant 0 : i32
    %c0_i32_0 = arith.constant 0 : i32
    %c0_i32_1 = arith.constant 0 : i32
    return %arg0, %c0_i32, %c0_i32_0 : i32, i32, i32
  }
  func.func @transform_5(%arg0: i32) -> (i32, i32, i32) {
    %c0_i32 = arith.constant 0 : i32
    %c0_i32_0 = arith.constant 0 : i32
    %c0_i32_1 = arith.constant 0 : i32
    return %arg0, %c0_i32, %c0_i32_0 : i32, i32, i32
  }
  func.func @transform_6(%arg0: i32) -> (i32, i32) {
    %c0_i32 = arith.constant 0 : i32
    %c0_i32_0 = arith.constant 0 : i32
    %c0_i32_1 = arith.constant 0 : i32
    return %c0_i32, %c0_i32_0 : i32, i32
  }
  func.func @transform_7(%arg0: i32) -> (i32, i32) {
    %c0_i32 = arith.constant 0 : i32
    %c0_i32_0 = arith.constant 0 : i32
    %c0_i32_1 = arith.constant 0 : i32
    return %c0_i32, %c0_i32_0 : i32, i32
  }
  func.func @transform_8(%arg0: i32) -> (i32, i32) {
    %c0_i32 = arith.constant 0 : i32
    %c0_i32_0 = arith.constant 0 : i32
    %c0_i32_1 = arith.constant 0 : i32
    return %c0_i32, %c0_i32_0 : i32, i32
  }
  func.func @transform_9(%arg0: i32) -> (i32, i32) {
    %c0_i32 = arith.constant 0 : i32
    %c0_i32_0 = arith.constant 0 : i32
    %c0_i32_1 = arith.constant 0 : i32
    return %c0_i32, %c0_i32_0 : i32, i32
  }
  func.func @transform_10(%arg0: i32) -> (i32, i32, i32) {
    %c0_i32 = arith.constant 0 : i32
    %c0_i32_0 = arith.constant 0 : i32
    %c0_i32_1 = arith.constant 0 : i32
    %c0_i32_2 = arith.constant 0 : i32
    return %c0_i32, %c0_i32_0, %c0_i32_1 : i32, i32, i32
  }
  func.func @transform_11(%arg0: i32) -> (i32, i32) {
    %c0_i32 = arith.constant 0 : i32
    %c0_i32_0 = arith.constant 0 : i32
    %c0_i32_1 = arith.constant 0 : i32
    return %c0_i32, %c0_i32_0 : i32, i32
  }
  func.func @transform_12(%arg0: i32) -> (i32, i32) {
    %c0_i32 = arith.constant 0 : i32
    %c0_i32_0 = arith.constant 0 : i32
    %c0_i32_1 = arith.constant 0 : i32
    return %c0_i32, %c0_i32_0 : i32, i32
  }
  func.func @transform_13(%arg0: i32) -> (i32, i32) {
    %c0_i32 = arith.constant 0 : i32
    %c0_i32_0 = arith.constant 0 : i32
    %c0_i32_1 = arith.constant 0 : i32
    return %c0_i32, %c0_i32_0 : i32, i32
  }
  func.func @transform_14(%arg0: i32) -> (i32, i32) {
    %c0_i32 = arith.constant 0 : i32
    %c0_i32_0 = arith.constant 0 : i32
    %c0_i32_1 = arith.constant 0 : i32
    return %c0_i32, %c0_i32_0 : i32, i32
  }
  func.func @transform_15(%arg0: i32) -> (i32, i32, i32) {
    %c0_i32 = arith.constant 0 : i32
    %c0_i32_0 = arith.constant 0 : i32
    %c0_i32_1 = arith.constant 0 : i32
    return %arg0, %c0_i32, %c0_i32_0 : i32, i32, i32
  }
}

</mosaic_0001>

<bundles_post_ra>
// kernel: tpu_custom_call.1
= control target key start
LH: loop header
LB: loop body
LE: loop exit
PB: predicated region body
PF: predicated region fallthrough
CT: control target
= control target key end

     0   :  { %s8535_s0 = inlined_call_operand.vmem [shape: f32[4], index: 0, kind: input, shape index: {}]   ;;  %s8536_s1 = inlined_call_operand.vmem [shape: f32[2,32,256], index: 1, kind: input, shape index: {}]   ;;  %s8537_s2 = inlined_call_operand.vmem [shape: f32[2,32,256], index: 2, kind: input, shape index: {}]   ;;  %s8538_s3 = inlined_call_operand.vmem [shape: f32[2,256,8], index: 3, kind: input, shape index: {}]   ;;  %s8539_s4 = inlined_call_operand.vmem [shape: f32[2,128,4], index: 4, kind: input, shape index: {}]   ;;  %s8540_s5 = inlined_call_operand.vmem [shape: f32[2,64,2], index: 5, kind: input, shape index: {}]   ;;  %s8541_s6 = inlined_call_operand.vmem [shape: f32[8,16], index: 6, kind: input, shape index: {}]   ;;  %s8542_s7 = inlined_call_operand.vmem [shape: f32[4,16], index: 7, kind: input, shape index: {}]   ;;  %s8543_s8 = inlined_call_operand.vmem [shape: f32[2,16], index: 8, kind: input, shape index: {}]   ;;  %s8544_s9 = inlined_call_operand.vmem [shape: f32[8,256], index: 9, kind: input, shape index: {}]   ;;  %s8545_s10 = inlined_call_operand.vmem [shape: f32[9,32,32], index: 10, kind: input, shape index: {}]   ;;  %s8546_s11 = inlined_call_operand.vmem [shape: f32[32,1], index: 11, kind: input, shape index: {}]   ;;  %s8547_s12 = inlined_call_operand.vmem [shape: f32[32,1], index: 12, kind: input, shape index: {}]   ;;  %s8548_s13 = inlined_call_operand.vmem [shape: f32[4,64], index: 13, kind: input, shape index: {}]   ;;  %s8549_s14 = inlined_call_operand.vmem [shape: f32[4,1], index: 14, kind: input, shape index: {}]   ;;  %s8550_s15 = inlined_call_operand.hbm [shape: f32[2,4,256], index: 15, kind: output, shape index: {}]  }
   0x1   :  { %8559 = sst [smem:[#allocation108_spill]] %s8535_s0 }
   0x2   :  { %8560 = sst [smem:[#allocation109_spill]] %s8536_s1 }
   0x3   :  { %8561 = sst [smem:[#allocation110_spill]] %s8537_s2 }
   0x4   :  { %8562 = sst [smem:[#allocation111_spill]] %s8541_s6 }
   0x5   :  { %8563 = sst [smem:[#allocation112_spill]] %s8542_s7 }
   0x6   :  { %20 = vsyncpa [#allocation9], 0 }
   0x7   :  { %21 = vsyncpa [#allocation8], 0 }
   0x8   :  { %23 = vsyncpa [#allocation8 + $0x1], 0  ;;  %s6251_s18 = smov 0   ;;  %s6253_s19 = smov 0  }
   0x9   :  { %s6255_s20 = smov 0   ;;  %s6257_s21 = smov 0  }
   0xa LB: > { %s6272_s22 = sadd.s32 4294967295, %s6152_s21   ;;  %s5526_s23 = sadd.s32 4294967294, %s6152_s21   ;;  %s6152_s21 = sphi %s6257_s21, %s8799_s21   ;;  %s6148_s20 = sphi %s6255_s20, %s8798_s20   ;;  %s6144_s19 = sphi %s6253_s19, %s8797_s19   ;;  %s6140_s18 = sphi %s6251_s18, %s8796_s18  }
   0xb   : > { %s6276_s24 = sadd.s32 1, %s6152_s21   ;;  %s376_s25 = sadd.s32 1, %s6148_s20 }
   0xc   : > { %s373_s26 = ssub.s32 %s6152_s21, %s6276_s24  ;;  %p386_p0 = scmp.ne.s32.totalorder %s6148_s20, %s6144_s19 }
   0xd   : > { %p374_p1 = scmp.eq.s32.totalorder %s373_s26, 0  ;;  %p387_p2 = scmp.eq.s32.totalorder %s6272_s22, 1 }
   0xe   : > { %p392_p3 = scmp.ne.s32.totalorder %s6144_s19, %s6140_s18  ;;  %p393_p4 = scmp.eq.s32.totalorder %s5526_s23, 1 }
   0xf   : > { %s6287_s27 = scalar_select %p374_p1, %s6148_s20, %s376_s25  }
  0x10   : > { %p6289_p5 = por %p387_p2, %p386_p0  ;;  %p6293_p6 = por %p393_p4, %p392_p3 }
  0x11   : > { %p5527_p7 = scmp.ge.s32.totalorder %s6152_s21, 1  ;;  %p400_p8 = scmp.lt.s32.totalorder %s6152_s21, 3 }
  0x12   : > { %p6003_p9 = scmp.eq.s32.totalorder %s6272_s22, 0  ;;  %s8567_s0 = sld [smem:[#allocation108_spill]] }
  0x13   : > { %p6300_p10 = pnand %p5527_p7, %p400_p8 }
  0x15   : > { %p5995_p11 = pneg %p6300_p10 }
  0x17   : > { %p5996_p12 = pnand %p6003_p9, %p5995_p11 }
  0x18   : > { %s413_s23 = sshll.u32 %s8567_s0, 4  ;;  %s414_s23 = int_to_ptr.vmem [resolvable:$true] %s413_s23 }
  0x19   : > { %s6071_s25 = scalar_lea.vmem %s414_s23, 16  ;;  %p6073_p0 = pneg %p5996_p12 }
  0x1a   : > { %p6072_p13 = scmp.ne.s32.totalorder %s414_s23, %s6071_s25  ;;  %p6079_p3 = scmp.lt.s32.totalorder %s414_s23, %s414_s23 }
  0x1b   : > { %p6080_p4 = scmp.lt.s32.totalorder %s6071_s25, %s6071_s25 }
  0x1c   : > { %p6074_p1 = pnand %p6073_p0, %p6072_p13 }
  0x1d   : > { %p6081_p7 = por %p6080_p4, %p6079_p3 }
  0x1e   : > { %p6075_p2 = pneg %p6074_p1 }
  0x20   : > { %p6082_p8 = pnand %p6081_p7, %p6075_p2 }
  0x22   : > { %6085 = shalt.err (!%p6082_p8)
}
  0x23   : > { %s6154_s26 = smov [#allocation7]   ;;  %493 = sbr.rel (%p6300_p10) target bundleno = 1696 (0x6a0), region = 80 }
  0x24   : > { %5998 = dma.vmem_to_smem (!%p5996_p12), %s414_s23, 16, %s6154_s26, [#allocation9]  }
  0x2a   : > { %6131 = dma.done.wait (%p6003_p9), [#allocation9], 16  }
  0x2b   : > { %6133 = vsyncadd (%p6003_p9), [#allocation9], 4294967280 }
  0x2c   : > { %499 = sfence }
  0x2d   : > { %s8568_s6 = sld [smem:[#allocation111_spill]]  ;;  %v1214_v1 = vld [vmem:[%s8543_s8] sm:$0x3]  ;;  %vm1240_vm0 = vcmask 1041408   ;;  %p562_p11 = scmp.lt.s32.totalorder %s6272_s22, 1  ;;  %vm1041_vm1 = vcmask 1043456  }
  0x2e   : > { %5823 = vmatprep.subr.msk.mxu1 %vm1240_vm0, %v1214_v1  ;;  %s8569_s7 = sld [smem:[#allocation112_spill]]  ;;  %vm620_vm2 = vcmask 64512   ;;  %vm1215_vm3 = vcmask 15360   ;;  %vm992_vm4 = vcmask 31744   ;;  %vm942_vm5 = vcmask 130048   ;;  %s6157_s30 = smov 48  }
  0x2f   : > { %s6328_s26 = scalar_select %p562_p11, %s6272_s22, 1  ;;  %5824 = vmatpush3.msk.msra.mxu1 %vm1240_vm0, %v1214_v1  ;;  %vm1507_vm6 = vcmask 261248   ;;  %vm1656_vm7 = vcmask 392448   ;;  %vm1805_vm8 = vcmask 523648   ;;  %vm1986_vm9 = vcmask 654848  }
  0x30   : > { %s6158_s23 = smov 64   ;;  %s8570_s1 = sld [smem:[#allocation109_spill]]  ;;  %vm2167_vm10 = vcmask 786048   ;;  %vm2348_vm11 = vcmask 917248   ;;  %vm2529_vm12 = vcmask 1048448   ;;  %vm3729_vm15 = vcmask 261120  }
  0x31   : > { %s5684_s16 = sshll.u32 %s6328_s26, 8  ;;  %s6333_s0 = sshll.u32 %s6328_s26, 6 }
  0x32   : > { %s6161_s17 = smov 112   ;;  %s8795_s2 = sld [smem:[#allocation110_spill]] }
  0x33   : > { %v619_v0 = vld [vmem:[%s8568_s6] sm:$0xff]  ;;  %s6338_s6 = scalar_lea.vmem %s8538_s3, %s5684_s16  ;;  %s6160_s16 = smov 96  }
  0x34   : > { %5747 = vmatprep.subr.mxu0 %v619_v0  ;;  %v991_v2 = vld [vmem:[%s8569_s7] sm:$0xf]  ;;  %s6345_s7 = scalar_lea.vmem %s8540_s5, %s6333_s0  ;;  %v588_v4 = vld [vmem:[%s6338_s6 + $0x8] sm:$0xff]  ;;  %v589_v5 = vld [vmem:[%s6338_s6 + $0x10] sm:$0xff] }
  0x35   : > { %5748 = vmatpush3.msra.mxu0 %v619_v0  ;;  %v587_v3 = vld [vmem:[%s6338_s6] sm:$0xff]  ;;  %v1207_v7 = vld [vmem:[%s6345_s7 + $0x8] sm:$0xff]  ;;  %v590_v8 = vld [vmem:[%s6338_s6 + $0x18] sm:$0xff] }
  0x36   : > { %5797 = vmatprep.subr.msk.mxu0 %vm1041_vm1, %v991_v2  ;;  %5749 = vmatprep.mubr.msk.f32.mxu0 %vm620_vm2, %v587_v3  ;;  %v1206_v6 = vld [vmem:[%s6345_s7] sm:$0xff]  ;;  %v1208_v10 = vld [vmem:[%s6345_s7 + $0x10] sm:$0xff]  ;;  %v1209_v11 = vld [vmem:[%s6345_s7 + $0x18] sm:$0xff] }
  0x37   : > { %5825 = vmatprep.mubr.msk.f32.mxu1 %vm1215_vm3, %v1206_v6  ;;  %5750 = vmatmul.mubr.msk.f32.vlgmr.msra.gmra.mrb[0].mxu0 %vm620_vm2, %v588_v4  ;;  %v591_v9 = vld [vmem:[%s6338_s6 + $0x20] sm:$0xff]  ;;  %v592_v12 = vld [vmem:[%s6338_s6 + $0x28] sm:$0xff]  ;;  %v593_v13 = vld [vmem:[%s6338_s6 + $0x30] sm:$0xff] }
  0x38   : > { %5826 = vmatmul.mubr.msk.f32.vlgmr.msra.gmra.mrb[0].mxu1 %vm1215_vm3, %v1207_v7  ;;  %5752 = vmatprep.mubr.msk.f32.mxu0 %vm620_vm2, %v589_v5  ;;  %v594_v14 = vld [vmem:[%s6338_s6 + $0x38] sm:$0xff]  ;;  %v1210_v15 = vld [vmem:[%s6345_s7 + $0x20] sm:$0xff]  ;;  %v1211_v16 = vld [vmem:[%s6345_s7 + $0x28] sm:$0xff] }
  0x39   : > { %5798 = vmatpush3.msk.msra.mxu0 %vm1041_vm1, %v991_v2  ;;  %5828 = vmatprep.mubr.msk.f32.mxu1 %vm1215_vm3, %v1208_v10  ;;  %v595_v17 = vld [vmem:[%s6338_s6 + $0x40] sm:$0xff]  ;;  %v596_v18 = vld [vmem:[%s6338_s6 + $0x48] sm:$0xff]  ;;  %v597_v19 = vld [vmem:[%s6338_s6 + $0x50] sm:$0xff] }
  0x3a   : > { %v1212_v20 = vld [vmem:[%s6345_s7 + $0x30] sm:$0xff]  ;;  %v1213_v21 = vld [vmem:[%s6345_s7 + $0x38] sm:$0xff]  ;;  %v599_v23 = vld [vmem:[%s6338_s6 + $0x60] sm:$0xff]  ;;  %s5685_s7 = sshll.u32 %s6328_s26, 7  ;;  %s6156_s26 = smov 32  }
  0x3b   : > { %5753 = vmatmul.mubr.msk.f32.gmra.mrb[2].mxu0 %vm620_vm2, %v590_v8  ;;  %v598_v22 = vld [vmem:[%s6338_s6 + $0x58] sm:$0xff]  ;;  %v600_v24 = vld [vmem:[%s6338_s6 + $0x68] sm:$0xff]  ;;  %v601_v25 = vld [vmem:[%s6338_s6 + $0x70] sm:$0xff]  ;;  %s6427_s25 = scalar_lea.vmem %s8539_s4, %s5685_s7  ;;  %s1357_s7 = sld [smem:[#allocation7]] }
  0x3c   : > { %5755 = vmatprep.mubr.msk.f32.mxu0 %vm620_vm2, %v591_v9  ;;  %5829 = vmatmul.mubr.msk.f32.gmra.mrb[2].mxu1 %vm1215_vm3, %v1209_v11  ;;  %v602_v26 = vld [vmem:[%s6338_s6 + $0x78] sm:$0xff]  ;;  %v603_v27 = vld [vmem:[%s6338_s6 + $0x80] sm:$0xff]  ;;  %v604_v28 = vld [vmem:[%s6338_s6 + $0x88] sm:$0xff] }
  0x3d   : > { %5831 = vmatprep.mubr.msk.f32.mxu1 %vm1215_vm3, %v1210_v15  ;;  %v605_v29 = vld [vmem:[%s6338_s6 + $0x90] sm:$0xff]  ;;  %v606_v30 = vld [vmem:[%s6338_s6 + $0x98] sm:$0xff]  ;;  %v607_v31 = vld [vmem:[%s6338_s6 + $0xa0] sm:$0xff] }
  0x3e   : > { %v608_v32 = vld [vmem:[%s6338_s6 + $0xa8] sm:$0xff]  ;;  %v609_v33 = vld [vmem:[%s6338_s6 + $0xb0] sm:$0xff]  ;;  %v610_v34 = vld [vmem:[%s6338_s6 + $0xb8] sm:$0xff] }
  0x3f   : > { %5756 = vmatmul.mubr.msk.f32.gmra.mrb[4].mxu0 %vm620_vm2, %v592_v12  ;;  %v611_v35 = vld [vmem:[%s6338_s6 + $0xc0] sm:$0xff]  ;;  %v612_v36 = vld [vmem:[%s6338_s6 + $0xc8] sm:$0xff]  ;;  %v613_v37 = vld [vmem:[%s6338_s6 + $0xd0] sm:$0xff] }
  0x40   : > { %5758 = vmatprep.mubr.msk.f32.mxu0 %vm620_vm2, %v593_v13  ;;  %5832 = vmatmul.mubr.msk.f32.gmra.mrb[4].mxu1 %vm1215_vm3, %v1211_v16  ;;  %v614_v38 = vld [vmem:[%s6338_s6 + $0xd8] sm:$0xff]  ;;  %v615_v39 = vld [vmem:[%s6338_s6 + $0xe0] sm:$0xff]  ;;  %v616_v40 = vld [vmem:[%s6338_s6 + $0xe8] sm:$0xff] }
  0x41   : > { %5834 = vmatprep.mubr.msk.f32.mxu1 %vm1215_vm3, %v1212_v20  ;;  %v617_v41 = vld [vmem:[%s6338_s6 + $0xf0] sm:$0xff]  ;;  %v618_v42 = vld [vmem:[%s6338_s6 + $0xf8] sm:$0xff]  ;;  %v975_v43 = vld [vmem:[%s6427_s25] sm:$0xff]  ;;  %s6155_s6 = smov 16  }
  0x42   : > { %v976_v44 = vld [vmem:[%s6427_s25 + $0x8] sm:$0xff]  ;;  %v977_v45 = vld [vmem:[%s6427_s25 + $0x10] sm:$0xff]  ;;  %v978_v46 = vld [vmem:[%s6427_s25 + $0x18] sm:$0xff] }
  0x43   : > { %5759 = vmatmul.mubr.msk.f32.gmra.mrb[6].mxu0 %vm620_vm2, %v594_v14  ;;  %v979_v47 = vld [vmem:[%s6427_s25 + $0x20] sm:$0xff]  ;;  %v980_v48 = vld [vmem:[%s6427_s25 + $0x28] sm:$0xff]  ;;  %v981_v49 = vld [vmem:[%s6427_s25 + $0x30] sm:$0xff] }
  0x44   : > { %5761 = vmatprep.mubr.msk.f32.mxu0 %vm620_vm2, %v595_v17  ;;  %5835 = vmatmul.mubr.msk.f32.gmra.mrb[6].mxu1 %vm1215_vm3, %v1213_v21  ;;  %v982_v50 = vld [vmem:[%s6427_s25 + $0x38] sm:$0xff]  ;;  %v983_v51 = vld [vmem:[%s6427_s25 + $0x40] sm:$0xff]  ;;  %v984_v52 = vld [vmem:[%s6427_s25 + $0x48] sm:$0xff] }
  0x45   : > { %v985_v53 = vld [vmem:[%s6427_s25 + $0x50] sm:$0xff]  ;;  %v986_v54 = vld [vmem:[%s6427_s25 + $0x58] sm:$0xff]  ;;  %v987_v55 = vld [vmem:[%s6427_s25 + $0x60] sm:$0xff] }
  0x46   : > { %v988_v56 = vld [vmem:[%s6427_s25 + $0x68] sm:$0xff]  ;;  %v989_v57 = vld [vmem:[%s6427_s25 + $0x70] sm:$0xff]  ;;  %v990_v58 = vld [vmem:[%s6427_s25 + $0x78] sm:$0xff]  ;;  %s6541_s25 = scalar_lea.vmem %s8570_s1, %s6333_s0 }
  0x47   : > { %5762 = vmatmul.mubr.msk.f32.gmra.mrb[8].mxu0 %vm620_vm2, %v596_v18 }
  0x48   : > { %5764 = vmatprep.mubr.msk.f32.mxu0 %vm620_vm2, %v597_v19 }
  0x4b   : > { %5765 = vmatmul.mubr.msk.f32.gmra.mrb[10].mxu0 %vm620_vm2, %v598_v22 }
  0x4c   : > { %5767 = vmatprep.mubr.msk.f32.mxu0 %vm620_vm2, %v599_v23 }
  0x4f   : > { %5768 = vmatmul.mubr.msk.f32.gmra.mrb[12].mxu0 %vm620_vm2, %v600_v24 }
  0x50   : > { %5770 = vmatprep.mubr.msk.f32.mxu0 %vm620_vm2, %v601_v25 }
  0x53   : > { %5771 = vmatmul.mubr.msk.f32.gmra.mrb[14].mxu0 %vm620_vm2, %v602_v26 }
  0x54   : > { %5773 = vmatprep.mubr.msk.f32.mxu0 %vm620_vm2, %v603_v27 }
  0x57   : > { %5774 = vmatmul.mubr.msk.f32.gmra.mrb[16].mxu0 %vm620_vm2, %v604_v28 }
  0x58   : > { %5776 = vmatprep.mubr.msk.f32.mxu0 %vm620_vm2, %v605_v29 }
  0x5b   : > { %5777 = vmatmul.mubr.msk.f32.gmra.mrb[18].mxu0 %vm620_vm2, %v606_v30 }
  0x5c   : > { %5779 = vmatprep.mubr.msk.f32.mxu0 %vm620_vm2, %v607_v31 }
  0x5f   : > { %5780 = vmatmul.mubr.msk.f32.gmra.mrb[20].mxu0 %vm620_vm2, %v608_v32 }
  0x60   : > { %5782 = vmatprep.mubr.msk.f32.mxu0 %vm620_vm2, %v609_v33 }
  0x63   : > { %5783 = vmatmul.mubr.msk.f32.gmra.mrb[22].mxu0 %vm620_vm2, %v610_v34 }
  0x64   : > { %5785 = vmatprep.mubr.msk.f32.mxu0 %vm620_vm2, %v611_v35 }
  0x67   : > { %5786 = vmatmul.mubr.msk.f32.gmra.mrb[24].mxu0 %vm620_vm2, %v612_v36 }
  0x68   : > { %5788 = vmatprep.mubr.msk.f32.mxu0 %vm620_vm2, %v613_v37 }
  0x6b   : > { %5789 = vmatmul.mubr.msk.f32.gmra.mrb[26].mxu0 %vm620_vm2, %v614_v38 }
  0x6c   : > { %5791 = vmatprep.mubr.msk.f32.mxu0 %vm620_vm2, %v615_v39 }
  0x6f   : > { %5792 = vmatmul.mubr.msk.f32.gmra.mrb[28].mxu0 %vm620_vm2, %v616_v40 }
  0x70   : > { %5794 = vmatprep.mubr.msk.f32.mxu0 %vm620_vm2, %v617_v41 }
  0x73   : > { %5795 = vmatmul.mubr.msk.f32.gmra.mrb[30].mxu0 %vm620_vm2, %v618_v42 }
  0x74   : > { %5799 = vmatprep.mubr.msk.f32.mxu0 %vm992_vm4, %v975_v43 }
  0x77   : > { %5800 = vmatmul.mubr.msk.f32.vlgmr.msra.gmra.mrb[32].mxu0 %vm992_vm4, %v976_v44 }
  0x78   : > { %5802 = vmatprep.mubr.msk.f32.mxu0 %vm992_vm4, %v977_v45 }
  0x7b   : > { %5803 = vmatmul.mubr.msk.f32.gmra.mrb[34].mxu0 %vm992_vm4, %v978_v46 }
  0x7c   : > { %5805 = vmatprep.mubr.msk.f32.mxu0 %vm992_vm4, %v979_v47 }
  0x7f   : > { %5806 = vmatmul.mubr.msk.f32.gmra.mrb[36].mxu0 %vm992_vm4, %v980_v48 }
  0x80   : > { %5808 = vmatprep.mubr.msk.f32.mxu0 %vm992_vm4, %v981_v49 }
  0x83   : > { %5809 = vmatmul.mubr.msk.f32.gmra.mrb[38].mxu0 %vm992_vm4, %v982_v50 }
  0x84   : > { %5811 = vmatprep.mubr.msk.f32.mxu0 %vm992_vm4, %v983_v51 }
  0x87   : > { %5812 = vmatmul.mubr.msk.f32.gmra.mrb[40].mxu0 %vm992_vm4, %v984_v52 }
  0x88   : > { %5814 = vmatprep.mubr.msk.f32.mxu0 %vm992_vm4, %v985_v53 }
  0x8b   : > { %5815 = vmatmul.mubr.msk.f32.gmra.mrb[42].mxu0 %vm992_vm4, %v986_v54 }
  0x8c   : > { %5817 = vmatprep.mubr.msk.f32.mxu0 %vm992_vm4, %v987_v55 }
  0x8f   : > { %5818 = vmatmul.mubr.msk.f32.gmra.mrb[44].mxu0 %vm992_vm4, %v988_v56 }
  0x90   : > { %5820 = vmatprep.mubr.msk.f32.mxu0 %vm992_vm4, %v989_v57 }
  0x93   : > { %5821 = vmatmul.mubr.msk.f32.gmra.mrb[46].mxu0 %vm992_vm4, %v990_v58 }
 0x10a   : > { %v5751_v59 = vpop.f32.mrb[0].mxu0 }
 0x10b   : > { %v5827_v60 = vpop.f32.mrb[0].mxu1  ;;  %944 = vst.msk [vmem:[#allocation2 + $0x8] sm:$0xff] %vm942_vm5, %v5751_v59  ;;  %v783_v61 = vpop.f32.mrb[1].mxu0 }
 0x10c   : > { %1350 = vst.msk [vmem:[#allocation4 + $0x8] sm:$0xff] %vm942_vm5, %v5827_v60  ;;  %v1310_v62 = vpop.f32.mrb[1].mxu1  ;;  %943 = vst.msk [vmem:[#allocation2] sm:$0xff] %vm942_vm5, %v783_v61 }
 0x10d   : > { %1349 = vst.msk [vmem:[#allocation4] sm:$0xff] %vm942_vm5, %v1310_v62 }
 0x10e   : > { %v5754_v63 = vpop.f32.mrb[2].mxu0 }
 0x10f   : > { %v5830_v0 = vpop.f32.mrb[2].mxu1  ;;  %946 = vst.msk [vmem:[#allocation2 + $0x18] sm:$0xff] %vm942_vm5, %v5754_v63  ;;  %v793_v1 = vpop.f32.mrb[3].mxu0 }
 0x110   : > { %1352 = vst.msk [vmem:[#allocation4 + $0x18] sm:$0xff] %vm942_vm5, %v5830_v0  ;;  %v1320_v2 = vpop.f32.mrb[3].mxu1  ;;  %945 = vst.msk [vmem:[#allocation2 + $0x10] sm:$0xff] %vm942_vm5, %v793_v1 }
 0x111   : > { %1351 = vst.msk [vmem:[#allocation4 + $0x10] sm:$0xff] %vm942_vm5, %v1320_v2 }
 0x112   : > { %v5757_v3 = vpop.f32.mrb[4].mxu0  ;;  %v1521_v7 = vld [vmem:[#allocation2 + $0x8] sm:$0xff] }
 0x113   : > { %v1484_v4 = vld [vmem:[#allocation4 + $0x8] sm:$0xff]  ;;  %948 = vst.msk [vmem:[#allocation2 + $0x28] sm:$0xff] %vm942_vm5, %v5757_v3  ;;  %v803_v5 = vpop.f32.mrb[5].mxu0  ;;  %v5833_v8 = vpop.f32.mrb[4].mxu1  ;;  %v1525_v12 = vmul.f32 0.25, %v1521_v7  ;;  %v1408_v13 = vmul.f32 0.75, %v1521_v7 }
 0x114   : > { %1493 = vrot.lane.b32.xlu1 %v1484_v4, %s6155_s6  ;;  %v6475_v6 = vld [vmem:[#allocation4] sm:$0xff]  ;;  %947 = vst.msk [vmem:[#allocation2 + $0x20] sm:$0xff] %vm942_vm5, %v803_v5  ;;  %1354 = vst.msk [vmem:[#allocation4 + $0x28] sm:$0xff] %vm942_vm5, %v5833_v8  ;;  %v1330_v10 = vpop.f32.mrb[5].mxu1  ;;  %v2743_v19 = vmul.f32 0.3125, %v1484_v4  ;;  %v2923_v23 = vmul.f32 0.1875, %v1484_v4 }
 0x115   : > { %1491 = vrot.lane.b32.xlu0 %v6475_v6, %s6155_s6  ;;  %1353 = vst.msk [vmem:[#allocation4 + $0x20] sm:$0xff] %vm942_vm5, %v1330_v10  ;;  %v1403_v18 = vld [vmem:[#allocation2] sm:$0xff]  ;;  %v3103_v27 = vmul.f32 0.0625, %v1484_v4  ;;  %v2742_v29 = vmul.f32 0.3125, %v6475_v6  ;;  %v1935_v31 = vmul.f32 0.9375, %v1484_v4  ;;  %v2922_v33 = vmul.f32 0.1875, %v6475_v6 }
 0x116   : > { %v5760_v9 = vpop.f32.mrb[6].mxu0  ;;  %v1407_v21 = vmul.f32 0.75, %v1403_v18  ;;  %v1524_v25 = vmul.f32 0.25, %v1403_v18  ;;  %v1406_v36 = vld [vmem:[#allocation2 + $0x18] sm:$0xff]  ;;  %v3102_v38 = vmul.f32 0.0625, %v6475_v6  ;;  %v1934_v42 = vmul.f32 0.9375, %v6475_v6 }
 0x117   : > { %950 = vst.msk [vmem:[#allocation2 + $0x38] sm:$0xff] %vm942_vm5, %v5760_v9  ;;  %v813_v11 = vpop.f32.mrb[7].mxu0  ;;  %v5836_v15 = vpop.f32.mrb[6].mxu1  ;;  %v1486_v35 = vld [vmem:[#allocation4 + $0x18] sm:$0xff]  ;;  %v1410_v40 = vmul.f32 0.75, %v1406_v36  ;;  %v1527_v44 = vmul.f32 0.25, %v1406_v36 }
 0x118   : > { %1642 = vrot.lane.b32.xlu1 %v1484_v4, %s6156_s26  ;;  %949 = vst.msk [vmem:[#allocation2 + $0x30] sm:$0xff] %vm942_vm5, %v813_v11  ;;  %1356 = vst.msk [vmem:[#allocation4 + $0x38] sm:$0xff] %vm942_vm5, %v5836_v15  ;;  %v1340_v17 = vpop.f32.mrb[7].mxu1  ;;  %v1405_v46 = vld [vmem:[#allocation2 + $0x10] sm:$0xff]  ;;  %v6547_v4 = vstv %s1357_s7  ;;  %v1358_v7 = vld [vmem:[%s6541_s25] sm:$0xff]  ;;  %s6159_s7 = smov 80  }
 0x119   : > { %1640 = vrot.lane.b32.xlu0 %v6475_v6, %s6156_s26  ;;  %1355 = vst.msk [vmem:[#allocation4 + $0x30] sm:$0xff] %vm942_vm5, %v1340_v17  ;;  %v1485_v48 = vld [vmem:[#allocation4 + $0x10] sm:$0xff]  ;;  %v1409_v50 = vmul.f32 0.75, %v1405_v46  ;;  %v1526_v53 = vmul.f32 0.25, %v1405_v46  ;;  %v1363_v15 = vmul.f32 %v6547_v4, %v1358_v7  ;;  %v1367_v18 = vld [vmem:[#allocation2] sm:$0xff] }
 0x11a   : > { %v5763_v14 = vpop.f32.mrb[8].mxu0  ;;  %v1432_v49 = vld [vmem:[#allocation2 + $0x28] sm:$0xff]  ;;  %v1359_v5 = vld [vmem:[%s6541_s25 + $0x10] sm:$0xff] }
 0x11b   : > { %952 = vst.msk [vmem:[#allocation2 + $0x48] sm:$0xff] %vm942_vm5, %v5763_v14  ;;  %v823_v16 = vpop.f32.mrb[9].mxu0  ;;  %v1431_v51 = vld [vmem:[#allocation2 + $0x20] sm:$0xff]  ;;  %v1436_v55 = vmul.f32 0.25, %v1432_v49  ;;  %v1674_v61 = vmul.f32 0.75, %v1432_v49  ;;  %v2767_v1 = vld [vmem:[#allocation4 + $0x28] sm:$0xff]  ;;  %v1364_v11 = vmul.f32 %v6547_v4, %v1359_v5 }
 0x11c   : > { %1534 = vrot.lane.b32.xlu1 %v1525_v12, %s6156_s26  ;;  %951 = vst.msk [vmem:[#allocation2 + $0x40] sm:$0xff] %vm942_vm5, %v823_v16  ;;  %v1435_v56 = vmul.f32 0.25, %v1431_v51  ;;  %v1673_v63 = vmul.f32 0.75, %v1431_v51  ;;  %v2766_v3 = vld [vmem:[#allocation4 + $0x20] sm:$0xff]  ;;  %v2771_v8 = vmul.f32 0.6875, %v2767_v1  ;;  %v1368_v14 = vld [vmem:[#allocation2 + $0x8] sm:$0xff] }
 0x11d   : > { %1417 = vrot.lane.b32.xlu0 %v1408_v13, %s6155_s6  ;;  %v2770_v9 = vmul.f32 0.6875, %v2766_v3  ;;  %v1361_v16 = vld [vmem:[%s6541_s25 + $0x30] sm:$0xff] }
 0x11e   : > { %v5766_v20 = vpop.f32.mrb[10].mxu0  ;;  %v6555_v10 = vld [vmem:[#allocation2 + $0x38] sm:$0xff]  ;;  %v1385_v1 = vld [vmem:[#allocation4 + $0x10] sm:$0xff] }
 0x11f   : > { %954 = vst.msk [vmem:[#allocation2 + $0x58] sm:$0xff] %vm942_vm5, %v5766_v20  ;;  %v833_v22 = vpop.f32.mrb[11].mxu0  ;;  %v6558_v13 = vld [vmem:[#allocation2 + $0x30] sm:$0xff]  ;;  %v1438_v20 = vmul.f32 0.25, %v6555_v10  ;;  %v1676_v7 = vmul.f32 0.75, %v6555_v10 }
 0x120   : > { %2752 = vrot.lane.b32.xlu1 %v2743_v19, %s6155_s6  ;;  %953 = vst.msk [vmem:[#allocation2 + $0x50] sm:$0xff] %vm942_vm5, %v833_v22  ;;  %v1360_v19 = vld [vmem:[%s6541_s25 + $0x20] sm:$0xff]  ;;  %v1372_v22 = vadd.f32 %v1368_v14, %v1364_v11 }
 0x121   : > { %1415 = vrot.lane.b32.xlu0 %v1407_v21, %s6155_s6  ;;  %v1437_v21 = vmul.f32 0.25, %v6558_v13 }
 0x122   : > { %v5769_v24 = vpop.f32.mrb[12].mxu0  ;;  %v2000_v10 = vld [vmem:[#allocation2 + $0x48] sm:$0xff] }
 0x123   : > { %956 = vst.msk [vmem:[#allocation2 + $0x68] sm:$0xff] %vm942_vm5, %v5769_v24  ;;  %v843_v26 = vpop.f32.mrb[13].mxu0 }
 0x124   : > { %2932 = vrot.lane.b32.xlu1 %v2923_v23, %s6156_s26  ;;  %955 = vst.msk [vmem:[#allocation2 + $0x60] sm:$0xff] %vm942_vm5, %v843_v26  ;;  %v1366_v23 = vmul.f32 %v6547_v4, %v1361_v16 }
 0x125   : > { %1532 = vrot.lane.b32.xlu0 %v1524_v25, %s6156_s26  ;;  %v2535_v25 = vld [vmem:[%s6541_s25 + $0x18] sm:$0xff] }
 0x126   : > { %v5772_v28 = vpop.f32.mrb[14].mxu0 }
 0x127   : > { %958 = vst.msk [vmem:[#allocation2 + $0x78] sm:$0xff] %vm942_vm5, %v5772_v28  ;;  %v853_v30 = vpop.f32.mrb[15].mxu0  ;;  %v1371_v28 = vadd.f32 %v1367_v18, %v1363_v15  ;;  %v1675_v15 = vmul.f32 0.75, %v6558_v13 }
 0x128   : > { %3112 = vrot.lane.b32.xlu1 %v3103_v27, %s6157_s30  ;;  %957 = vst.msk [vmem:[#allocation2 + $0x70] sm:$0xff] %vm942_vm5, %v853_v30  ;;  %v1365_v30 = vmul.f32 %v6547_v4, %v1360_v19 }
 0x129   : > { %2750 = vrot.lane.b32.xlu0 %v2742_v29, %s6155_s6  ;;  %v1370_v29 = vld [vmem:[#allocation2 + $0x18] sm:$0xff] }
 0x12a   : > { %v5775_v32 = vpop.f32.mrb[16].mxu0  ;;  %v2543_v24 = vld [vmem:[#allocation2 + $0x68] sm:$0xff] }
 0x12b   : > { %960 = vst.msk [vmem:[#allocation2 + $0x88] sm:$0xff] %vm942_vm5, %v5775_v32  ;;  %v863_v34 = vpop.f32.mrb[17].mxu0  ;;  %v2542_v36 = vld [vmem:[#allocation2 + $0x60] sm:$0xff] }
 0x12c   : > { %1944 = vrot.lane.b32.xlu1 %v1935_v31, %s6158_s23  ;;  %959 = vst.msk [vmem:[#allocation2 + $0x80] sm:$0xff] %vm942_vm5, %v863_v34  ;;  %v2534_v31 = vld [vmem:[%s6541_s25 + $0x8] sm:$0xff] }
 0x12d   : > { %2930 = vrot.lane.b32.xlu0 %v2922_v33, %s6156_s26 }
 0x12e   : > { %v5778_v37 = vpop.f32.mrb[18].mxu0  ;;  %v2545_v46 = vld [vmem:[#allocation2 + $0x78] sm:$0xff] }
 0x12f   : > { %962 = vst.msk [vmem:[#allocation2 + $0x98] sm:$0xff] %vm942_vm5, %v5778_v37  ;;  %v873_v39 = vpop.f32.mrb[19].mxu0  ;;  %v6581_v37 = vld [vmem:[#allocation4 + $0x8] sm:$0xff]  ;;  %v2549_v3 = vmul.f32 0.25, %v2545_v46 }
 0x130   : > { %1497 = vrot.lane.b32.xlu1 %v1486_v35, %s6155_s6  ;;  %961 = vst.msk [vmem:[#allocation2 + $0x90] sm:$0xff] %vm942_vm5, %v873_v39  ;;  %v1369_v35 = vld [vmem:[#allocation2 + $0x10] sm:$0xff]  ;;  %v2547_v39 = vmul.f32 0.25, %v2543_v24 }
 0x131   : > { %3110 = vrot.lane.b32.xlu0 %v3102_v38, %s6157_s30 }
 0x132   : > { %v5781_v41 = vpop.f32.mrb[20].mxu0  ;;  %v2555_v51 = vld [vmem:[#allocation2 + $0x88] sm:$0xff] }
 0x133   : > { %964 = vst.msk [vmem:[#allocation2 + $0xa8] sm:$0xff] %vm942_vm5, %v5781_v41  ;;  %v883_v43 = vpop.f32.mrb[21].mxu0  ;;  %v3457_v41 = vld [vmem:[%s6541_s25 + $0x38] sm:$0xff] }
 0x134   : > { %1421 = vrot.lane.b32.xlu1 %v1410_v40, %s6155_s6  ;;  %963 = vst.msk [vmem:[#allocation2 + $0xa0] sm:$0xff] %vm942_vm5, %v883_v43  ;;  %v6585_v40 = vmul.f32 %v2535_v25, %v6547_v4  ;;  %v6590_v43 = vld [vmem:[#allocation4] sm:$0xff] }
 0x135   : > { %1942 = vrot.lane.b32.xlu0 %v1934_v42, %s6158_s23 }
 0x136   : > { %v5784_v45 = vpop.f32.mrb[22].mxu0  ;;  %8571 = vst [vmem:[#allocation13_spill] sm:$0xff] %v6585_v40 }
 0x137   : > { %966 = vst.msk [vmem:[#allocation2 + $0xb8] sm:$0xff] %vm942_vm5, %v5784_v45  ;;  %v893_v47 = vpop.f32.mrb[23].mxu0  ;;  %v3456_v45 = vld [vmem:[%s6541_s25 + $0x28] sm:$0xff]  ;;  %v2556_v18 = vld [vmem:[#allocation2 + $0x90] sm:$0xff] }
 0x138   : > { %1538 = vrot.lane.b32.xlu1 %v1527_v44, %s6156_s26  ;;  %965 = vst.msk [vmem:[#allocation2 + $0xb0] sm:$0xff] %vm942_vm5, %v893_v47  ;;  %v1374_v44 = vadd.f32 %v1370_v29, %v1366_v23  ;;  %v1999_v23 = vld [vmem:[#allocation2 + $0x40] sm:$0xff]  ;;  %v2560_v29 = vmul.f32 0.75, %v2556_v18 }
 0x139   : > { %1495 = vrot.lane.b32.xlu0 %v1485_v48, %s6155_s6 }
 0x13a   : > { %v5787_v52 = vpop.f32.mrb[24].mxu0 }
 0x13b   : > { %968 = vst.msk [vmem:[#allocation2 + $0xc8] sm:$0xff] %vm942_vm5, %v5787_v52  ;;  %v903_v54 = vpop.f32.mrb[25].mxu0  ;;  %v2546_v52 = vmul.f32 0.25, %v2542_v36 }
 0x13c   : > { %1419 = vrot.lane.b32.xlu1 %v1409_v50, %s6155_s6  ;;  %967 = vst.msk [vmem:[#allocation2 + $0xc0] sm:$0xff] %vm942_vm5, %v903_v54  ;;  %v1373_v50 = vadd.f32 %v1369_v35, %v1365_v30  ;;  %v2544_v54 = vld [vmem:[#allocation2 + $0x70] sm:$0xff] }
 0x13d   : > { %1536 = vrot.lane.b32.xlu0 %v1526_v53, %s6156_s26  ;;  %v6597_v53 = vmul.f32 %v2534_v31, %v6547_v4  ;;  %v2548_v5 = vmul.f32 0.25, %v2544_v54 }
 0x13e   : > { %v5790_v57 = vpop.f32.mrb[26].mxu0 }
 0x13f   : > { %970 = vst.msk [vmem:[#allocation2 + $0xd8] sm:$0xff] %vm942_vm5, %v5790_v57  ;;  %v913_v58 = vpop.f32.mrb[27].mxu0  ;;  %8572 = vst [vmem:[#allocation14_spill] sm:$0xff] %v6597_v53  ;;  %v2550_v11 = vadd.f32 %v2546_v52, %v6597_v53 }
 0x140   : > { %1445 = vrot.lane.b32.xlu1 %v1436_v55, %s6155_s6  ;;  %969 = vst.msk [vmem:[#allocation2 + $0xd0] sm:$0xff] %vm942_vm5, %v913_v58  ;;  %v2554_v58 = vld [vmem:[#allocation2 + $0x80] sm:$0xff] }
 0x141   : > { %1443 = vrot.lane.b32.xlu0 %v1435_v56, %s6155_s6 }
 0x142   : > { %v5793_v59 = vpop.f32.mrb[28].mxu0 }
 0x143   : > { %972 = vst.msk [vmem:[#allocation2 + $0xe8] sm:$0xff] %vm942_vm5, %v5793_v59  ;;  %v923_v60 = vpop.f32.mrb[29].mxu0  ;;  %v1386_v59 = vld [vmem:[#allocation4 + $0x18] sm:$0xff] }
 0x144   : > { %1832 = vrot.lane.b32.xlu1 %v1436_v55, %s6158_s23  ;;  %971 = vst.msk [vmem:[#allocation2 + $0xe0] sm:$0xff] %vm942_vm5, %v923_v60 }
 0x145   : > { %1830 = vrot.lane.b32.xlu0 %v1435_v56, %s6158_s23 }
 0x146   : > { %v5796_v62 = vpop.f32.mrb[30].mxu0 }
 0x147   : > { %974 = vst.msk [vmem:[#allocation2 + $0xf8] sm:$0xff] %vm942_vm5, %v5796_v62  ;;  %v933_v0 = vpop.f32.mrb[31].mxu0  ;;  %v6610_v62 = vmul.f32 %v3457_v41, %v6547_v4 }
 0x148   : > { %1683 = vrot.lane.b32.xlu1 %v1674_v61, %s6157_s30  ;;  %973 = vst.msk [vmem:[#allocation2 + $0xf0] sm:$0xff] %vm942_vm5, %v933_v0 }
 0x149   : > { %1681 = vrot.lane.b32.xlu0 %v1673_v63, %s6157_s30  ;;  %8573 = vst [vmem:[#allocation15_spill] sm:$0xff] %v6610_v62 }
 0x14a   : > { %v5801_v2 = vpop.f32.mrb[32].mxu0 }
 0x14b   : > { %1191 = vst.msk [vmem:[#allocation3 + $0x8] sm:$0xff] %vm942_vm5, %v5801_v2  ;;  %v1111_v6 = vpop.f32.mrb[33].mxu0  ;;  %v2559_v2 = vmul.f32 0.75, %v2555_v51  ;;  %v2595_v51 = vmul.f32 0.4375, %v6581_v37 }
 0x14c   : > { %1190 = vst.msk [vmem:[#allocation3] sm:$0xff] %vm942_vm5, %v1111_v6  ;;  %1562 = vrot.lane.b32.xlu1 %v1674_v61, %s6156_s26  ;;  %v2551_v61 = vadd.f32 %v2547_v39, %v6585_v40 }
 0x14d   : > { %1560 = vrot.lane.b32.xlu0 %v1673_v63, %s6156_s26  ;;  %v6613_v63 = vmul.f32 %v3456_v45, %v6547_v4 }
 0x14e   : > { %v5804_v12 = vpop.f32.mrb[34].mxu0  ;;  %v2563_v19 = vadd.f32 %v2559_v2, %v2551_v61 }
 0x14f   : > { %1193 = vst.msk [vmem:[#allocation3 + $0x18] sm:$0xff] %vm942_vm5, %v5804_v12  ;;  %v1121_v17 = vpop.f32.mrb[35].mxu0  ;;  %8574 = vst [vmem:[#allocation16_spill] sm:$0xff] %v6613_v63  ;;  %v2557_v12 = vld [vmem:[#allocation2 + $0x98] sm:$0xff]  ;;  %v2552_v13 = vadd.f32 %v6613_v63, %v2548_v5 }
 0x150   : > { %1192 = vst.msk [vmem:[#allocation3 + $0x10] sm:$0xff] %vm942_vm5, %v1121_v17  ;;  %2780 = vrot.lane.b32.xlu1 %v2771_v8, %s6155_s6 }
 0x151   : > { %2778 = vrot.lane.b32.xlu0 %v2770_v9, %s6155_s6  ;;  %v2558_v9 = vmul.f32 0.75, %v2554_v58 }
 0x152   : > { %v5807_v26 = vpop.f32.mrb[36].mxu0  ;;  %v6571_v27 = vld [vmem:[#allocation3 + $0x8] sm:$0xff] }
 0x153   : > { %1195 = vst.msk [vmem:[#allocation3 + $0x28] sm:$0xff] %vm942_vm5, %v5807_v26  ;;  %v1131_v32 = vpop.f32.mrb[37].mxu0  ;;  %v6576_v33 = vld [vmem:[#allocation3] sm:$0xff]  ;;  %v1380_v34 = vadd.f32 %v6571_v27, %v1372_v22  ;;  %v2562_v26 = vadd.f32 %v2558_v9, %v2550_v11 }
 0x154   : > { %1449 = vrot.lane.b32.xlu1 %v1438_v20, %s6155_s6  ;;  %1194 = vst.msk [vmem:[#allocation3 + $0x20] sm:$0xff] %vm942_vm5, %v1131_v32  ;;  %v1379_v38 = vadd.f32 %v6576_v33, %v1371_v28  ;;  %v2004_v32 = vmul.f32 0.75, %v2000_v10 }
 0x155   : > { %1447 = vrot.lane.b32.xlu0 %v1437_v21, %s6155_s6  ;;  %v1388_v42 = vadd.f32 %v6581_v37, %v1380_v34  ;;  %v2003_v34 = vmul.f32 0.75, %v1999_v23 }
 0x156   : > { %v5810_v47 = vpop.f32.mrb[38].mxu0  ;;  %v6593_v48 = vld [vmem:[#allocation3 + $0x18] sm:$0xff]  ;;  %v1387_v49 = vadd.f32 %v6590_v43, %v1379_v38 }
 0x157   : > { %1197 = vst.msk [vmem:[#allocation3 + $0x38] sm:$0xff] %vm942_vm5, %v5810_v47  ;;  %v1141_v55 = vpop.f32.mrb[39].mxu0  ;;  %v6600_v56 = vld [vmem:[#allocation3 + $0x10] sm:$0xff]  ;;  %1392 = vst.msk [vmem:[#allocation5 + $0x10] sm:$0xff] %vm942_vm5, %v1388_v42  ;;  %v1382_v57 = vadd.f32 %v6593_v48, %v1374_v44  ;;  %v2564_v44 = vadd.f32 %v2560_v29, %v2552_v13  ;;  %v6637_v47 = vld [vmem:[#allocation4 + $0x28] sm:$0xff] }
 0x158   : > { %1836 = vrot.lane.b32.xlu1 %v1438_v20, %s6158_s23  ;;  %1196 = vst.msk [vmem:[#allocation3 + $0x30] sm:$0xff] %vm942_vm5, %v1141_v55  ;;  %1391 = vst.msk [vmem:[#allocation5] sm:$0xff] %vm942_vm5, %v1387_v49  ;;  %v1381_v60 = vadd.f32 %v6600_v56, %v1373_v50  ;;  %v2561_v20 = vmul.f32 0.75, %v2557_v12  ;;  %v6640_v50 = vld [vmem:[#allocation4 + $0x20] sm:$0xff]  ;;  %v2594_v55 = vmul.f32 0.4375, %v6590_v43  ;;  %v2607_v61 = vmul.f32 0.5625, %v6637_v47 }
 0x159   : > { %1834 = vrot.lane.b32.xlu0 %v1437_v21, %s6158_s23  ;;  %v1390_v0 = vadd.f32 %v1386_v59, %v1382_v57  ;;  %v2553_v21 = vadd.f32 %v6610_v62, %v2549_v3  ;;  %v2295_v59 = vld [vmem:[#allocation4 + $0x18] sm:$0xff]  ;;  %v2606_v37 = vmul.f32 0.5625, %v6640_v50  ;;  %v2185_v43 = vmul.f32 0.25, %v2000_v10  ;;  %v2001_v13 = vld [vmem:[#allocation2 + $0x50] sm:$0xff]  ;;  %v2028_v29 = vld [vmem:[#allocation2 + $0x68] sm:$0xff] }
 0x15a   : > { %v5813_v6 = vpop.f32.mrb[40].mxu0  ;;  %v1389_v8 = vadd.f32 %v1385_v1, %v1381_v60  ;;  %v2567_v16 = vld [vmem:[#allocation3 + $0x28] sm:$0xff]  ;;  %v2294_v1 = vld [vmem:[#allocation4 + $0x10] sm:$0xff]  ;;  %v2597_v9 = vmul.f32 0.4375, %v2295_v59  ;;  %v2002_v10 = vld [vmem:[#allocation2 + $0x58] sm:$0xff] }
 0x15b   : > { %1199 = vst.msk [vmem:[#allocation3 + $0x48] sm:$0xff] %vm942_vm5, %v5813_v6  ;;  %v1151_v14 = vpop.f32.mrb[41].mxu0  ;;  %1394 = vst.msk [vmem:[#allocation5 + $0x30] sm:$0xff] %vm942_vm5, %v1390_v0  ;;  %v2566_v17 = vld [vmem:[#allocation3 + $0x20] sm:$0xff]  ;;  %v2571_v24 = vmul.f32 0.375, %v2567_v16  ;;  %v2565_v36 = vadd.f32 %v2561_v20, %v2553_v21  ;;  %v2769_v6 = vld [vmem:[#allocation4 + $0x38] sm:$0xff] }
 0x15c   : > { %1198 = vst.msk [vmem:[#allocation3 + $0x40] sm:$0xff] %vm942_vm5, %v1151_v14  ;;  %1687 = vrot.lane.b32.xlu1 %v1676_v7, %s6157_s30  ;;  %1393 = vst.msk [vmem:[#allocation5 + $0x20] sm:$0xff] %vm942_vm5, %v1389_v8  ;;  %v2570_v25 = vmul.f32 0.375, %v2566_v17  ;;  %v2184_v17 = vmul.f32 0.25, %v1999_v23  ;;  %v2006_v23 = vmul.f32 0.75, %v2002_v10 }
 0x15d   : > { %1685 = vrot.lane.b32.xlu0 %v1675_v15, %s6157_s30  ;;  %v2575_v39 = vadd.f32 %v2571_v24, %v2563_v19  ;;  %v2609_v19 = vmul.f32 0.5625, %v2769_v6 }
 0x15e   : > { %v5816_v22 = vpop.f32.mrb[42].mxu0  ;;  %v2420_v28 = vld [vmem:[#allocation3 + $0x38] sm:$0xff]  ;;  %v2574_v41 = vadd.f32 %v2570_v25, %v2562_v26  ;;  %v2005_v25 = vmul.f32 0.75, %v2001_v13  ;;  %v2187_v26 = vmul.f32 0.25, %v2002_v10  ;;  %v2654_v10 = vld [vmem:[#allocation2 + $0xa0] sm:$0xff] }
 0x15f   : > { %1201 = vst.msk [vmem:[#allocation3 + $0x58] sm:$0xff] %vm942_vm5, %v5816_v22  ;;  %v1161_v30 = vpop.f32.mrb[43].mxu0  ;;  %v2419_v31 = vld [vmem:[#allocation3 + $0x30] sm:$0xff]  ;;  %v2573_v35 = vmul.f32 0.375, %v2420_v28  ;;  %v2186_v28 = vmul.f32 0.25, %v2001_v13 }
 0x160   : > { %1200 = vst.msk [vmem:[#allocation3 + $0x50] sm:$0xff] %vm942_vm5, %v1161_v30  ;;  %1566 = vrot.lane.b32.xlu1 %v1676_v7, %s6156_s26  ;;  %v2572_v42 = vmul.f32 0.375, %v2419_v31  ;;  %v2768_v7 = vld [vmem:[#allocation4 + $0x30] sm:$0xff]  ;;  %v2027_v30 = vld [vmem:[#allocation2 + $0x60] sm:$0xff]  ;;  %v2032_v31 = vmul.f32 0.25, %v2028_v29 }
 0x161   : > { %1564 = vrot.lane.b32.xlu0 %v1675_v15, %s6156_s26  ;;  %v2577_v52 = vadd.f32 %v2573_v35, %v2565_v36  ;;  %v2596_v15 = vmul.f32 0.4375, %v2294_v1  ;;  %v2608_v20 = vmul.f32 0.5625, %v2768_v7  ;;  %v2366_v35 = vmul.f32 0.75, %v2028_v29 }
 0x162   : > { %v6631_v38 = vld [vmem:[#allocation3 + $0x48] sm:$0xff]  ;;  %v2576_v60 = vadd.f32 %v2572_v42, %v2564_v44  ;;  %v2029_v44 = vld [vmem:[#allocation2 + $0x70] sm:$0xff] }
 0x163   : > { %v6634_v45 = vmul.f32 0.625, %v6631_v38  ;;  %v2578_v46 = vld [vmem:[#allocation3 + $0x40] sm:$0xff]  ;;  %v2367_v59 = vmul.f32 0.75, %v2029_v44 }
 0x164   : > { %2013 = vrot.lane.b32.xlu1 %v2004_v32, %s6159_s7  ;;  %v2582_v49 = vmul.f32 0.625, %v2578_v46 }
 0x165   : > { %2011 = vrot.lane.b32.xlu0 %v2003_v34, %s6159_s7  ;;  %v2587_v54 = vadd.f32 %v6634_v45, %v2575_v39  ;;  %v2365_v39 = vmul.f32 0.75, %v2027_v30 }
 0x166   : > { %v2586_v57 = vadd.f32 %v2582_v49, %v2574_v41  ;;  %v2267_v58 = vld [vmem:[#allocation3 + $0x58] sm:$0xff] }
 0x167   : > { %v2266_v0 = vld [vmem:[#allocation3 + $0x50] sm:$0xff]  ;;  %v2585_v2 = vmul.f32 0.625, %v2267_v58  ;;  %v2599_v3 = vadd.f32 %v2595_v51, %v2587_v54  ;;  %v2030_v41 = vld [vmem:[#allocation2 + $0x78] sm:$0xff]  ;;  %v2033_v51 = vmul.f32 0.25, %v2029_v44 }
 0x168   : > { %1860 = vrot.lane.b32.xlu1 %v2004_v32, %s6158_s23  ;;  %v2598_v5 = vadd.f32 %v2594_v55, %v2586_v57  ;;  %v2584_v8 = vmul.f32 0.625, %v2266_v0  ;;  %v2031_v32 = vmul.f32 0.25, %v2027_v30  ;;  %v2034_v49 = vmul.f32 0.25, %v2030_v41  ;;  %v2626_v0 = vld [vmem:[#allocation2 + $0x80] sm:$0xff]  ;;  %v2656_v44 = vld [vmem:[#allocation2 + $0xb0] sm:$0xff] }
 0x169   : > { %1858 = vrot.lane.b32.xlu0 %v2003_v34, %s6158_s23  ;;  %v2589_v11 = vadd.f32 %v2585_v2, %v2577_v52  ;;  %v2611_v12 = vadd.f32 %v2607_v61, %v2599_v3  ;;  %v2368_v57 = vmul.f32 0.75, %v2030_v41  ;;  %v2630_v3 = vmul.f32 0.75, %v2626_v0 }
 0x16a   : > { %v2610_v14 = vadd.f32 %v2606_v37, %v2598_v5  ;;  %v2588_v16 = vadd.f32 %v2584_v8, %v2576_v60  ;;  %v2627_v60 = vld [vmem:[#allocation2 + $0x88] sm:$0xff] }
 0x16b   : > { %v2601_v18 = vadd.f32 %v2597_v9, %v2589_v11  ;;  %2615 = vst.msk [vmem:[#allocation5 + $0x18] sm:$0xff] %vm942_vm5, %v2611_v12  ;;  %v2631_v2 = vmul.f32 0.75, %v2627_v60  ;;  %v2811_v7 = vmul.f32 0.25, %v2627_v60  ;;  %v2629_v9 = vld [vmem:[#allocation2 + $0x98] sm:$0xff]  ;;  %v2628_v12 = vld [vmem:[#allocation2 + $0x90] sm:$0xff] }
 0x16c   : > { %2194 = vrot.lane.b32.xlu1 %v2185_v43, %s6160_s16  ;;  %2614 = vst.msk [vmem:[#allocation5 + $0x8] sm:$0xff] %vm942_vm5, %v2610_v14  ;;  %v2600_v21 = vadd.f32 %v2596_v15, %v2588_v16  ;;  %v2633_v15 = vmul.f32 0.75, %v2629_v9  ;;  %v2632_v16 = vmul.f32 0.75, %v2628_v12 }
 0x16d   : > { %2192 = vrot.lane.b32.xlu0 %v2184_v17, %s6160_s16  ;;  %v2613_v22 = vadd.f32 %v2609_v19, %v2601_v18  ;;  %v2655_v19 = vld [vmem:[#allocation2 + $0xa8] sm:$0xff] }
 0x16e   : > { %v2612_v24 = vadd.f32 %v2608_v20, %v2600_v21  ;;  %v2813_v21 = vmul.f32 0.25, %v2629_v9  ;;  %v2991_v29 = vmul.f32 0.75, %v2655_v19  ;;  %v2992_v9 = vmul.f32 0.75, %v2656_v44 }
 0x16f   : > { %2617 = vst.msk [vmem:[#allocation5 + $0x38] sm:$0xff] %vm942_vm5, %v2613_v22  ;;  %v2812_v22 = vmul.f32 0.25, %v2628_v12 }
 0x170   : > { %1711 = vrot.lane.b32.xlu1 %v2185_v43, %s6157_s30  ;;  %2616 = vst.msk [vmem:[#allocation5 + $0x28] sm:$0xff] %vm942_vm5, %v2612_v24  ;;  %v2810_v43 = vmul.f32 0.25, %v2626_v0  ;;  %v2659_v24 = vmul.f32 0.25, %v2655_v19  ;;  %v5819_v0 = vpop.f32.mrb[44].mxu0 }
 0x171   : > { %1709 = vrot.lane.b32.xlu0 %v2184_v17, %s6157_s30  ;;  %1203 = vst.msk [vmem:[#allocation3 + $0x68] sm:$0xff] %vm942_vm5, %v5819_v0 }
 0x174   : > { %2017 = vrot.lane.b32.xlu1 %v2006_v23, %s6159_s7 }
 0x175   : > { %2015 = vrot.lane.b32.xlu0 %v2005_v25, %s6159_s7 }
 0x178   : > { %1864 = vrot.lane.b32.xlu1 %v2006_v23, %s6158_s23  ;;  %v2658_v23 = vmul.f32 0.25, %v2654_v10 }
 0x179   : > { %1862 = vrot.lane.b32.xlu0 %v2005_v25, %s6158_s23 }
 0x17c   : > { %2198 = vrot.lane.b32.xlu1 %v2187_v26, %s6160_s16 }
 0x17d   : > { %2196 = vrot.lane.b32.xlu0 %v2186_v28, %s6160_s16 }
 0x180   : > { %1715 = vrot.lane.b32.xlu1 %v2187_v26, %s6157_s30 }
 0x181   : > { %1713 = vrot.lane.b32.xlu0 %v2186_v28, %s6157_s30 }
 0x184   : > { %2041 = vrot.lane.b32.xlu1 %v2032_v31, %s6159_s7  ;;  %v2990_v31 = vmul.f32 0.75, %v2654_v10 }
 0x185   : > { %2039 = vrot.lane.b32.xlu0 %v2031_v32, %s6159_s7 }
 0x186   : > { %v6667_v34 = vpop.permute.xlu1 %1493 }
 0x187   : > { %v6669_v36 = vpop.permute.xlu0 %1491 }
 0x188   : > { %2375 = vrot.lane.b32.xlu1 %v2366_v35, %s6161_s17 }
 0x189   : > { %2373 = vrot.lane.b32.xlu0 %v2365_v39, %s6161_s17 }
 0x18a   : > { %v6673_v42 = vpop.permute.xlu1 %1642 }
 0x18b   : > { %v6675_v46 = vpop.permute.xlu0 %1640 }
 0x18c   : > { %2222 = vrot.lane.b32.xlu1 %v2366_v35, %s6160_s16 }
 0x18d   : > { %2220 = vrot.lane.b32.xlu0 %v2365_v39, %s6160_s16  ;;  %v2657_v39 = vld [vmem:[#allocation2 + $0xb8] sm:$0xff] }
 0x18e   : > { %v6679_v52 = vpop.permute.xlu1 %1534 }
 0x18f   : > { %v6681_v54 = vpop.permute.xlu0 %1417 }
 0x190   : > { %2045 = vrot.lane.b32.xlu1 %v2034_v49, %s6159_s7 }
 0x191   : > { %2043 = vrot.lane.b32.xlu0 %v2033_v51, %s6159_s7  ;;  %v2661_v51 = vmul.f32 0.25, %v2657_v39 }
 0x192   : > { %v6685_v55 = vpop.permute.xlu1 %2752 }
 0x193   : > { %v6687_v58 = vpop.permute.xlu0 %1415 }
 0x194   : > { %2379 = vrot.lane.b32.xlu1 %v2368_v57, %s6161_s17 }
 0x195   : > { %2377 = vrot.lane.b32.xlu0 %v2367_v59, %s6161_s17 }
 0x196   : > { %v6691_v61 = vpop.permute.xlu1 %2932 }
 0x197   : > { %v6693_v1 = vpop.permute.xlu0 %1532 }
 0x198   : > { %2226 = vrot.lane.b32.xlu1 %v2368_v57, %s6160_s16  ;;  %v2660_v57 = vmul.f32 0.25, %v2656_v44 }
 0x199   : > { %2224 = vrot.lane.b32.xlu0 %v2367_v59, %s6160_s16 }
 0x19a   : > { %v6697_v5 = vpop.permute.xlu1 %3112 }
 0x19b   : > { %8575 = vst [vmem:[#allocation17_spill] sm:$0xff] %v6697_v5  ;;  %v6699_v37 = vpop.permute.xlu0 %2750 }
 0x19c   : > { %2640 = vrot.lane.b32.xlu1 %v2631_v2, %s6155_s6  ;;  %v1171_v2 = vpop.f32.mrb[45].mxu0 }
 0x19d   : > { %2638 = vrot.lane.b32.xlu0 %v2630_v3, %s6155_s6  ;;  %1202 = vst.msk [vmem:[#allocation3 + $0x60] sm:$0xff] %vm942_vm5, %v1171_v2 }
 0x19e   : > { %v6703_v6 = vpop.permute.xlu1 %1944 }
 0x19f   : > { %8576 = vst [vmem:[#allocation18_spill] sm:$0xff] %v6703_v6  ;;  %v6705_v8 = vpop.permute.xlu0 %2930 }
 0x1a0   : > { %8577 = vst [vmem:[#allocation19_spill] sm:$0xff] %v6705_v8  ;;  %2820 = vrot.lane.b32.xlu1 %v2811_v7, %s6156_s26 }
 0x1a1   : > { %2818 = vrot.lane.b32.xlu0 %v2810_v43, %s6156_s26 }
 0x1a2   : > { %v6709_v11 = vpop.permute.xlu1 %1497 }
 0x1a3   : > { %v6711_v14 = vpop.permute.xlu0 %3110 }
 0x1a4   : > { %8578 = vst [vmem:[#allocation20_spill] sm:$0xff] %v6711_v14  ;;  %2403 = vrot.lane.b32.xlu1 %v2811_v7, %s6161_s17  ;;  %v2993_v7 = vmul.f32 0.75, %v2657_v39 }
 0x1a5   : > { %2401 = vrot.lane.b32.xlu0 %v2810_v43, %s6161_s17 }
 0x1a6   : > { %v6715_v17 = vpop.permute.xlu1 %1421 }
 0x1a7   : > { %v6717_v18 = vpop.permute.xlu0 %1942 }
 0x1a8   : > { %8579 = vst [vmem:[#allocation21_spill] sm:$0xff] %v6717_v18  ;;  %2644 = vrot.lane.b32.xlu1 %v2633_v15, %s6155_s6 }
 0x1a9   : > { %2642 = vrot.lane.b32.xlu0 %v2632_v16, %s6155_s6  ;;  %v3015_v16 = vld [vmem:[#allocation2 + $0xc8] sm:$0xff] }
 0x1aa   : > { %v6721_v20 = vpop.permute.xlu1 %1538 }
 0x1ab   : > { %8580 = vst [vmem:[#allocation22_spill] sm:$0xff] %v6721_v20  ;;  %v6723_v13 = vpop.permute.xlu0 %1495 }
 0x1ac   : > { %2824 = vrot.lane.b32.xlu1 %v2813_v21, %s6156_s26  ;;  %v3014_v21 = vld [vmem:[#allocation2 + $0xc0] sm:$0xff] }
 0x1ad   : > { %2822 = vrot.lane.b32.xlu0 %v2812_v22, %s6156_s26  ;;  %v3019_v22 = vmul.f32 0.25, %v3015_v16 }
 0x1ae   : > { %v6727_v25 = vpop.permute.xlu1 %1419 }
 0x1af   : > { %v6729_v26 = vpop.permute.xlu0 %1536 }
 0x1b0   : > { %8581 = vst [vmem:[#allocation23_spill] sm:$0xff] %v6729_v26  ;;  %2668 = vrot.lane.b32.xlu1 %v2659_v24, %s6155_s6 }
 0x1b1   : > { %2666 = vrot.lane.b32.xlu0 %v2658_v23, %s6155_s6 }
 0x1b2   : > { %v6733_v28 = vpop.permute.xlu1 %1445 }
 0x1b3   : > { %v6735_v30 = vpop.permute.xlu0 %1443 }
 0x1b4   : > { %3000 = vrot.lane.b32.xlu1 %v2991_v29, %s6157_s30 }
 0x1b5   : > { %2998 = vrot.lane.b32.xlu0 %v2990_v31, %s6157_s30 }
 0x1b6   : > { %v6739_v32 = vpop.permute.xlu1 %1832 }
 0x1b7   : > { %8582 = vst [vmem:[#allocation24_spill] sm:$0xff] %v6739_v32  ;;  %v6741_v35 = vpop.permute.xlu0 %1830 }
 0x1b8   : > { %8583 = vst [vmem:[#allocation25_spill] sm:$0xff] %v6741_v35  ;;  %2848 = vrot.lane.b32.xlu1 %v2991_v29, %s6156_s26 }
 0x1b9   : > { %2846 = vrot.lane.b32.xlu0 %v2990_v31, %s6156_s26 }
 0x1ba   : > { %v6745_v41 = vpop.permute.xlu1 %1683 }
 0x1bb   : > { %8584 = vst [vmem:[#allocation26_spill] sm:$0xff] %v6745_v41  ;;  %v6747_v49 = vpop.permute.xlu0 %1681 }
 0x1bc   : > { %8585 = vst [vmem:[#allocation27_spill] sm:$0xff] %v6747_v49  ;;  %3180 = vrot.lane.b32.xlu1 %v2659_v24, %s6158_s23  ;;  %v5822_v24 = vpop.f32.mrb[46].mxu0 }
 0x1bd   : > { %3178 = vrot.lane.b32.xlu0 %v2658_v23, %s6158_s23  ;;  %v3018_v23 = vmul.f32 0.25, %v3014_v21  ;;  %1205 = vst.msk [vmem:[#allocation3 + $0x78] sm:$0xff] %vm942_vm5, %v5822_v24  ;;  %v1181_v29 = vpop.f32.mrb[47].mxu0 }
 0x1be   : > { %v6751_v59 = vpop.permute.xlu1 %1562  ;;  %1204 = vst.msk [vmem:[#allocation3 + $0x70] sm:$0xff] %vm942_vm5, %v1181_v29  ;;  %v3016_v29 = vld [vmem:[#allocation2 + $0xd0] sm:$0xff] }
 0x1bf   : > { %v6753_v60 = vpop.permute.xlu0 %1560  ;;  %v3020_v63 = vmul.f32 0.25, %v3016_v29 }
 0x1c0   : > { %2672 = vrot.lane.b32.xlu1 %v2661_v51, %s6155_s6 }
 0x1c1   : > { %2670 = vrot.lane.b32.xlu0 %v2660_v57, %s6155_s6 }
 0x1c2   : > { %v6758_v3 = vpop.permute.xlu1 %2780 }
 0x1c3   : > { %v6761_v43 = vpop.permute.xlu0 %2778 }
 0x1c4   : > { %3004 = vrot.lane.b32.xlu1 %v2993_v7, %s6157_s30 }
 0x1c5   : > { %3002 = vrot.lane.b32.xlu0 %v2992_v9, %s6157_s30 }
 0x1c6   : > { %v6765_v12 = vpop.permute.xlu1 %1449 }
 0x1c7   : > { %v6767_v15 = vpop.permute.xlu0 %1447 }
 0x1c8   : > { %2852 = vrot.lane.b32.xlu1 %v2993_v7, %s6156_s26 }
 0x1c9   : > { %2850 = vrot.lane.b32.xlu0 %v2992_v9, %s6156_s26  ;;  %v3017_v9 = vld [vmem:[#allocation2 + $0xd8] sm:$0xff] }
 0x1ca   : > { %v6771_v19 = vpop.permute.xlu1 %1836 }
 0x1cb   : > { %8586 = vst [vmem:[#allocation28_spill] sm:$0xff] %v6771_v19  ;;  %v6773_v10 = vpop.permute.xlu0 %1834 }
 0x1cc   : > { %8587 = vst [vmem:[#allocation29_spill] sm:$0xff] %v6773_v10  ;;  %3184 = vrot.lane.b32.xlu1 %v2661_v51, %s6158_s23  ;;  %v3319_v51 = vmul.f32 0.75, %v3015_v16  ;;  %v6815_v10 = vmul.f32 0.75, %v3016_v29 }
 0x1cd   : > { %3182 = vrot.lane.b32.xlu0 %v2660_v57, %s6158_s23  ;;  %v3318_v57 = vmul.f32 0.75, %v3014_v21  ;;  %v3021_v21 = vmul.f32 0.25, %v3017_v9 }
 0x1ce   : > { %v6778_v31 = vpop.permute.xlu1 %1687 }
 0x1cf   : > { %8588 = vst [vmem:[#allocation30_spill] sm:$0xff] %v6778_v31  ;;  %v6781_v39 = vpop.permute.xlu0 %1685 }
 0x1d0   : > { %8589 = vst [vmem:[#allocation31_spill] sm:$0xff] %v6781_v39  ;;  %3028 = vrot.lane.b32.xlu1 %v3019_v22, %s6157_s30 }
 0x1d1   : > { %3026 = vrot.lane.b32.xlu0 %v3018_v23, %s6157_s30 }
 0x1d2   : > { %v6785_v44 = vpop.permute.xlu1 %1566 }
 0x1d3   : > { %8590 = vst [vmem:[#allocation32_spill] sm:$0xff] %v6785_v44  ;;  %v6787_v0 = vpop.permute.xlu0 %1564 }
 0x1d4   : > { %8591 = vst [vmem:[#allocation33_spill] sm:$0xff] %v6787_v0  ;;  %3328 = vrot.lane.b32.xlu1 %v3319_v51, %s6159_s7 }
 0x1d5   : > { %3326 = vrot.lane.b32.xlu0 %v3318_v57, %s6159_s7 }
 0x1d6   : > { %v6791_v2 = vpop.permute.xlu1 %2013 }
 0x1d7   : > { %8592 = vst [vmem:[#allocation34_spill] sm:$0xff] %v6791_v2  ;;  %v6793_v7 = vpop.permute.xlu0 %2011 }
 0x1d8   : > { %8593 = vst [vmem:[#allocation35_spill] sm:$0xff] %v6793_v7  ;;  %3208 = vrot.lane.b32.xlu1 %v3319_v51, %s6158_s23 }
 0x1d9   : > { %3206 = vrot.lane.b32.xlu0 %v3318_v57, %s6158_s23  ;;  %v6811_v57 = vmul.f32 0.75, %v3017_v9 }
 0x1da   : > { %v6797_v24 = vpop.permute.xlu1 %1860 }
 0x1db   : > { %8594 = vst [vmem:[#allocation36_spill] sm:$0xff] %v6797_v24  ;;  %v6799_v16 = vpop.permute.xlu0 %1858 }
 0x1dc   : > { %8595 = vst [vmem:[#allocation37_spill] sm:$0xff] %v6799_v16  ;;  %3476 = vrot.lane.b32.xlu1 %v3019_v22, %s6160_s16  ;;  %v6817_v22 = vld [vmem:[#allocation2 + $0xe8] sm:$0xff] }
 0x1dd   : > { %3474 = vrot.lane.b32.xlu0 %v3018_v23, %s6160_s16  ;;  %v6821_v23 = vld [vmem:[#allocation2 + $0xe0] sm:$0xff] }
 0x1de   : > { %v6803_v62 = vpop.permute.xlu1 %2194  ;;  %v3346_v19 = vmul.f32 0.25, %v6821_v23 }
 0x1df   : > { %8596 = vst [vmem:[#allocation38_spill] sm:$0xff] %v6803_v62  ;;  %v6805_v53 = vpop.permute.xlu0 %2192 }
 0x1e0   : > { %8597 = vst [vmem:[#allocation39_spill] sm:$0xff] %v6805_v53  ;;  %3032 = vrot.lane.b32.xlu1 %v3021_v21, %s6157_s30  ;;  %v1878_v53 = vmul.f32 0.375, %v6576_v33 }
 0x1e1   : > { %3030 = vrot.lane.b32.xlu0 %v3020_v63, %s6157_s30  ;;  %v3347_v63 = vmul.f32 0.25, %v6817_v22 }
 0x1e2   : > { %v6809_v51 = vpop.permute.xlu1 %1711 }
 0x1e3   : > { %8598 = vst [vmem:[#allocation40_spill] sm:$0xff] %v6809_v51  ;;  %v6813_v40 = vpop.permute.xlu0 %1709  ;;  %v7047_v51 = vld [vmem:[#allocation3 + $0x70] sm:$0xff] }
 0x1e4   : > { %8599 = vst [vmem:[#allocation41_spill] sm:$0xff] %v6813_v40  ;;  %3332 = vrot.lane.b32.xlu1 %v6811_v57, %s6159_s7 }
 0x1e5   : > { %3330 = vrot.lane.b32.xlu0 %v6815_v10, %s6159_s7 }
 0x1e6   : > { %v6825_v21 = vpop.permute.xlu1 %2017 }
 0x1e7   : > { %8600 = vst [vmem:[#allocation42_spill] sm:$0xff] %v6825_v21  ;;  %v6828_v9 = vpop.permute.xlu0 %2015 }
 0x1e8   : > { %8601 = vst [vmem:[#allocation43_spill] sm:$0xff] %v6828_v9  ;;  %3356 = vrot.lane.b32.xlu1 %v3347_v63, %s6159_s7  ;;  %v1581_v9 = vmul.f32 0.875, %v6571_v27  ;;  %v1580_v63 = vmul.f32 0.875, %v6576_v33 }
 0x1e9   : > { %3354 = vrot.lane.b32.xlu0 %v3346_v19, %s6159_s7 }
 0x1ea   : > { %v6833_v29 = vpop.permute.xlu1 %1864 }
 0x1eb   : > { %8602 = vst [vmem:[#allocation44_spill] sm:$0xff] %v6833_v29  ;;  %v6835_v39 = vpop.permute.xlu0 %1862 }
 0x1ec   : > { %8603 = vst [vmem:[#allocation45_spill] sm:$0xff] %v6835_v39  ;;  %1469 = vrot.lane.b32.xlu1 %v6571_v27, %s6155_s6  ;;  %v1879_v39 = vmul.f32 0.375, %v6571_v27 }
 0x1ed   : > { %1467 = vrot.lane.b32.xlu0 %v6576_v33, %s6155_s6 }
 0x1ee   : > { %v6841_v21 = vpop.permute.xlu1 %2198 }
 0x1ef   : > { %8604 = vst [vmem:[#allocation46_spill] sm:$0xff] %v6841_v21  ;;  %v6844_v31 = vpop.permute.xlu0 %2196 }
 0x1f0   : > { %8605 = vst [vmem:[#allocation47_spill] sm:$0xff] %v6844_v31  ;;  %1590 = vrot.lane.b32.xlu1 %v1581_v9, %s6156_s26  ;;  %v1730_v31 = vmul.f32 0.625, %v6571_v27  ;;  %v1729_v9 = vmul.f32 0.625, %v6576_v33 }
 0x1f1   : > { %1588 = vrot.lane.b32.xlu0 %v1580_v63, %s6156_s26 }
 0x1f2   : > { %v6849_v19 = vpop.permute.xlu1 %1715 }
 0x1f3   : > { %8606 = vst [vmem:[#allocation48_spill] sm:$0xff] %v6849_v19  ;;  %v6852_v29 = vpop.permute.xlu0 %1713 }
 0x1f4   : > { %8607 = vst [vmem:[#allocation49_spill] sm:$0xff] %v6852_v29  ;;  %1888 = vrot.lane.b32.xlu1 %v1879_v39, %s6158_s23  ;;  %v2060_v29 = vmul.f32 0.125, %v6571_v27  ;;  %v1583_v27 = vmul.f32 0.875, %v6593_v48 }
 0x1f5   : > { %1886 = vrot.lane.b32.xlu0 %v1878_v53, %s6158_s23  ;;  %v2059_v53 = vmul.f32 0.125, %v6576_v33  ;;  %v1582_v33 = vmul.f32 0.875, %v6600_v56 }
 0x1f6   : > { %v6857_v21 = vpop.permute.xlu1 %2041 }
 0x1f7   : > { %8608 = vst [vmem:[#allocation50_spill] sm:$0xff] %v6857_v21  ;;  %v6860_v62 = vpop.permute.xlu0 %2039 }
 0x1f8   : > { %8609 = vst [vmem:[#allocation51_spill] sm:$0xff] %v6860_v62  ;;  %1739 = vrot.lane.b32.xlu1 %v1730_v31, %s6157_s30 }
 0x1f9   : > { %1737 = vrot.lane.b32.xlu0 %v1729_v9, %s6157_s30 }
 0x1fa   : > { %v6865_v63 = vpop.permute.xlu1 %2375 }
 0x1fb   : > { %8610 = vst [vmem:[#allocation52_spill] sm:$0xff] %v6865_v63  ;;  %v6868_v19 = vpop.permute.xlu0 %2373  ;;  %v2682_v63 = vld [vmem:[#allocation3 + $0x20] sm:$0xff] }
 0x1fc   : > { %8611 = vst [vmem:[#allocation53_spill] sm:$0xff] %v6868_v19  ;;  %2069 = vrot.lane.b32.xlu1 %v2060_v29, %s6159_s7  ;;  %v2683_v29 = vld [vmem:[#allocation3 + $0x28] sm:$0xff]  ;;  %v1881_v19 = vmul.f32 0.375, %v6593_v48  ;;  %v2240_v62 = vmul.f32 0.875, %v2682_v63  ;;  %v1757_v7 = vmul.f32 0.375, %v2682_v63 }
 0x1fd   : > { %2067 = vrot.lane.b32.xlu0 %v2059_v53, %s6159_s7  ;;  %v2241_v26 = vmul.f32 0.875, %v2683_v29 }
 0x1fe   : > { %v6873_v39 = vpop.permute.xlu1 %2222 }
 0x1ff   : > { %8612 = vst [vmem:[#allocation54_spill] sm:$0xff] %v6873_v39  ;;  %v6875_v0 = vpop.permute.xlu0 %2220  ;;  %v2687_v39 = vmul.f32 0.125, %v2683_v29 }
 0x200   : > { %8613 = vst [vmem:[#allocation55_spill] sm:$0xff] %v6875_v0  ;;  %1473 = vrot.lane.b32.xlu1 %v6593_v48, %s6155_s6 }
 0x201   : > { %1471 = vrot.lane.b32.xlu0 %v6600_v56, %s6155_s6 }
 0x202   : > { %v6881_v31 = vpop.permute.xlu1 %2045 }
 0x203   : > { %8614 = vst [vmem:[#allocation56_spill] sm:$0xff] %v6881_v31  ;;  %v6884_v9 = vpop.permute.xlu0 %2043  ;;  %v1880_v31 = vmul.f32 0.375, %v6600_v56 }
 0x204   : > { %8615 = vst [vmem:[#allocation57_spill] sm:$0xff] %v6884_v9  ;;  %1594 = vrot.lane.b32.xlu1 %v1583_v27, %s6156_s26  ;;  %v2686_v9 = vmul.f32 0.125, %v2682_v63 }
 0x205   : > { %1592 = vrot.lane.b32.xlu0 %v1582_v33, %s6156_s26 }
 0x206   : > { %v6889_v53 = vpop.permute.xlu1 %2379 }
 0x207   : > { %8616 = vst [vmem:[#allocation58_spill] sm:$0xff] %v6889_v53  ;;  %v6892_v0 = vpop.permute.xlu0 %2377 }
 0x208   : > { %8617 = vst [vmem:[#allocation59_spill] sm:$0xff] %v6892_v0  ;;  %1892 = vrot.lane.b32.xlu1 %v1881_v19, %s6158_s23 }
 0x209   : > { %1890 = vrot.lane.b32.xlu0 %v1880_v31, %s6158_s23  ;;  %v1907_v31 = vmul.f32 0.625, %v2683_v29 }
 0x20a   : > { %v6897_v44 = vpop.permute.xlu1 %2226 }
 0x20b   : > { %8618 = vst [vmem:[#allocation60_spill] sm:$0xff] %v6897_v44  ;;  %v6899_v27 = vpop.permute.xlu0 %2224  ;;  %v1906_v44 = vmul.f32 0.625, %v2682_v63 }
 0x20c   : > { %8619 = vst [vmem:[#allocation61_spill] sm:$0xff] %v6899_v27  ;;  %2696 = vrot.lane.b32.xlu1 %v2687_v39, %s6155_s6 }
 0x20d   : > { %2694 = vrot.lane.b32.xlu0 %v2686_v9, %s6155_s6 }
 0x20e   : > { %v6903_v33 = vpop.permute.xlu1 %2640 }
 0x20f   : > { %v6905_v53 = vpop.permute.xlu0 %2638 }
 0x210   : > { %1618 = vrot.lane.b32.xlu1 %v2687_v39, %s6156_s26 }
 0x211   : > { %1616 = vrot.lane.b32.xlu0 %v2686_v9, %s6156_s26  ;;  %v1758_v9 = vmul.f32 0.375, %v2683_v29  ;;  %v6937_v29 = vld [vmem:[#allocation3 + $0x30] sm:$0xff] }
 0x212   : > { %v6909_v19 = vpop.permute.xlu1 %2820  ;;  %v6947_v63 = vmul.f32 0.125, %v6937_v29 }
 0x213   : > { %v6911_v0 = vpop.permute.xlu0 %2818 }
 0x214   : > { %1916 = vrot.lane.b32.xlu1 %v1907_v31, %s6158_s23 }
 0x215   : > { %1914 = vrot.lane.b32.xlu0 %v1906_v44, %s6158_s23 }
 0x216   : > { %v6915_v27 = vpop.permute.xlu1 %2403 }
 0x217   : > { %8620 = vst [vmem:[#allocation62_spill] sm:$0xff] %v6915_v27  ;;  %v6917_v20 = vpop.permute.xlu0 %2401 }
 0x218   : > { %8621 = vst [vmem:[#allocation63_spill] sm:$0xff] %v6917_v20  ;;  %2250 = vrot.lane.b32.xlu1 %v2241_v26, %s6160_s16  ;;  %v6933_v20 = vld [vmem:[#allocation3 + $0x38] sm:$0xff] }
 0x219   : > { %2248 = vrot.lane.b32.xlu0 %v2240_v62, %s6160_s16 }
 0x21a   : > { %v6921_v39 = vpop.permute.xlu1 %2644 }
 0x21b   : > { %8622 = vst [vmem:[#allocation64_spill] sm:$0xff] %v6921_v39  ;;  %v6923_v21 = vpop.permute.xlu0 %2642 }
 0x21c   : > { %8623 = vst [vmem:[#allocation65_spill] sm:$0xff] %v6923_v21  ;;  %1767 = vrot.lane.b32.xlu1 %v1758_v9, %s6157_s30 }
 0x21d   : > { %1765 = vrot.lane.b32.xlu0 %v1757_v7, %s6157_s30  ;;  %v6943_v7 = vmul.f32 0.125, %v6933_v20 }
 0x21e   : > { %v6927_v2 = vpop.permute.xlu1 %2824 }
 0x21f   : > { %8624 = vst [vmem:[#allocation66_spill] sm:$0xff] %v6927_v2  ;;  %v6929_v27 = vpop.permute.xlu0 %2822 }
 0x220   : > { %8625 = vst [vmem:[#allocation67_spill] sm:$0xff] %v6929_v27  ;;  %2097 = vrot.lane.b32.xlu1 %v2241_v26, %s6159_s7  ;;  %v2867_v27 = vmul.f32 0.875, %v6631_v38 }
 0x221   : > { %2095 = vrot.lane.b32.xlu0 %v2240_v62, %s6159_s7  ;;  %v2862_v62 = vld [vmem:[#allocation3 + $0x40] sm:$0xff] }
 0x222   : > { %v6935_v18 = vpop.permute.xlu1 %2668  ;;  %v3046_v35 = vmul.f32 0.625, %v2862_v62 }
 0x223   : > { %v6939_v21 = vpop.permute.xlu0 %2666 }
 0x224   : > { %2431 = vrot.lane.b32.xlu1 %v1907_v31, %s6161_s17  ;;  %v2866_v31 = vmul.f32 0.875, %v2862_v62 }
 0x225   : > { %2429 = vrot.lane.b32.xlu0 %v1906_v44, %s6161_s17 }
 0x226   : > { %v6949_v26 = vpop.permute.xlu1 %3000 }
 0x227   : > { %8626 = vst [vmem:[#allocation68_spill] sm:$0xff] %v6949_v26  ;;  %v6951_v9 = vpop.permute.xlu0 %2998  ;;  %v7020_v26 = vld [vmem:[#allocation3 + $0x60] sm:$0xff] }
 0x228   : > { %8627 = vst [vmem:[#allocation69_spill] sm:$0xff] %v6951_v9  ;;  %2700 = vrot.lane.b32.xlu1 %v6943_v7, %s6155_s6 }
 0x229   : > { %2698 = vrot.lane.b32.xlu0 %v6947_v63, %s6155_s6 }
 0x22a   : > { %v6958_v2 = vpop.permute.xlu1 %2848 }
 0x22b   : > { %v6960_v44 = vpop.permute.xlu0 %2846 }
 0x22c   : > { %2876 = vrot.lane.b32.xlu1 %v2867_v27, %s6156_s26 }
 0x22d   : > { %2874 = vrot.lane.b32.xlu0 %v2866_v31, %s6156_s26 }
 0x22e   : > { %v6964_v39 = vpop.permute.xlu1 %3180 }
 0x22f   : > { %8628 = vst [vmem:[#allocation70_spill] sm:$0xff] %v6964_v39  ;;  %v6966_v6 = vpop.permute.xlu0 %3178  ;;  %v6980_v39 = vmul.f32 0.375, %v6631_v38 }
 0x230   : > { %8629 = vst [vmem:[#allocation71_spill] sm:$0xff] %v6966_v6  ;;  %2724 = vrot.lane.b32.xlu1 %v2867_v27, %s6155_s6  ;;  %v6984_v27 = vmul.f32 0.375, %v2862_v62 }
 0x231   : > { %2722 = vrot.lane.b32.xlu0 %v2866_v31, %s6155_s6  ;;  %v6990_v31 = vld [vmem:[#allocation3 + $0x58] sm:$0xff] }
 0x232   : > { %v6970_v16 = vpop.permute.xlu1 %2672 }
 0x233   : > { %8630 = vst [vmem:[#allocation72_spill] sm:$0xff] %v6970_v16  ;;  %v6972_v24 = vpop.permute.xlu0 %2670  ;;  %v3374_v16 = vmul.f32 0.125, %v2862_v62  ;;  %v7015_v62 = vld [vmem:[#allocation3 + $0x68] sm:$0xff] }
 0x234   : > { %8631 = vst [vmem:[#allocation73_spill] sm:$0xff] %v6972_v24  ;;  %3056 = vrot.lane.b32.xlu1 %v6634_v45, %s6157_s30 }
 0x235   : > { %3054 = vrot.lane.b32.xlu0 %v3046_v35, %s6157_s30  ;;  %v3375_v35 = vmul.f32 0.125, %v6631_v38 }
 0x236   : > { %v6977_v32 = vpop.permute.xlu1 %3004 }
 0x237   : > { %8632 = vst [vmem:[#allocation74_spill] sm:$0xff] %v6977_v32  ;;  %v6982_v6 = vpop.permute.xlu0 %3002  ;;  %v6995_v32 = vld [vmem:[#allocation3 + $0x50] sm:$0xff] }
 0x238   : > { %8633 = vst [vmem:[#allocation75_spill] sm:$0xff] %v6982_v6  ;;  %3236 = vrot.lane.b32.xlu1 %v6980_v39, %s6158_s23  ;;  %v2869_v6 = vmul.f32 0.875, %v6990_v31  ;;  %v2868_v14 = vmul.f32 0.875, %v6995_v32  ;;  %v3048_v40 = vmul.f32 0.625, %v6995_v32 }
 0x239   : > { %3234 = vrot.lane.b32.xlu0 %v6984_v27, %s6158_s23 }
 0x23a   : > { %v6992_v45 = vpop.permute.xlu1 %2852 }
 0x23b   : > { %8634 = vst [vmem:[#allocation76_spill] sm:$0xff] %v6992_v45  ;;  %v6997_v24 = vpop.permute.xlu0 %2850 }
 0x23c   : > { %8635 = vst [vmem:[#allocation77_spill] sm:$0xff] %v6997_v24  ;;  %3384 = vrot.lane.b32.xlu1 %v3375_v35, %s6159_s7 }
 0x23d   : > { %3382 = vrot.lane.b32.xlu0 %v3374_v16, %s6159_s7 }
 0x23e   : > { %v7003_v5 = vpop.permute.xlu1 %3184 }
 0x23f   : > { %8636 = vst [vmem:[#allocation78_spill] sm:$0xff] %v7003_v5  ;;  %v7005_v9 = vpop.permute.xlu0 %3182  ;;  %v3049_v5 = vmul.f32 0.625, %v6990_v31 }
 0x240   : > { %8637 = vst [vmem:[#allocation79_spill] sm:$0xff] %v7005_v9  ;;  %2880 = vrot.lane.b32.xlu1 %v2869_v6, %s6156_s26 }
 0x241   : > { %2878 = vrot.lane.b32.xlu0 %v2868_v14, %s6156_s26 }
 0x242   : > { %v7009_v38 = vpop.permute.xlu1 %3028 }
 0x243   : > { %8638 = vst [vmem:[#allocation80_spill] sm:$0xff] %v7009_v38  ;;  %v7011_v24 = vpop.permute.xlu0 %3026 }
 0x244   : > { %8639 = vst [vmem:[#allocation81_spill] sm:$0xff] %v7011_v24  ;;  %2728 = vrot.lane.b32.xlu1 %v2869_v6, %s6155_s6  ;;  %v2895_v24 = vmul.f32 0.125, %v7015_v62  ;;  %v2894_v6 = vmul.f32 0.125, %v7020_v26 }
 0x245   : > { %2726 = vrot.lane.b32.xlu0 %v2868_v14, %s6155_s6 }
 0x246   : > { %v7017_v45 = vpop.permute.xlu1 %3328 }
 0x247   : > { %8640 = vst [vmem:[#allocation82_spill] sm:$0xff] %v7017_v45  ;;  %v7022_v9 = vpop.permute.xlu0 %3326 }
 0x248   : > { %8641 = vst [vmem:[#allocation83_spill] sm:$0xff] %v7022_v9  ;;  %3060 = vrot.lane.b32.xlu1 %v3049_v5, %s6157_s30  ;;  %v3075_v5 = vmul.f32 0.375, %v7015_v62 }
 0x249   : > { %3058 = vrot.lane.b32.xlu0 %v3048_v40, %s6157_s30  ;;  %v3074_v40 = vmul.f32 0.375, %v7020_v26 }
 0x24a   : > { %v7029_v14 = vpop.permute.xlu1 %3208 }
 0x24b   : > { %8642 = vst [vmem:[#allocation84_spill] sm:$0xff] %v7029_v14  ;;  %v7031_v45 = vpop.permute.xlu0 %3206  ;;  %v7043_v14 = vld [vmem:[#allocation3 + $0x78] sm:$0xff] }
 0x24c   : > { %8643 = vst [vmem:[#allocation85_spill] sm:$0xff] %v7031_v45  ;;  %2904 = vrot.lane.b32.xlu1 %v2895_v24, %s6156_s26 }
 0x24d   : > { %2902 = vrot.lane.b32.xlu0 %v2894_v6, %s6156_s26  ;;  %v1513_v6 = vld [vmem:[%s6541_s25 + $0x10] sm:$0xff] }
 0x24e   : > { %v7035_v9 = vpop.permute.xlu1 %3476 }
 0x24f   : > { %8644 = vst [vmem:[#allocation86_spill] sm:$0xff] %v7035_v9  ;;  %v7038_v38 = vpop.permute.xlu0 %3474  ;;  %v2897_v9 = vmul.f32 0.125, %v7043_v14 }
 0x250   : > { %8645 = vst [vmem:[#allocation87_spill] sm:$0xff] %v7038_v38  ;;  %3084 = vrot.lane.b32.xlu1 %v3075_v5, %s6157_s30  ;;  %v1395_v38 = vld [vmem:[%s6541_s25] sm:$0xff]  ;;  %v2896_v5 = vmul.f32 0.125, %v7047_v51 }
 0x251   : > { %3082 = vrot.lane.b32.xlu0 %v3074_v40, %s6157_s30  ;;  %v7060_v40 = vmul.f32 %v1513_v6, %v6547_v4  ;;  %v7065_v41 = vmul.f32 %v1395_v38, %v6547_v4  ;;  %v2950_v6 = vmul.f32 0.8125, %v6640_v50 }
 0x252   : > { %v7045_v45 = vpop.permute.xlu1 %3032 }
 0x253   : > { %8646 = vst [vmem:[#allocation88_spill] sm:$0xff] %v7045_v45  ;;  %v7049_v24 = vpop.permute.xlu0 %3030 }
 0x254   : > { %8647 = vst [vmem:[#allocation89_spill] sm:$0xff] %v7049_v24  ;;  %2278 = vrot.lane.b32.xlu1 %v3375_v35, %s6160_s16  ;;  %v1428_v24 = vadd.f32 %v7060_v40, %v6681_v54 }
 0x255   : > { %2276 = vrot.lane.b32.xlu0 %v3374_v16, %s6160_s16  ;;  %v2951_v16 = vmul.f32 0.8125, %v6637_v47 }
 0x256   : > { %v7057_v49 = vpop.permute.xlu1 %3332 }
 0x257   : > { %8648 = vst [vmem:[#allocation90_spill] sm:$0xff] %v7057_v49  ;;  %v7062_v45 = vpop.permute.xlu0 %3330 }
 0x258   : > { %8649 = vst [vmem:[#allocation91_spill] sm:$0xff] %v7062_v45  ;;  %2908 = vrot.lane.b32.xlu1 %v2897_v9, %s6156_s26  ;;  %v1427_v45 = vadd.f32 %v6687_v58, %v7065_v41  ;;  %v1456_v9 = vadd.f32 %v6733_v28, %v1428_v24  ;;  %v1398_v24 = vld [vmem:[%s6541_s25 + $0x30] sm:$0xff] }
 0x259   : > { %2906 = vrot.lane.b32.xlu0 %v2896_v5, %s6156_s26 }
 0x25a   : > { %v7069_v35 = vpop.permute.xlu1 %3356  ;;  %v1455_v38 = vadd.f32 %v6735_v30, %v1427_v45  ;;  %v3255_v30 = vmul.f32 0.625, %v7015_v62 }
 0x25b   : > { %8650 = vst [vmem:[#allocation92_spill] sm:$0xff] %v7069_v35  ;;  %v7074_v49 = vpop.permute.xlu0 %3354 }
 0x25c   : > { %8651 = vst [vmem:[#allocation93_spill] sm:$0xff] %v7074_v49  ;;  %2960 = vrot.lane.b32.xlu1 %v2951_v16, %s6156_s26  ;;  %v1732_v16 = vmul.f32 0.625, %v6593_v48 }
 0x25d   : > { %2958 = vrot.lane.b32.xlu0 %v2950_v6, %s6156_s26  ;;  %v7113_v6 = vmul.f32 %v1398_v24, %v6547_v4 }
 0x25e   : > { %v1470_v5 = vpop.permute.xlu1 %1469 }
 0x25f   : > { %v1480_v35 = vadd.f32 %v1470_v5, %v1456_v9  ;;  %v1468_v8 = vpop.permute.xlu0 %1467  ;;  %v1430_v5 = vadd.f32 %v6715_v17, %v7113_v6 }
 0x260   : > { %v1479_v54 = vadd.f32 %v1468_v8, %v1455_v38  ;;  %3212 = vrot.lane.b32.xlu1 %v6811_v57, %s6158_s23  ;;  %v3254_v8 = vmul.f32 0.625, %v7020_v26  ;;  %v3494_v57 = vmul.f32 0.75, %v6821_v23 }
 0x261   : > { %v1504_v49 = vadd.f32 %v6667_v34, %v1480_v35  ;;  %3210 = vrot.lane.b32.xlu0 %v6815_v10, %s6158_s23 }
 0x262   : > { %v1503_v58 = vadd.f32 %v6669_v36, %v1479_v54  ;;  %v7089_v28 = vpop.permute.xlu1 %1590  ;;  %v3495_v36 = vmul.f32 0.75, %v6817_v22  ;;  %v1731_v22 = vmul.f32 0.625, %v6600_v56 }
 0x263   : > { %1509 = vst.msk [vmem:[#allocation5 + $0x10] sm:$0xff] %vm1507_vm6, %v1504_v49  ;;  %v7093_v45 = vpop.permute.xlu0 %1588  ;;  %v1397_v49 = vld [vmem:[%s6541_s25 + $0x20] sm:$0xff] }
 0x264   : > { %1508 = vst.msk [vmem:[#allocation5] sm:$0xff] %vm1507_vm6, %v1503_v58  ;;  %3264 = vrot.lane.b32.xlu1 %v3255_v30, %s6158_s23  ;;  %v7119_v38 = vmul.f32 %v1397_v49, %v6547_v4  ;;  %v7131_v58 = vld [vmem:[#allocation4 + $0x8] sm:$0xff]  ;;  %v1458_v30 = vadd.f32 %v6765_v12, %v1430_v5 }
 0x265   : > { %3262 = vrot.lane.b32.xlu0 %v3254_v8, %s6158_s23  ;;  %v7136_v8 = vld [vmem:[#allocation4] sm:$0xff] }
 0x266   : > { %v7099_v34 = vpop.permute.xlu1 %1888  ;;  %8652 = vst [vmem:[#allocation94_spill] sm:$0xff] %v7119_v38  ;;  %v1429_v54 = vadd.f32 %v6727_v25, %v7119_v38  ;;  %v2061_v25 = vmul.f32 0.125, %v6600_v56  ;;  %v2392_v56 = vld [vmem:[#allocation2 + $0x98] sm:$0xff] }
 0x267   : > { %v7102_v10 = vpop.permute.xlu0 %1886 }
 0x268   : > { %3504 = vrot.lane.b32.xlu1 %v3495_v36, %s6160_s16  ;;  %v1457_v36 = vadd.f32 %v6767_v15, %v1429_v54  ;;  %v2116_v15 = vmul.f32 0.8125, %v7131_v58 }
 0x269   : > { %3502 = vrot.lane.b32.xlu0 %v3494_v57, %s6160_s16  ;;  %v6058_v57 = vld [vmem:[#allocation3 + $0x18] sm:$0xff] }
 0x26a   : > { %v7109_v35 = vpop.permute.xlu1 %1739  ;;  %v2062_v24 = vmul.f32 0.125, %v6058_v57 }
 0x26b   : > { %v7115_v9 = vpop.permute.xlu0 %1737 }
 0x26c   : > { %1743 = vrot.lane.b32.xlu1 %v1732_v16, %s6157_s30 }
 0x26d   : > { %1741 = vrot.lane.b32.xlu0 %v1731_v22, %s6157_s30 }
 0x26e   : > { %v7123_v23 = vpop.permute.xlu1 %2069 }
 0x26f   : > { %v7127_v48 = vpop.permute.xlu0 %2067 }
 0x270   : > { %1791 = vrot.lane.b32.xlu1 %v7131_v58, %s6157_s30 }
 0x271   : > { %1789 = vrot.lane.b32.xlu0 %v7136_v8, %s6157_s30 }
 0x272   : > { %v1474_v17 = vpop.permute.xlu1 %1473 }
 0x273   : > { %v1482_v49 = vadd.f32 %v1474_v17, %v1458_v30  ;;  %v1472_v16 = vpop.permute.xlu0 %1471  ;;  %v2115_v30 = vmul.f32 0.8125, %v7136_v8 }
 0x274   : > { %v1481_v22 = vadd.f32 %v1472_v16, %v1457_v36  ;;  %2073 = vrot.lane.b32.xlu1 %v2062_v24, %s6159_s7  ;;  %v1544_v24 = vadd.f32 %v6693_v1, %v7065_v41  ;;  %v7178_v1 = vld [vmem:[#allocation4 + $0x18] sm:$0xff] }
 0x275   : > { %v1506_v38 = vadd.f32 %v6709_v11, %v1482_v49  ;;  %2071 = vrot.lane.b32.xlu0 %v2061_v25, %s6159_s7  ;;  %v2391_v11 = vld [vmem:[#allocation2 + $0x90] sm:$0xff] }
 0x276   : > { %v1505_v12 = vadd.f32 %v6723_v13, %v1481_v22  ;;  %v7146_v5 = vpop.permute.xlu1 %1594  ;;  %v2396_v13 = vmul.f32 0.25, %v2392_v56  ;;  %v2395_v57 = vmul.f32 0.25, %v2391_v11  ;;  %v1572_v22 = vadd.f32 %v6753_v60, %v1544_v24  ;;  %v7181_v11 = vld [vmem:[#allocation4 + $0x10] sm:$0xff] }
 0x277   : > { %1511 = vst.msk [vmem:[#allocation5 + $0x30] sm:$0xff] %vm1507_vm6, %v1506_v38  ;;  %v7150_v54 = vpop.permute.xlu0 %1592  ;;  %v1545_v38 = vadd.f32 %v6679_v52, %v7060_v40  ;;  %v2744_v60 = vmul.f32 0.3125, %v7181_v11 }
 0x278   : > { %8653 = vst [vmem:[#allocation95_spill] sm:$0xff] %v7150_v54  ;;  %1510 = vst.msk [vmem:[#allocation5 + $0x20] sm:$0xff] %vm1507_vm6, %v1505_v12  ;;  %2125 = vrot.lane.b32.xlu1 %v2116_v15, %s6159_s7  ;;  %v1600_v52 = vadd.f32 %v7093_v45, %v1572_v22 }
 0x279   : > { %2123 = vrot.lane.b32.xlu0 %v2115_v30, %s6159_s7  ;;  %v1573_v16 = vadd.f32 %v6751_v59, %v1545_v38  ;;  %v2745_v30 = vmul.f32 0.3125, %v7178_v1  ;;  %v3076_v38 = vmul.f32 0.375, %v7047_v51  ;;  %v7207_v51 = vld [vmem:[#allocation2 + $0xf0] sm:$0xff] }
 0x27a   : > { %v7156_v36 = vpop.permute.xlu1 %1892 }
 0x27b   : > { %8654 = vst [vmem:[#allocation96_spill] sm:$0xff] %v7156_v36  ;;  %v7158_v17 = vpop.permute.xlu0 %1890  ;;  %v1601_v12 = vadd.f32 %v7089_v28, %v1573_v16  ;;  %v7204_v16 = vld [vmem:[#allocation2 + $0xf8] sm:$0xff] }
 0x27c   : > { %8655 = vst [vmem:[#allocation97_spill] sm:$0xff] %v7158_v17  ;;  %2407 = vrot.lane.b32.xlu1 %v2396_v13, %s6161_s17  ;;  %v3077_v13 = vmul.f32 0.375, %v7043_v14  ;;  %v3130_v14 = vmul.f32 0.9375, %v6640_v50  ;;  %v7264_v17 = vld [vmem:[#allocation4 + $0x28] sm:$0xff] }
 0x27d   : > { %2405 = vrot.lane.b32.xlu0 %v2395_v57, %s6161_s17  ;;  %v1963_v36 = vmul.f32 0.0625, %v7264_v17 }
 0x27e   : > { %v7166_v49 = vpop.permute.xlu1 %2696 }
 0x27f   : > { %v7169_v25 = vpop.permute.xlu0 %2694 }
 0x280   : > { %2459 = vrot.lane.b32.xlu1 %v6980_v39, %s6161_s17 }
 0x281   : > { %2457 = vrot.lane.b32.xlu0 %v6984_v27, %s6161_s17 }
 0x282   : > { %v1619_v15 = vpop.permute.xlu1 %1618 }
 0x283   : > { %v1629_v59 = vadd.f32 %v1619_v15, %v1601_v12  ;;  %v1617_v56 = vpop.permute.xlu0 %1616  ;;  %v3349_v12 = vmul.f32 0.25, %v7204_v16  ;;  %v3403_v15 = vmul.f32 0.875, %v7015_v62 }
 0x284   : > { %v1628_v39 = vadd.f32 %v1617_v56, %v1600_v52  ;;  %2756 = vrot.lane.b32.xlu1 %v2745_v30, %s6155_s6  ;;  %v2619_v56 = vld [vmem:[%s6541_s25 + $0x18] sm:$0xff] }
 0x285   : > { %v1653_v28 = vadd.f32 %v6673_v42, %v1629_v59  ;;  %2754 = vrot.lane.b32.xlu0 %v2744_v60, %s6155_s6  ;;  %v3402_v59 = vmul.f32 0.875, %v7020_v26 }
 0x286   : > { %v1652_v27 = vadd.f32 %v6675_v46, %v1628_v39  ;;  %v7188_v45 = vpop.permute.xlu1 %1916  ;;  %v3131_v46 = vmul.f32 0.9375, %v6637_v47  ;;  %v3348_v47 = vmul.f32 0.25, %v7207_v51  ;;  %v2618_v39 = vld [vmem:[%s6541_s25 + $0x8] sm:$0xff] }
 0x287   : > { %1658 = vst.msk [vmem:[#allocation5 + $0x10] sm:$0xff] %vm1656_vm7, %v1653_v28  ;;  %v7192_v57 = vpop.permute.xlu0 %1914 }
 0x288   : > { %1657 = vst.msk [vmem:[#allocation5] sm:$0xff] %vm1656_vm7, %v1652_v27  ;;  %3088 = vrot.lane.b32.xlu1 %v3077_v13, %s6157_s30  ;;  %v3579_v27 = vld [vmem:[#allocation2 + $0xe8] sm:$0xff]  ;;  %v3578_v13 = vld [vmem:[#allocation2 + $0xe0] sm:$0xff] }
 0x289   : > { %3086 = vrot.lane.b32.xlu0 %v3076_v38, %s6157_s30  ;;  %v7234_v38 = vmul.f32 %v2619_v56, %v6547_v4  ;;  %v1909_v56 = vmul.f32 0.625, %v6933_v20 }
 0x28a   : > { %v7198_v42 = vpop.permute.xlu1 %2250 }
 0x28b   : > { %8656 = vst [vmem:[#allocation98_spill] sm:$0xff] %v7198_v42  ;;  %v7201_v24 = vpop.permute.xlu0 %2248 }
 0x28c   : > { %8657 = vst [vmem:[#allocation99_spill] sm:$0xff] %v7201_v24  ;;  %3140 = vrot.lane.b32.xlu1 %v3131_v46, %s6157_s30  ;;  %v7238_v46 = vmul.f32 %v2618_v39, %v6547_v4 }
 0x28d   : > { %3138 = vrot.lane.b32.xlu0 %v3130_v14, %s6157_s30 }
 0x28e   : > { %v7210_v22 = vpop.permute.xlu1 %1767 }
 0x28f   : > { %v7213_v52 = vpop.permute.xlu0 %1765 }
 0x290   : > { %3360 = vrot.lane.b32.xlu1 %v3349_v12, %s6159_s7 }
 0x291   : > { %3358 = vrot.lane.b32.xlu0 %v3348_v47, %s6159_s7  ;;  %v2651_v47 = vadd.f32 %v6903_v33, %v7234_v38 }
 0x292   : > { %v7218_v50 = vpop.permute.xlu1 %2097 }
 0x293   : > { %v7221_v30 = vpop.permute.xlu0 %2095  ;;  %v2679_v39 = vadd.f32 %v6935_v18, %v2651_v47 }
 0x294   : > { %3412 = vrot.lane.b32.xlu1 %v3403_v15, %s6159_s7  ;;  %v2650_v15 = vadd.f32 %v6905_v53, %v7238_v46 }
 0x295   : > { %3410 = vrot.lane.b32.xlu0 %v3402_v59, %s6159_s7  ;;  %v2707_v33 = vadd.f32 %v7166_v49, %v2679_v39 }
 0x296   : > { %v7227_v60 = vpop.permute.xlu1 %2431 }
 0x297   : > { %8658 = vst [vmem:[#allocation100_spill] sm:$0xff] %v7227_v60  ;;  %v7230_v28 = vpop.permute.xlu0 %2429 }
 0x298   : > { %8659 = vst [vmem:[#allocation101_spill] sm:$0xff] %v7230_v28  ;;  %3588 = vrot.lane.b32.xlu1 %v3579_v27, %s6161_s17  ;;  %v7267_v28 = vld [vmem:[#allocation4 + $0x20] sm:$0xff] }
 0x299   : > { %3586 = vrot.lane.b32.xlu0 %v3578_v13, %s6161_s17  ;;  %v1908_v13 = vmul.f32 0.625, %v6937_v29  ;;  %v1962_v60 = vmul.f32 0.0625, %v7267_v28 }
 0x29a   : > { %v7240_v14 = vpop.permute.xlu1 %2700 }
 0x29b   : > { %v7242_v12 = vpop.permute.xlu0 %2698 }
 0x29c   : > { %1622 = vrot.lane.b32.xlu1 %v6943_v7, %s6156_s26  ;;  %v2678_v7 = vadd.f32 %v6939_v21, %v2650_v15 }
 0x29d   : > { %1620 = vrot.lane.b32.xlu0 %v6947_v63, %s6156_s26 }
 0x29e   : > { %v7252_v59 = vpop.permute.xlu1 %2876  ;;  %v2706_v53 = vadd.f32 %v7169_v25, %v2678_v7  ;;  %v2242_v7 = vmul.f32 0.875, %v6937_v29 }
 0x29f   : > { %v7256_v27 = vpop.permute.xlu0 %2874 }
 0x2a0   : > { %1920 = vrot.lane.b32.xlu1 %v1909_v56, %s6158_s23  ;;  %v2243_v56 = vmul.f32 0.875, %v6933_v20 }
 0x2a1   : > { %1918 = vrot.lane.b32.xlu0 %v1908_v13, %s6158_s23 }
 0x2a2   : > { %v2725_v63 = vpop.permute.xlu1 %2724 }
 0x2a3   : > { %v2735_v18 = vadd.f32 %v2725_v63, %v2707_v33  ;;  %v2723_v47 = vpop.permute.xlu0 %2722  ;;  %v2924_v63 = vmul.f32 0.1875, %v7181_v11 }
 0x2a4   : > { %v2734_v21 = vadd.f32 %v2723_v47, %v2706_v53  ;;  %1972 = vrot.lane.b32.xlu1 %v1963_v36, %s6158_s23  ;;  %v3229_v47 = vmul.f32 0.375, %v6990_v31 }
 0x2a5   : > { %v2763_v49 = vadd.f32 %v6685_v55, %v2735_v18  ;;  %1970 = vrot.lane.b32.xlu0 %v1962_v60, %s6158_s23  ;;  %v2925_v60 = vmul.f32 0.1875, %v7178_v1 }
 0x2a6   : > { %v2762_v25 = vadd.f32 %v6699_v37, %v2734_v21  ;;  %v7274_v15 = vpop.permute.xlu1 %3056  ;;  %v2297_v37 = vmul.f32 0.6875, %v7131_v58 }
 0x2a7   : > { %v2791_v39 = vadd.f32 %v6758_v3, %v2763_v49  ;;  %v7278_v13 = vpop.permute.xlu0 %3054  ;;  %v2296_v3 = vmul.f32 0.6875, %v7136_v8  ;;  %v3228_v49 = vmul.f32 0.375, %v6995_v32 }
 0x2a8   : > { %v2790_v33 = vadd.f32 %v6761_v43, %v2762_v25  ;;  %2254 = vrot.lane.b32.xlu1 %v2243_v56, %s6160_s16 }
 0x2a9   : > { %2252 = vrot.lane.b32.xlu0 %v2242_v7, %s6160_s16  ;;  %2795 = vst.msk [vmem:[#allocation5 + $0x18] sm:$0xff] %vm1507_vm6, %v2791_v39 }
 0x2aa   : > { %v7285_v55 = vpop.permute.xlu1 %3236  ;;  %2794 = vst.msk [vmem:[#allocation5 + $0x8] sm:$0xff] %vm1507_vm6, %v2790_v33  ;;  %v3465_v33 = vld [vmem:[#allocation2 + $0xd8] sm:$0xff] }
 0x2ab   : > { %v7289_v36 = vpop.permute.xlu0 %3234 }
 0x2ac   : > { %2306 = vrot.lane.b32.xlu1 %v2297_v37, %s6160_s16  ;;  %v3464_v37 = vld [vmem:[#allocation2 + $0xd0] sm:$0xff] }
 0x2ad   : > { %2304 = vrot.lane.b32.xlu0 %v2296_v3, %s6160_s16 }
 0x2ae   : > { %v7294_v43 = vpop.permute.xlu1 %3384 }
 0x2af   : > { %v7297_v53 = vpop.permute.xlu0 %3382 }
 0x2b0   : > { %2936 = vrot.lane.b32.xlu1 %v2925_v60, %s6156_s26  ;;  %v3469_v60 = vmul.f32 0.25, %v3465_v33  ;;  %v2831_v33 = vadd.f32 %v6909_v19, %v7234_v38 }
 0x2b1   : > { %2934 = vrot.lane.b32.xlu0 %v2924_v63, %s6156_s26 }
 0x2b2   : > { %v7302_v18 = vpop.permute.xlu1 %2880 }
 0x2b3   : > { %8660 = vst [vmem:[#allocation102_spill] sm:$0xff] %v7302_v18  ;;  %v7305_v21 = vpop.permute.xlu0 %2878 }
 0x2b4   : > { %8661 = vst [vmem:[#allocation103_spill] sm:$0xff] %v7305_v21  ;;  %3240 = vrot.lane.b32.xlu1 %v3229_v47, %s6158_s23  ;;  %v3468_v47 = vmul.f32 0.25, %v3464_v37 }
 0x2b5   : > { %3238 = vrot.lane.b32.xlu0 %v3228_v49, %s6158_s23 }
 0x2b6   : > { %v7310_v25 = vpop.permute.xlu1 %2728 }
 0x2b7   : > { %v7312_v39 = vpop.permute.xlu0 %2726 }
 0x2b8   : > { %3288 = vrot.lane.b32.xlu1 %v7264_v17, %s6158_s23 }
 0x2b9   : > { %3286 = vrot.lane.b32.xlu0 %v7267_v28, %s6158_s23 }
 0x2ba   : > { %v7318_v3 = vpop.permute.xlu1 %3060 }
 0x2bb   : > { %8662 = vst [vmem:[#allocation104_spill] sm:$0xff] %v7318_v3  ;;  %v7320_v63 = vpop.permute.xlu0 %3058  ;;  %v1760_v3 = vmul.f32 0.375, %v6933_v20 }
 0x2bc   : > { %8663 = vst [vmem:[#allocation105_spill] sm:$0xff] %v7320_v63  ;;  %3480 = vrot.lane.b32.xlu1 %v3469_v60, %s6160_s16  ;;  %v1759_v60 = vmul.f32 0.375, %v6937_v29  ;;  %v2859_v63 = vadd.f32 %v6958_v2, %v2831_v33  ;;  %v2144_v2 = vmul.f32 0.1875, %v7264_v17 }
 0x2bd   : > { %3478 = vrot.lane.b32.xlu0 %v3468_v47, %s6160_s16  ;;  %v2830_v47 = vadd.f32 %v6911_v0, %v7238_v46 }
 0x2be   : > { %v2905_v49 = vpop.permute.xlu1 %2904  ;;  %v2887_v20 = vadd.f32 %v7252_v59, %v2859_v63  ;;  %v6063_v63 = vld [vmem:[#allocation3 + $0x38] sm:$0xff] }
 0x2bf   : > { %v2903_v21 = vpop.permute.xlu0 %2902  ;;  %v2858_v24 = vadd.f32 %v6960_v44, %v2830_v47  ;;  %v2143_v44 = vmul.f32 0.1875, %v7267_v28 }
 0x2c0   : > { %3528 = vrot.lane.b32.xlu1 %v7015_v62, %s6160_s16  ;;  %v2915_v29 = vadd.f32 %v2905_v49, %v2887_v20  ;;  %v6064_v49 = vld [vmem:[#allocation3 + $0x30] sm:$0xff] }
 0x2c1   : > { %3526 = vrot.lane.b32.xlu0 %v7020_v26, %s6160_s16  ;;  %v2886_v54 = vadd.f32 %v7256_v27, %v2858_v24  ;;  %v8664_v27 = vld [vmem:[#allocation19_spill] sm:$0xff] }
 0x2c2   : > { %v7328_v18 = vpop.permute.xlu1 %3084  ;;  %v2943_v24 = vadd.f32 %v6691_v61, %v2915_v29  ;;  %v2478_v61 = vmul.f32 0.5625, %v7131_v58 }
 0x2c3   : > { %v7333_v37 = vpop.permute.xlu0 %3082  ;;  %v2914_v0 = vadd.f32 %v2903_v21, %v2886_v54 }
 0x2c4   : > { %1771 = vrot.lane.b32.xlu1 %v1760_v3, %s6157_s30 }
 0x2c5   : > { %1769 = vrot.lane.b32.xlu0 %v1759_v60, %s6157_s30  ;;  %v2423_v60 = vmul.f32 0.625, %v6064_v49  ;;  %v8669_v49 = vld [vmem:[#allocation27_spill] sm:$0xff] }
 0x2c6   : > { %v7342_v42 = vpop.permute.xlu1 %2278 }
 0x2c7   : > { %v7345_v19 = vpop.permute.xlu0 %2276 }
 0x2c8   : > { %2101 = vrot.lane.b32.xlu1 %v2243_v56, %s6159_s7  ;;  %v2942_v56 = vadd.f32 %v8664_v27, %v2914_v0  ;;  %v2477_v0 = vmul.f32 0.5625, %v7136_v8  ;;  %v3105_v8 = vmul.f32 0.0625, %v7178_v1 }
 0x2c9   : > { %2099 = vrot.lane.b32.xlu0 %v2242_v7, %s6159_s7  ;;  %v2424_v7 = vmul.f32 0.625, %v6063_v63  ;;  %v8667_v63 = vld [vmem:[#allocation26_spill] sm:$0xff] }
 0x2ca   : > { %v7350_v3 = vpop.permute.xlu1 %2908 }
 0x2cb   : > { %v7353_v33 = vpop.permute.xlu0 %2906 }
 0x2cc   : > { %2153 = vrot.lane.b32.xlu1 %v2144_v2, %s6159_s7  ;;  %v7371_v2 = vld [vmem:[#allocation4 + $0x38] sm:$0xff] }
 0x2cd   : > { %2151 = vrot.lane.b32.xlu0 %v2143_v44, %s6159_s7  ;;  %v2773_v44 = vmul.f32 0.6875, %v7371_v2 }
 0x2ce   : > { %v2961_v59 = vpop.permute.xlu1 %2960 }
 0x2cf   : > { %v2971_v54 = vadd.f32 %v2961_v59, %v2943_v24  ;;  %v2959_v21 = vpop.permute.xlu0 %2958  ;;  %v7375_v24 = vld [vmem:[#allocation4 + $0x30] sm:$0xff] }
 0x2d0   : > { %v2970_v47 = vadd.f32 %v2959_v21, %v2942_v56  ;;  %2435 = vrot.lane.b32.xlu1 %v2424_v7, %s6161_s17  ;;  %v2772_v59 = vmul.f32 0.6875, %v7375_v24  ;;  %v1694_v7 = vadd.f32 %v8667_v63, %v7060_v40  ;;  %v3104_v21 = vmul.f32 0.0625, %v7181_v11 }
 0x2d1   : > { %2975 = vst.msk [vmem:[#allocation5 + $0x18] sm:$0xff] %vm1656_vm7, %v2971_v54  ;;  %2433 = vrot.lane.b32.xlu0 %v2423_v60, %s6161_s17  ;;  %v1693_v60 = vadd.f32 %v8669_v49, %v7065_v41 }
 0x2d2   : > { %2974 = vst.msk [vmem:[#allocation5 + $0x8] sm:$0xff] %vm1656_vm7, %v2970_v47  ;;  %v7364_v20 = vpop.permute.xlu1 %3212  ;;  %v8670_v47 = vld [vmem:[#allocation40_spill] sm:$0xff] }
 0x2d3   : > { %8665 = vst [vmem:[#allocation19_spill] sm:$0xff] %v7364_v20  ;;  %v7367_v29 = vpop.permute.xlu0 %3210 }
 0x2d4   : > { %8666 = vst [vmem:[#allocation106_spill] sm:$0xff] %v7367_v29  ;;  %2487 = vrot.lane.b32.xlu1 %v2478_v61, %s6161_s17  ;;  %v1722_v61 = vadd.f32 %v8670_v47, %v1694_v7  ;;  %v3377_v29 = vmul.f32 0.125, %v6990_v31 }
 0x2d5   : > { %2485 = vrot.lane.b32.xlu0 %v2477_v0, %s6161_s17  ;;  %v8671_v0 = vld [vmem:[#allocation41_spill] sm:$0xff] }
 0x2d6   : > { %v7378_v27 = vpop.permute.xlu1 %3264  ;;  %v1750_v63 = vadd.f32 %v7109_v35, %v1722_v61  ;;  %v7442_v61 = vld [vmem:[#allocation3 + $0x58] sm:$0xff] }
 0x2d7   : > { %v7380_v56 = vpop.permute.xlu0 %3262 }
 0x2d8   : > { %2784 = vrot.lane.b32.xlu1 %v2773_v44, %s6155_s6  ;;  %v1721_v44 = vadd.f32 %v8671_v0, %v1693_v60  ;;  %v2271_v0 = vmul.f32 0.125, %v7442_v61 }
 0x2d9   : > { %2782 = vrot.lane.b32.xlu0 %v2772_v59, %s6155_s6 }
 0x2da   : > { %v7384_v58 = vpop.permute.xlu1 %3504  ;;  %v1749_v49 = vadd.f32 %v7115_v9, %v1721_v44  ;;  %v8676_v44 = vld [vmem:[#allocation68_spill] sm:$0xff] }
 0x2db   : > { %v7389_v54 = vpop.permute.xlu0 %3502 }
 0x2dc   : > { %8668 = vst [vmem:[#allocation26_spill] sm:$0xff] %v7389_v54  ;;  %3116 = vrot.lane.b32.xlu1 %v3105_v8, %s6157_s30  ;;  %v3376_v54 = vmul.f32 0.125, %v6995_v32  ;;  %v1778_v8 = vadd.f32 %v7210_v22, %v1750_v63  ;;  %v1777_v7 = vadd.f32 %v7213_v52, %v1749_v49  ;;  %v3011_v63 = vadd.f32 %v8676_v44, %v7234_v38 }
 0x2dd   : > { %3114 = vrot.lane.b32.xlu0 %v3104_v21, %s6157_s30  ;;  %v2325_v44 = vmul.f32 0.3125, %v7264_v17 }
 0x2de   : > { %v7398_v59 = vpop.permute.xlu1 %1743 }
 0x2df   : > { %v7402_v20 = vpop.permute.xlu0 %1741 }
 0x2e0   : > { %3388 = vrot.lane.b32.xlu1 %v3377_v29, %s6159_s7  ;;  %v1937_v29 = vmul.f32 0.9375, %v7178_v1 }
 0x2e1   : > { %3386 = vrot.lane.b32.xlu0 %v3376_v54, %s6159_s7 }
 0x2e2   : > { %v1792_v21 = vpop.permute.xlu1 %1791 }
 0x2e3   : > { %v1802_v60 = vadd.f32 %v1792_v21, %v1778_v8  ;;  %v1790_v31 = vpop.permute.xlu0 %1789  ;;  %v7449_v8 = vld [vmem:[#allocation3 + $0x50] sm:$0xff] }
 0x2e4   : > { %v1801_v47 = vadd.f32 %v1790_v31, %v1777_v7  ;;  %3436 = vrot.lane.b32.xlu1 %v7264_v17, %s6159_s7  ;;  %v2270_v7 = vmul.f32 0.125, %v7449_v8  ;;  %v8677_v21 = vld [vmem:[#allocation69_spill] sm:$0xff]  ;;  %v8678_v31 = vld [vmem:[#allocation80_spill] sm:$0xff]  ;;  %v2953_v17 = vmul.f32 0.8125, %v7371_v2 }
 0x2e5   : > { %1807 = vst.msk [vmem:[#allocation5 + $0x10] sm:$0xff] %vm1805_vm8, %v1802_v60  ;;  %3434 = vrot.lane.b32.xlu0 %v7267_v28, %s6159_s7  ;;  %v3010_v60 = vadd.f32 %v8677_v21, %v7238_v46 }
 0x2e6   : > { %1806 = vst.msk [vmem:[#allocation5] sm:$0xff] %vm1805_vm8, %v1801_v47  ;;  %v7416_v32 = vpop.permute.xlu1 %2073  ;;  %v3039_v47 = vadd.f32 %v8678_v31, %v3011_v63  ;;  %v7476_v31 = vld [vmem:[#allocation3 + $0x78] sm:$0xff] }
 0x2e7   : > { %8672 = vst [vmem:[#allocation27_spill] sm:$0xff] %v7416_v32  ;;  %v7418_v35 = vpop.permute.xlu0 %2071  ;;  %v2324_v32 = vmul.f32 0.3125, %v7267_v28  ;;  %v7479_v28 = vld [vmem:[#allocation3 + $0x70] sm:$0xff] }
 0x2e8   : > { %8673 = vst [vmem:[#allocation40_spill] sm:$0xff] %v7418_v35  ;;  %3612 = vrot.lane.b32.xlu1 %v7015_v62, %s6161_s17  ;;  %v1936_v62 = vmul.f32 0.9375, %v7181_v11 }
 0x2e9   : > { %3610 = vrot.lane.b32.xlu0 %v7020_v26, %s6161_s17 }
 0x2ea   : > { %v7424_v9 = vpop.permute.xlu1 %2125 }
 0x2eb   : > { %v7426_v22 = vpop.permute.xlu0 %2123 }
 0x2ec   : > { %1646 = vrot.lane.b32.xlu1 %v7178_v1, %s6156_s26 }
 0x2ed   : > { %1644 = vrot.lane.b32.xlu0 %v7181_v11, %s6156_s26 }
 0x2ee   : > { %v7432_v52 = vpop.permute.xlu1 %2407 }
 0x2ef   : > { %8674 = vst [vmem:[#allocation41_spill] sm:$0xff] %v7432_v52  ;;  %v7435_v54 = vpop.permute.xlu0 %2405  ;;  %v3067_v52 = vadd.f32 %v7274_v15, %v3039_v47  ;;  %v2952_v15 = vmul.f32 0.8125, %v7375_v24  ;;  %v3257_v47 = vmul.f32 0.625, %v7476_v31 }
 0x2f0   : > { %8675 = vst [vmem:[#allocation107_spill] sm:$0xff] %v7435_v54  ;;  %1948 = vrot.lane.b32.xlu1 %v1937_v29, %s6158_s23  ;;  %v8679_v29 = vld [vmem:[#allocation81_spill] sm:$0xff] }
 0x2f1   : > { %1946 = vrot.lane.b32.xlu0 %v1936_v62, %s6158_s23  ;;  %v3038_v62 = vadd.f32 %v8679_v29, %v3010_v60 }
 0x2f2   : > { %v7440_v26 = vpop.permute.xlu1 %2459 }
 0x2f3   : > { %v7447_v49 = vpop.permute.xlu0 %2457  ;;  %v3066_v21 = vadd.f32 %v7278_v13, %v3038_v62  ;;  %v8682_v13 = vld [vmem:[#allocation17_spill] sm:$0xff] }
 0x2f4   : > { %2282 = vrot.lane.b32.xlu1 %v2271_v0, %s6160_s16  ;;  %v3095_v0 = vadd.f32 %v7328_v18, %v3067_v52 }
 0x2f5   : > { %2280 = vrot.lane.b32.xlu0 %v2270_v7, %s6160_s16  ;;  %v3094_v63 = vadd.f32 %v7333_v37, %v3066_v21  ;;  %v8683_v37 = vld [vmem:[#allocation20_spill] sm:$0xff] }
 0x2f6   : > { %v7458_v54 = vpop.permute.xlu1 %2756  ;;  %v3123_v18 = vadd.f32 %v8682_v13, %v3095_v0  ;;  %v3497_v0 = vmul.f32 0.75, %v7204_v16 }
 0x2f7   : > { %v7462_v35 = vpop.permute.xlu0 %2754  ;;  %v3122_v52 = vadd.f32 %v8683_v37, %v3094_v63  ;;  %v7506_v37 = vld [vmem:[#allocation4 + $0x20] sm:$0xff] }
 0x2f8   : > { %2334 = vrot.lane.b32.xlu1 %v2325_v44, %s6160_s16  ;;  %v3256_v44 = vmul.f32 0.625, %v7479_v28 }
 0x2f9   : > { %2332 = vrot.lane.b32.xlu0 %v2324_v32, %s6160_s16 }
 0x2fa   : > { %v7470_v7 = vpop.permute.xlu1 %3088 }
 0x2fb   : > { %8680 = vst [vmem:[#allocation68_spill] sm:$0xff] %v7470_v7  ;;  %v7473_v60 = vpop.permute.xlu0 %3086 }
 0x2fc   : > { %8681 = vst [vmem:[#allocation69_spill] sm:$0xff] %v7473_v60  ;;  %2964 = vrot.lane.b32.xlu1 %v2953_v17, %s6156_s26 }
 0x2fd   : > { %2962 = vrot.lane.b32.xlu0 %v2952_v15, %s6156_s26  ;;  %v3496_v15 = vmul.f32 0.75, %v7207_v51  ;;  %s6162_s26 = smov 15  }
 0x2fe   : > { %v3141_v32 = vpop.permute.xlu1 %3140 }
 0x2ff   : > { %v3151_v29 = vadd.f32 %v3141_v32, %v3123_v18  ;;  %v3139_v62 = vpop.permute.xlu0 %3138  ;;  %v7502_v32 = vld [vmem:[#allocation4 + $0x28] sm:$0xff] }
 0x300   : > { %v3150_v21 = vadd.f32 %v3139_v62, %v3122_v52  ;;  %3268 = vrot.lane.b32.xlu1 %v3257_v47, %s6158_s23  ;;  %v8687_v47 = vld [vmem:[#allocation24_spill] sm:$0xff] }
 0x301   : > { %3155 = vst.msk [vmem:[#allocation5 + $0x18] sm:$0xff] %vm1805_vm8, %v3151_v29  ;;  %3266 = vrot.lane.b32.xlu0 %v3256_v44, %s6158_s23  ;;  %v1843_v29 = vadd.f32 %v8687_v47, %v7060_v40  ;;  %v8689_v44 = vld [vmem:[#allocation25_spill] sm:$0xff] }
 0x302   : > { %3154 = vst.msk [vmem:[#allocation5 + $0x8] sm:$0xff] %vm1805_vm8, %v3150_v21  ;;  %v7490_v17 = vpop.permute.xlu1 %3360  ;;  %v1842_v21 = vadd.f32 %v8689_v44, %v7065_v41  ;;  %v2117_v44 = vmul.f32 0.8125, %v7181_v11 }
 0x303   : > { %8684 = vst [vmem:[#allocation80_spill] sm:$0xff] %v7490_v17  ;;  %v7493_v63 = vpop.permute.xlu0 %3358 }
 0x304   : > { %8685 = vst [vmem:[#allocation81_spill] sm:$0xff] %v7493_v63  ;;  %3508 = vrot.lane.b32.xlu1 %v3497_v0, %s6160_s16  ;;  %v8690_v0 = vld [vmem:[#allocation36_spill] sm:$0xff]  ;;  %v8691_v63 = vld [vmem:[#allocation37_spill] sm:$0xff] }
 0x305   : > { %3506 = vrot.lane.b32.xlu0 %v3496_v15, %s6160_s16  ;;  %v1871_v15 = vadd.f32 %v8690_v0, %v1843_v29  ;;  %v1870_v17 = vadd.f32 %v8691_v63, %v1842_v21 }
 0x306   : > { %v7498_v13 = vpop.permute.xlu1 %3412 }
 0x307   : > { %v7500_v18 = vpop.permute.xlu0 %3410  ;;  %v1899_v47 = vadd.f32 %v7099_v34, %v1871_v15  ;;  %v1898_v7 = vadd.f32 %v7102_v10, %v1870_v17  ;;  %v2451_v34 = vmul.f32 0.375, %v7449_v8  ;;  %v8692_v10 = vld [vmem:[#allocation18_spill] sm:$0xff]  ;;  %v8693_v17 = vld [vmem:[#allocation21_spill] sm:$0xff] }
 0x308   : > { %3552 = vrot.lane.b32.xlu1 %v7502_v32, %s6160_s16 }
 0x309   : > { %3550 = vrot.lane.b32.xlu0 %v7506_v37, %s6160_s16  ;;  %v1927_v29 = vadd.f32 %v7188_v45, %v1899_v47  ;;  %v1926_v63 = vadd.f32 %v7192_v57, %v1898_v7  ;;  %v2506_v57 = vmul.f32 0.4375, %v7502_v32 }
 0x30a   : > { %v7510_v52 = vpop.permute.xlu1 %3588 }
 0x30b   : > { %8686 = vst [vmem:[#allocation17_spill] sm:$0xff] %v7510_v52  ;;  %v7514_v62 = vpop.permute.xlu0 %3586  ;;  %v2118_v52 = vmul.f32 0.8125, %v7178_v1 }
 0x30c   : > { %8688 = vst [vmem:[#allocation20_spill] sm:$0xff] %v7514_v62  ;;  %1795 = vrot.lane.b32.xlu1 %v7178_v1, %s6157_s30  ;;  %v2452_v1 = vmul.f32 0.375, %v7442_v61  ;;  %v2505_v61 = vmul.f32 0.4375, %v7506_v37 }
 0x30d   : > { %1793 = vrot.lane.b32.xlu0 %v7181_v11, %s6157_s30  ;;  %v1955_v11 = vadd.f32 %v8692_v10, %v1927_v29 }
 0x30e   : > { %v7524_v60 = vpop.permute.xlu1 %1622 }
 0x30f   : > { %v7528_v62 = vpop.permute.xlu0 %1620 }
 0x310   : > { %2129 = vrot.lane.b32.xlu1 %v2118_v52, %s6159_s7  ;;  %v1954_v52 = vadd.f32 %v8693_v17, %v1926_v63  ;;  %v3132_v63 = vmul.f32 0.9375, %v7375_v24  ;;  %v8696_v17 = vld [vmem:[#allocation70_spill] sm:$0xff] }
 0x311   : > { %2127 = vrot.lane.b32.xlu0 %v2117_v44, %s6159_s7  ;;  %v3133_v44 = vmul.f32 0.9375, %v7371_v2 }
 0x312   : > { %v7536_v21 = vpop.permute.xlu1 %1920 }
 0x313   : > { %v7539_v0 = vpop.permute.xlu0 %1918 }
 0x314   : > { %2463 = vrot.lane.b32.xlu1 %v2452_v1, %s6161_s17 }
 0x315   : > { %2461 = vrot.lane.b32.xlu0 %v2451_v34, %s6161_s17  ;;  %v3405_v34 = vmul.f32 0.875, %v7476_v31 }
 0x316   : > { %v1973_v45 = vpop.permute.xlu1 %1972 }
 0x317   : > { %v1983_v7 = vadd.f32 %v1973_v45, %v1955_v11  ;;  %v1971_v15 = vpop.permute.xlu0 %1970  ;;  %v3404_v11 = vmul.f32 0.875, %v7479_v28 }
 0x318   : > { %v1982_v47 = vadd.f32 %v1971_v15, %v1954_v52  ;;  %2515 = vrot.lane.b32.xlu1 %v2506_v57, %s6161_s17  ;;  %v3191_v52 = vadd.f32 %v8696_v17, %v7234_v38 }
 0x319   : > { %1988 = vst.msk [vmem:[#allocation5 + $0x10] sm:$0xff] %vm1986_vm9, %v1983_v7  ;;  %2513 = vrot.lane.b32.xlu0 %v2505_v61, %s6161_s17  ;;  %v8697_v7 = vld [vmem:[#allocation71_spill] sm:$0xff]  ;;  %v8698_v61 = vld [vmem:[#allocation84_spill] sm:$0xff] }
 0x31a   : > { %1987 = vst.msk [vmem:[#allocation5] sm:$0xff] %vm1986_vm9, %v1982_v47  ;;  %v7552_v8 = vpop.permute.xlu1 %2254  ;;  %v3190_v15 = vadd.f32 %v8697_v7, %v7238_v46  ;;  %v3219_v47 = vadd.f32 %v8698_v61, %v3191_v52  ;;  %v1965_v7 = vmul.f32 0.0625, %v7371_v2 }
 0x31b   : > { %8694 = vst [vmem:[#allocation24_spill] sm:$0xff] %v7552_v8  ;;  %v7555_v29 = vpop.permute.xlu0 %2252 }
 0x31c   : > { %8695 = vst [vmem:[#allocation25_spill] sm:$0xff] %v7555_v29  ;;  %3144 = vrot.lane.b32.xlu1 %v3133_v44, %s6157_s30  ;;  %v8699_v44 = vld [vmem:[#allocation85_spill] sm:$0xff] }
 0x31d   : > { %3142 = vrot.lane.b32.xlu0 %v3132_v63, %s6157_s30  ;;  %v3218_v63 = vadd.f32 %v8699_v44, %v3190_v15  ;;  %s6164_s30 = smov 1  }
 0x31e   : > { %v7560_v1 = vpop.permute.xlu1 %2306 }
 0x31f   : > { %v7563_v10 = vpop.permute.xlu0 %2304  ;;  %v3246_v29 = vadd.f32 %v7289_v36, %v3218_v63 }
 0x320   : > { %3416 = vrot.lane.b32.xlu1 %v3405_v34, %s6159_s7 }
 0x321   : > { %3414 = vrot.lane.b32.xlu0 %v3404_v11, %s6159_s7  ;;  %v3247_v11 = vadd.f32 %v7285_v55, %v3219_v47  ;;  %v1964_v55 = vmul.f32 0.0625, %v7375_v24 }
 0x322   : > { %v7568_v45 = vpop.permute.xlu1 %2936 }
 0x323   : > { %v7572_v57 = vpop.permute.xlu0 %2934 }
 0x324   : > { %3592 = vrot.lane.b32.xlu1 %v7204_v16, %s6161_s17  ;;  %v3275_v16 = vadd.f32 %v7378_v27, %v3247_v11  ;;  %v6069_v27 = vld [vmem:[#allocation4 + $0x18] sm:$0xff] }
 0x325   : > { %3590 = vrot.lane.b32.xlu0 %v7207_v51, %s6161_s17  ;;  %v3274_v51 = vadd.f32 %v7380_v56, %v3246_v29  ;;  %v2299_v56 = vmul.f32 0.6875, %v6069_v27  ;;  %v8702_v11 = vld [vmem:[#allocation34_spill] sm:$0xff] }
 0x326   : > { %v7582_v34 = vpop.permute.xlu1 %3240 }
 0x327   : > { %v7585_v17 = vpop.permute.xlu0 %3238 }
 0x328   : > { %3636 = vrot.lane.b32.xlu1 %v7502_v32, %s6161_s17 }
 0x329   : > { %3634 = vrot.lane.b32.xlu0 %v7506_v37, %s6161_s17  ;;  %v6070_v37 = vld [vmem:[#allocation4 + $0x10] sm:$0xff] }
 0x32a   : > { %v3289_v52 = vpop.permute.xlu1 %3288  ;;  %v2298_v29 = vmul.f32 0.6875, %v6070_v37 }
 0x32b   : > { %v3299_v15 = vadd.f32 %v3289_v52, %v3275_v16  ;;  %v3287_v61 = vpop.permute.xlu0 %3286  ;;  %v2024_v16 = vadd.f32 %v8702_v11, %v7060_v40  ;;  %v2621_v11 = vld [vmem:[%s6541_s25 + $0x38] sm:$0xff] }
 0x32c   : > { %v3298_v47 = vadd.f32 %v3287_v61, %v3274_v51  ;;  %1976 = vrot.lane.b32.xlu1 %v1965_v7, %s6158_s23  ;;  %v8703_v51 = vld [vmem:[#allocation35_spill] sm:$0xff] }
 0x32d   : > { %3303 = vst.msk [vmem:[#allocation5 + $0x18] sm:$0xff] %vm1986_vm9, %v3299_v15  ;;  %1974 = vrot.lane.b32.xlu0 %v1964_v55, %s6158_s23  ;;  %v2023_v52 = vadd.f32 %v8703_v51, %v7065_v41  ;;  %v8704_v15 = vld [vmem:[#allocation50_spill] sm:$0xff] }
 0x32e   : > { %3302 = vst.msk [vmem:[#allocation5 + $0x8] sm:$0xff] %vm1986_vm9, %v3298_v47  ;;  %v7600_v36 = vpop.permute.xlu1 %3480  ;;  %v2052_v61 = vadd.f32 %v8704_v15, %v2024_v16  ;;  %v8705_v47 = vld [vmem:[#allocation51_spill] sm:$0xff]  ;;  %v2620_v16 = vld [vmem:[%s6541_s25 + $0x28] sm:$0xff]  ;;  %s6166_s25 = smov 113  }
 0x32f   : > { %8700 = vst [vmem:[#allocation36_spill] sm:$0xff] %v7600_v36  ;;  %v7602_v32 = vpop.permute.xlu0 %3478  ;;  %v2146_v36 = vmul.f32 0.1875, %v7371_v2 }
 0x330   : > { %8701 = vst [vmem:[#allocation37_spill] sm:$0xff] %v7602_v32  ;;  %2310 = vrot.lane.b32.xlu1 %v2299_v56, %s6160_s16  ;;  %v2051_v56 = vadd.f32 %v8705_v47, %v2023_v52  ;;  %v2145_v52 = vmul.f32 0.1875, %v7375_v24 }
 0x331   : > { %2308 = vrot.lane.b32.xlu0 %v2298_v29, %s6160_s16  ;;  %v2080_v29 = vadd.f32 %v7123_v23, %v2052_v61  ;;  %v7642_v23 = vmul.f32 %v2621_v11, %v6547_v4  ;;  %v7647_v61 = vmul.f32 %v2620_v16, %v6547_v4  ;;  %v8709_v4 = vld [vmem:[#allocation65_spill] sm:$0xff] }
 0x332   : > { %v7606_v44 = vpop.permute.xlu1 %3528  ;;  %v2079_v32 = vadd.f32 %v7127_v48, %v2051_v56 }
 0x333   : > { %v7608_v63 = vpop.permute.xlu0 %3526  ;;  %v2108_v15 = vadd.f32 %v7218_v50, %v2080_v29  ;;  %v2480_v29 = vmul.f32 0.5625, %v6069_v27  ;;  %v8710_v27 = vld [vmem:[#allocation72_spill] sm:$0xff] }
 0x334   : > { %3292 = vrot.lane.b32.xlu1 %v7371_v2, %s6158_s23  ;;  %v2107_v47 = vadd.f32 %v7221_v30, %v2079_v32  ;;  %v2479_v30 = vmul.f32 0.5625, %v6070_v37 }
 0x335   : > { %3290 = vrot.lane.b32.xlu0 %v7375_v24, %s6158_s23  ;;  %v2136_v48 = vadd.f32 %v7424_v9, %v2108_v15  ;;  %v2652_v9 = vadd.f32 %v8709_v4, %v7647_v61  ;;  %s6165_s23 = smov 127  }
 0x336   : > { %v7618_v7 = vpop.permute.xlu1 %1771  ;;  %v2135_v50 = vadd.f32 %v7426_v22, %v2107_v47 }
 0x337   : > { %v7621_v55 = vpop.permute.xlu0 %1769 }
 0x338   : > { %3532 = vrot.lane.b32.xlu1 %v7476_v31, %s6160_s16 }
 0x339   : > { %3530 = vrot.lane.b32.xlu0 %v7479_v28, %s6160_s16 }
 0x33a   : > { %v7631_v51 = vpop.permute.xlu1 %2101 }
 0x33b   : > { %8706 = vst [vmem:[#allocation18_spill] sm:$0xff] %v7631_v51  ;;  %v7636_v8 = vpop.permute.xlu0 %2099 }
 0x33c   : > { %8707 = vst [vmem:[#allocation21_spill] sm:$0xff] %v7636_v8  ;;  %2157 = vrot.lane.b32.xlu1 %v2146_v36, %s6159_s7  ;;  %v8708_v36 = vld [vmem:[#allocation64_spill] sm:$0xff] }
 0x33d   : > { %2155 = vrot.lane.b32.xlu0 %v2145_v52, %s6159_s7  ;;  %v2653_v11 = vadd.f32 %v8708_v36, %v7642_v23 }
 0x33e   : > { %v2154_v56 = vpop.permute.xlu1 %2153 }
 0x33f   : > { %v2164_v8 = vadd.f32 %v2154_v56, %v2136_v48  ;;  %v2152_v51 = vpop.permute.xlu0 %2151  ;;  %v2681_v16 = vadd.f32 %v8710_v27, %v2653_v11 }
 0x340   : > { %v2163_v32 = vadd.f32 %v2152_v51, %v2135_v50  ;;  %2491 = vrot.lane.b32.xlu1 %v2480_v29, %s6161_s17  ;;  %v8711_v51 = vld [vmem:[#allocation73_spill] sm:$0xff] }
 0x341   : > { %2169 = vst.msk [vmem:[#allocation5 + $0x10] sm:$0xff] %vm2167_vm10, %v2164_v8  ;;  %2489 = vrot.lane.b32.xlu0 %v2479_v30, %s6161_s17  ;;  %v2680_v15 = vadd.f32 %v8711_v51, %v2652_v9  ;;  %v2709_v8 = vadd.f32 %v7240_v14, %v2681_v16  ;;  %v8714_v9 = vld [vmem:[#allocation92_spill] sm:$0xff]  ;;  %v8715_v16 = vld [vmem:[#allocation93_spill] sm:$0xff] }
 0x342   : > { %2168 = vst.msk [vmem:[#allocation5] sm:$0xff] %vm2167_vm10, %v2163_v32  ;;  %v7658_v22 = vpop.permute.xlu1 %2435 }
 0x343   : > { %v7661_v37 = vpop.permute.xlu0 %2433  ;;  %v2708_v52 = vadd.f32 %v7242_v12, %v2680_v15  ;;  %v2737_v48 = vadd.f32 %v7310_v25, %v2709_v8  ;;  %v2327_v12 = vmul.f32 0.3125, %v7371_v2  ;;  %v2326_v25 = vmul.f32 0.3125, %v7375_v24 }
 0x344   : > { %3440 = vrot.lane.b32.xlu1 %v7371_v2, %s6159_s7  ;;  %v2508_v8 = vmul.f32 0.4375, %v7371_v2 }
 0x345   : > { %3438 = vrot.lane.b32.xlu0 %v7375_v24, %s6159_s7  ;;  %v2736_v56 = vadd.f32 %v7312_v39, %v2708_v52  ;;  %v2765_v29 = vadd.f32 %v7458_v54, %v2737_v48  ;;  %s6167_s7 = smov 17  }
 0x346   : > { %v7670_v47 = vpop.permute.xlu1 %2487 }
 0x347   : > { %v7673_v50 = vpop.permute.xlu0 %2485  ;;  %v2764_v14 = vadd.f32 %v7462_v35, %v2736_v56  ;;  %v8712_v35 = vld [vmem:[#allocation82_spill] sm:$0xff]  ;;  %v2507_v56 = vmul.f32 0.4375, %v7375_v24 }
 0x348   : > { %3616 = vrot.lane.b32.xlu1 %v7476_v31, %s6161_s17  ;;  %v3339_v54 = vadd.f32 %v8712_v35, %v7234_v38  ;;  %v8718_v35 = vld [vmem:[#allocation23_spill] sm:$0xff] }
 0x349   : > { %3614 = vrot.lane.b32.xlu0 %v7479_v28, %s6161_s17  ;;  %v8713_v28 = vld [vmem:[#allocation83_spill] sm:$0xff] }
 0x34a   : > { %v2785_v30 = vpop.permute.xlu1 %2784  ;;  %v3338_v4 = vadd.f32 %v8713_v28, %v7238_v46  ;;  %v3367_v27 = vadd.f32 %v8714_v9, %v3339_v54 }
 0x34b   : > { %v2793_v32 = vadd.f32 %v2785_v30, %v2765_v29  ;;  %v2783_v36 = vpop.permute.xlu0 %2782 }
 0x34c   : > { %v2792_v11 = vadd.f32 %v2783_v36, %v2764_v14  ;;  %2338 = vrot.lane.b32.xlu1 %v2327_v12, %s6160_s16  ;;  %v3366_v51 = vadd.f32 %v8715_v16, %v3338_v4  ;;  %v3395_v52 = vadd.f32 %v7294_v43, %v3367_v27 }
 0x34d   : > { %2797 = vst.msk [vmem:[#allocation5 + $0x38] sm:$0xff] %vm1507_vm6, %v2793_v32  ;;  %2336 = vrot.lane.b32.xlu0 %v2326_v25, %s6160_s16  ;;  %v8716_v32 = vld [vmem:[#allocation22_spill] sm:$0xff] }
 0x34e   : > { %2796 = vst.msk [vmem:[#allocation5 + $0x28] sm:$0xff] %vm1507_vm6, %v2792_v11  ;;  %v7688_v39 = vpop.permute.xlu1 %3116  ;;  %v3394_v29 = vadd.f32 %v7297_v53, %v3366_v51  ;;  %v3423_v14 = vadd.f32 %v7498_v13, %v3395_v52  ;;  %v1547_v36 = vadd.f32 %v8716_v32, %v7113_v6  ;;  %v8717_v11 = vld [vmem:[#allocation94_spill] sm:$0xff]  ;;  %v8719_v53 = vld [vmem:[#allocation32_spill] sm:$0xff]  ;;  %v8720_v13 = vld [vmem:[#allocation33_spill] sm:$0xff]  ;;  %vm5312_vm6 = vcmask 523264  }
 0x34f   : > { %v7692_v31 = vpop.permute.xlu0 %3114  ;;  %v1546_v54 = vadd.f32 %v8718_v35, %v8717_v11  ;;  %v8721_v51 = vld [vmem:[#allocation95_spill] sm:$0xff] }
 0x350   : > { %3556 = vrot.lane.b32.xlu1 %v7371_v2, %s6160_s16  ;;  %v3422_v30 = vadd.f32 %v7500_v18, %v3394_v29  ;;  %v1575_v4 = vadd.f32 %v8719_v53, %v1547_v36  ;;  %v8723_v32 = vld [vmem:[#allocation39_spill] sm:$0xff]  ;;  %v8727_v53 = vld [vmem:[#allocation98_spill] sm:$0xff] }
 0x351   : > { %3554 = vrot.lane.b32.xlu0 %v7375_v24, %s6160_s16  ;;  %v1574_v18 = vadd.f32 %v8720_v13, %v1546_v54  ;;  %v8726_v54 = vld [vmem:[#allocation66_spill] sm:$0xff]  ;;  %v8728_v13 = vld [vmem:[#allocation67_spill] sm:$0xff] }
 0x352   : > { %v7702_v15 = vpop.permute.xlu1 %3388  ;;  %v1603_v27 = vadd.f32 %v7146_v5, %v1575_v4  ;;  %v2204_v5 = vadd.f32 %v8723_v32, %v7065_v41 }
 0x353   : > { %v7706_v48 = vpop.permute.xlu0 %3386 }
 0x354   : > { %2519 = vrot.lane.b32.xlu1 %v2508_v8, %s6161_s17  ;;  %v1602_v8 = vadd.f32 %v8721_v51, %v1574_v18  ;;  %v2832_v18 = vadd.f32 %v8728_v13, %v7647_v61 }
 0x355   : > { %2517 = vrot.lane.b32.xlu0 %v2507_v56, %s6161_s17 }
 0x356   : > { %v3437_v12 = vpop.permute.xlu1 %3436  ;;  %v1630_v52 = vadd.f32 %v7528_v62, %v1602_v8  ;;  %v8725_v62 = vld [vmem:[#allocation55_spill] sm:$0xff] }
 0x357   : > { %v3447_v25 = vadd.f32 %v3437_v12, %v3423_v14  ;;  %v3435_v43 = vpop.permute.xlu0 %3434  ;;  %v2232_v35 = vadd.f32 %v8725_v62, %v2204_v5 }
 0x358   : > { %v3446_v28 = vadd.f32 %v3435_v43, %v3422_v30  ;;  %3640 = vrot.lane.b32.xlu1 %v7371_v2, %s6161_s17  ;;  %v1631_v2 = vadd.f32 %v7524_v60, %v1603_v27  ;;  %v8722_v30 = vld [vmem:[#allocation38_spill] sm:$0xff]  ;;  %v8729_v27 = vld [vmem:[#allocation99_spill] sm:$0xff] }
 0x359   : > { %3451 = vst.msk [vmem:[#allocation5 + $0x18] sm:$0xff] %vm2167_vm10, %v3447_v25  ;;  %3638 = vrot.lane.b32.xlu0 %v7375_v24, %s6161_s17  ;;  %v2205_v12 = vadd.f32 %v8722_v30, %v7060_v40  ;;  %v8724_v25 = vld [vmem:[#allocation54_spill] sm:$0xff]  ;;  %v2260_v51 = vadd.f32 %v8729_v27, %v2232_v35 }
 0x35a   : > { %3450 = vst.msk [vmem:[#allocation5 + $0x8] sm:$0xff] %vm2167_vm10, %v3446_v28  ;;  %v7726_v9 = vpop.permute.xlu1 %3612  ;;  %v2833_v28 = vadd.f32 %v8726_v54, %v7642_v23 }
 0x35b   : > { %v7729_v16 = vpop.permute.xlu0 %3610  ;;  %v2233_v60 = vadd.f32 %v8724_v25, %v2205_v12  ;;  %v2288_v30 = vadd.f32 %v7345_v19, %v2260_v51  ;;  %v8732_v12 = vld [vmem:[#allocation102_spill] sm:$0xff]  ;;  %v8733_v25 = vld [vmem:[#allocation103_spill] sm:$0xff] }
 0x35d   : > { %v2261_v4 = vadd.f32 %v8727_v53, %v2233_v60  ;;  %v2316_v62 = vadd.f32 %v7563_v10, %v2288_v30 }
 0x35e   : > { %v1647_v56 = vpop.permute.xlu1 %1646 }
 0x35f   : > { %v1655_v29 = vadd.f32 %v1647_v56, %v1631_v2  ;;  %v1645_v14 = vpop.permute.xlu0 %1644  ;;  %v8730_v2 = vld [vmem:[#allocation76_spill] sm:$0xff]  ;;  %v2289_v56 = vadd.f32 %v7342_v42, %v2261_v4 }
 0x360   : > { %v1654_v24 = vadd.f32 %v1645_v14, %v1630_v52  ;;  %v2861_v52 = vadd.f32 %v8730_v2, %v2833_v28  ;;  %v8731_v14 = vld [vmem:[#allocation77_spill] sm:$0xff]  ;;  %v8735_v2 = vld [vmem:[#allocation87_spill] sm:$0xff] }
 0x361   : > { %1660 = vst.msk [vmem:[#allocation5 + $0x30] sm:$0xff] %vm1656_vm7, %v1655_v29  ;;  %v2317_v5 = vadd.f32 %v7560_v1, %v2289_v56  ;;  %v8736_v56 = vld [vmem:[#allocation30_spill] sm:$0xff] }
 0x362   : > { %1659 = vst.msk [vmem:[#allocation5 + $0x20] sm:$0xff] %vm1656_vm7, %v1654_v24  ;;  %v7740_v36 = vpop.permute.xlu1 %1948  ;;  %v2860_v24 = vadd.f32 %v8731_v14, %v2832_v18  ;;  %v2889_v32 = vadd.f32 %v8732_v12, %v2861_v52  ;;  %v1696_v14 = vadd.f32 %v8736_v56, %v7113_v6  ;;  %v8737_v12 = vld [vmem:[#allocation31_spill] sm:$0xff] }
 0x363   : > { %v7743_v43 = vpop.permute.xlu0 %1946 }
 0x364   : > { %v2888_v60 = vadd.f32 %v8733_v25, %v2860_v24  ;;  %v2917_v54 = vadd.f32 %v7350_v3, %v2889_v32  ;;  %v1695_v32 = vadd.f32 %v8737_v12, %v8717_v11  ;;  %v8746_v12 = vld [vmem:[#allocation100_spill] sm:$0xff] }
 0x366   : > { %v7752_v8 = vpop.permute.xlu1 %2282  ;;  %v2916_v53 = vadd.f32 %v7353_v33, %v2888_v60  ;;  %v2945_v13 = vadd.f32 %v7568_v45, %v2917_v54  ;;  %v8734_v45 = vld [vmem:[#allocation86_spill] sm:$0xff]  ;;  %v8739_v60 = vld [vmem:[#allocation48_spill] sm:$0xff] }
 0x367   : > { %v7756_v29 = vpop.permute.xlu0 %2280  ;;  %v3487_v51 = vadd.f32 %v8734_v45, %v7234_v38 }
 0x368   : > { %v2944_v19 = vadd.f32 %v7572_v57, %v2916_v53  ;;  %v3486_v57 = vadd.f32 %v8735_v2, %v7238_v46 }
 0x369   : > { %v3515_v24 = vadd.f32 %v7384_v58, %v3487_v51  ;;  %v8743_v51 = vld [vmem:[#allocation62_spill] sm:$0xff] }
 0x36a   : > { %v2335_v35 = vpop.permute.xlu1 %2334 }
 0x36b   : > { %v2345_v28 = vadd.f32 %v2335_v35, %v2317_v5  ;;  %v2333_v42 = vpop.permute.xlu0 %2332  ;;  %v8738_v5 = vld [vmem:[#allocation26_spill] sm:$0xff]  ;;  %v3539_v38 = vadd.f32 %v7606_v44, %v3515_v24  ;;  %v8740_v35 = vld [vmem:[#allocation49_spill] sm:$0xff] }
 0x36c   : > { %v2344_v4 = vadd.f32 %v2333_v42, %v2316_v62  ;;  %v3514_v25 = vadd.f32 %v8738_v5, %v3486_v57  ;;  %v1724_v62 = vadd.f32 %v8739_v60, %v1696_v14  ;;  %v1723_v46 = vadd.f32 %v8740_v35, %v1695_v32  ;;  %v8744_v57 = vld [vmem:[#allocation63_spill] sm:$0xff]  ;;  %v8745_v14 = vld [vmem:[#allocation74_spill] sm:$0xff] }
 0x36d   : > { %2350 = vst.msk [vmem:[#allocation5 + $0x10] sm:$0xff] %vm2348_vm11, %v2345_v28  ;;  %v3013_v24 = vadd.f32 %v8745_v14, %v7642_v23  ;;  %v8747_v32 = vld [vmem:[#allocation75_spill] sm:$0xff] }
 0x36e   : > { %2349 = vst.msk [vmem:[#allocation5] sm:$0xff] %vm2348_vm11, %v2344_v4  ;;  %v2965_v1 = vpop.permute.xlu1 %2964  ;;  %v3538_v54 = vadd.f32 %v7608_v63, %v3514_v25  ;;  %v1752_v42 = vadd.f32 %v7398_v59, %v1724_v62  ;;  %v1751_v4 = vadd.f32 %v7402_v20, %v1723_v46  ;;  %v8742_v20 = vld [vmem:[#allocation53_spill] sm:$0xff]  ;;  %v3012_v5 = vadd.f32 %v8747_v32, %v7647_v61  ;;  %v8749_v62 = vld [vmem:[#allocation88_spill] sm:$0xff] }
 0x36f   : > { %v2973_v18 = vadd.f32 %v2965_v1, %v2945_v13  ;;  %v2963_v10 = vpop.permute.xlu0 %2962  ;;  %v2385_v45 = vadd.f32 %v8742_v20, %v7065_v41  ;;  %v8748_v25 = vld [vmem:[#allocation101_spill] sm:$0xff] }
 0x370   : > { %v2972_v27 = vadd.f32 %v2963_v10, %v2944_v19  ;;  %v1780_v19 = vadd.f32 %v7618_v7, %v1752_v42  ;;  %v1779_v1 = vadd.f32 %v7621_v55, %v1751_v4 }
 0x371   : > { %2977 = vst.msk [vmem:[#allocation5 + $0x38] sm:$0xff] %vm1656_vm7, %v2973_v18  ;;  %v2413_v56 = vadd.f32 %v8744_v57, %v2385_v45 }
 0x372   : > { %2976 = vst.msk [vmem:[#allocation5 + $0x28] sm:$0xff] %vm1656_vm7, %v2972_v27  ;;  %v7772_v3 = vpop.permute.xlu1 %3268  ;;  %v8741_v27 = vld [vmem:[#allocation52_spill] sm:$0xff] }
 0x373   : > { %v7774_v33 = vpop.permute.xlu0 %3266  ;;  %v2386_v59 = vadd.f32 %v8741_v27, %v7060_v40  ;;  %v2441_v41 = vadd.f32 %v8748_v25, %v2413_v56  ;;  %v8754_v27 = vld [vmem:[#allocation69_spill] sm:$0xff] }
 0x375   : > { %v2414_v55 = vadd.f32 %v8743_v51, %v2386_v59  ;;  %v2469_v42 = vadd.f32 %v7447_v49, %v2441_v41  ;;  %v8758_v41 = vld [vmem:[#allocation13_spill] sm:$0xff] }
 0x376   : > { %v7780_v52 = vpop.permute.xlu1 %3508 }
 0x377   : > { %v7785_v30 = vpop.permute.xlu0 %3506  ;;  %v2442_v40 = vadd.f32 %v8746_v12, %v2414_v55  ;;  %v8756_v12 = vld [vmem:[#allocation29_spill] sm:$0xff] }
 0x379   : > { %v2470_v35 = vadd.f32 %v7440_v26, %v2442_v40  ;;  %v1844_v40 = vadd.f32 %v8756_v12, %v8717_v11 }
 0x37a   : > { %v3553_v28 = vpop.permute.xlu1 %3552 }
 0x37b   : > { %v3563_v53 = vadd.f32 %v3553_v28, %v3539_v38  ;;  %v3551_v58 = vpop.permute.xlu0 %3550  ;;  %v3041_v38 = vadd.f32 %v8749_v62, %v3013_v24  ;;  %v2498_v4 = vadd.f32 %v7670_v47, %v2470_v35  ;;  %v8759_v62 = vld [vmem:[#allocation17_spill] sm:$0xff] }
 0x37c   : > { %v3562_v13 = vadd.f32 %v3551_v58, %v3538_v54  ;;  %v8750_v54 = vld [vmem:[#allocation89_spill] sm:$0xff] }
 0x37d   : > { %3567 = vst.msk [vmem:[#allocation5 + $0x18] sm:$0xff] %vm2348_vm11, %v3563_v53  ;;  %v3040_v28 = vadd.f32 %v8750_v54, %v3012_v5  ;;  %v8751_v53 = vld [vmem:[#allocation104_spill] sm:$0xff]  ;;  %v8760_v54 = vld [vmem:[#allocation45_spill] sm:$0xff] }
 0x37e   : > { %3566 = vst.msk [vmem:[#allocation5 + $0x8] sm:$0xff] %vm2348_vm11, %v3562_v13  ;;  %v1796_v44 = vpop.permute.xlu1 %1795  ;;  %v3069_v58 = vadd.f32 %v8751_v53, %v3041_v38  ;;  %v8752_v13 = vld [vmem:[#allocation105_spill] sm:$0xff]  ;;  %v8757_v5 = vld [vmem:[#allocation44_spill] sm:$0xff]  ;;  %v3599_v38 = vadd.f32 %v8759_v62, %v8758_v41  ;;  %v8769_v62 = vld [vmem:[#allocation42_spill] sm:$0xff] }
 0x37f   : > { %v1804_v18 = vadd.f32 %v1796_v44, %v1780_v19  ;;  %v1794_v10 = vpop.permute.xlu0 %1793  ;;  %v3068_v19 = vadd.f32 %v8752_v13, %v3040_v28  ;;  %v1872_v28 = vadd.f32 %v8760_v54, %v1844_v40  ;;  %v8762_v53 = vld [vmem:[#allocation20_spill] sm:$0xff] }
 0x380   : > { %v1803_v63 = vadd.f32 %v1794_v10, %v1779_v1  ;;  %v2497_v1 = vadd.f32 %v7673_v50, %v2469_v42  ;;  %v8761_v42 = vld [vmem:[#allocation14_spill] sm:$0xff] }
 0x381   : > { %1809 = vst.msk [vmem:[#allocation5 + $0x30] sm:$0xff] %vm1805_vm8, %v1804_v18  ;;  %v8753_v18 = vld [vmem:[#allocation68_spill] sm:$0xff]  ;;  %v3096_v59 = vadd.f32 %v8754_v27, %v3068_v19  ;;  %v3623_v19 = vadd.f32 %v7726_v9, %v3599_v38  ;;  %v2026_v38 = vadd.f32 %v8769_v62, %v7113_v6 }
 0x382   : > { %1808 = vst.msk [vmem:[#allocation5 + $0x20] sm:$0xff] %vm1805_vm8, %v1803_v63  ;;  %v7806_v7 = vpop.permute.xlu1 %2129  ;;  %v3097_v10 = vadd.f32 %v8753_v18, %v3069_v58  ;;  %v3598_v58 = vadd.f32 %v8762_v53, %v8761_v42  ;;  %v8770_v42 = vld [vmem:[#allocation43_spill] sm:$0xff] }
 0x383   : > { %v7809_v2 = vpop.permute.xlu0 %2127  ;;  %v3124_v49 = vadd.f32 %v7692_v31, %v3096_v59  ;;  %v2025_v53 = vadd.f32 %v8770_v42, %v8717_v11  ;;  %v8782_v42 = vld [vmem:[#allocation47_spill] sm:$0xff] }
 0x384   : > { %v3125_v45 = vadd.f32 %v7688_v39, %v3097_v10  ;;  %v8755_v39 = vld [vmem:[#allocation28_spill] sm:$0xff]  ;;  %v3622_v18 = vadd.f32 %v7729_v16, %v3598_v58 }
 0x385   : > { %v1845_v24 = vadd.f32 %v8755_v39, %v7113_v6 }
 0x386   : > { %v7818_v60 = vpop.permute.xlu1 %2463 }
 0x387   : > { %v7822_v46 = vpop.permute.xlu0 %2461  ;;  %v1873_v25 = vadd.f32 %v8757_v5, %v1845_v24 }
 0x38a   : > { %v2516_v44 = vpop.permute.xlu1 %2515 }
 0x38b   : > { %v2526_v63 = vadd.f32 %v2516_v44, %v2498_v4  ;;  %v2514_v26 = vpop.permute.xlu0 %2513  ;;  %v8763_v4 = vld [vmem:[#allocation96_spill] sm:$0xff] }
 0x38c   : > { %v2525_v20 = vadd.f32 %v2514_v26, %v2497_v1  ;;  %v1901_v13 = vadd.f32 %v8763_v4, %v1873_v25  ;;  %v8764_v1 = vld [vmem:[#allocation97_spill] sm:$0xff] }
 0x38d   : > { %2531 = vst.msk [vmem:[#allocation5 + $0x10] sm:$0xff] %vm2529_vm12, %v2526_v63  ;;  %v1900_v44 = vadd.f32 %v8764_v1, %v1872_v28  ;;  %v8772_v1 = vld [vmem:[#allocation57_spill] sm:$0xff] }
 0x38e   : > { %2530 = vst.msk [vmem:[#allocation5] sm:$0xff] %vm2529_vm12, %v2525_v20  ;;  %v3145_v47 = vpop.permute.xlu1 %3144  ;;  %v1929_v63 = vadd.f32 %v7536_v21, %v1901_v13  ;;  %v8766_v21 = vld [vmem:[#allocation79_spill] sm:$0xff] }
 0x38f   : > { %v3153_v51 = vadd.f32 %v3145_v47, %v3125_v45  ;;  %v3143_v50 = vpop.permute.xlu0 %3142  ;;  %v1928_v59 = vadd.f32 %v7539_v0, %v1900_v44  ;;  %v8765_v47 = vld [vmem:[#allocation78_spill] sm:$0xff]  ;;  %v8767_v0 = vld [vmem:[#allocation19_spill] sm:$0xff] }
 0x390   : > { %v3152_v55 = vadd.f32 %v3143_v50, %v3124_v49  ;;  %v1957_v45 = vadd.f32 %v7740_v36, %v1929_v63  ;;  %v3193_v16 = vadd.f32 %v8765_v47, %v7642_v23  ;;  %v8768_v36 = vld [vmem:[#allocation106_spill] sm:$0xff]  ;;  %v8774_v63 = vld [vmem:[#allocation40_spill] sm:$0xff] }
 0x391   : > { %3157 = vst.msk [vmem:[#allocation5 + $0x38] sm:$0xff] %vm1805_vm8, %v3153_v51  ;;  %v1956_v49 = vadd.f32 %v7743_v43, %v1928_v59 }
 0x392   : > { %3156 = vst.msk [vmem:[#allocation5 + $0x28] sm:$0xff] %vm1805_vm8, %v3152_v55  ;;  %v7838_v57 = vpop.permute.xlu1 %3416  ;;  %v3192_v55 = vadd.f32 %v8766_v21, %v7647_v61  ;;  %v3221_v24 = vadd.f32 %v8767_v0, %v3193_v16 }
 0x393   : > { %v7840_v56 = vpop.permute.xlu0 %3414 }
 0x394   : > { %v7842_v14 = vld [vmem:[#allocation5 + $0x10] sm:$0xff]  ;;  %v3220_v12 = vadd.f32 %v8768_v36, %v3192_v55  ;;  %v3249_v40 = vadd.f32 %v7582_v34, %v3221_v24  ;;  %v8779_v36 = vld [vmem:[#allocation80_spill] sm:$0xff] }
 0x395   : > { %4017 = vrot.lane.b32.xlu1 %v7842_v14, %s6162_s26  ;;  %v7848_v31 = vld [vmem:[#allocation5] sm:$0xff] }
 0x396   : > { %v7852_v32 = vpop.permute.xlu1 %3592  ;;  %4015 = vrot.lane.b32.xlu0 %v7848_v31, %s6162_s26  ;;  %v3248_v25 = vadd.f32 %v7585_v17, %v3220_v12  ;;  %v3277_v54 = vadd.f32 %v7772_v3, %v3249_v40  ;;  %v8771_v17 = vld [vmem:[#allocation56_spill] sm:$0xff]  ;;  %v2053_v3 = vadd.f32 %v8772_v1, %v2025_v53  ;;  %v8780_v40 = vld [vmem:[#allocation81_spill] sm:$0xff]  ;;  %v2206_v53 = vadd.f32 %v8782_v42, %v8717_v11 }
 0x397   : > { %v7859_v35 = vpop.permute.xlu0 %3590  ;;  %v2054_v4 = vadd.f32 %v8771_v17, %v2026_v38  ;;  %v8781_v38 = vld [vmem:[#allocation46_spill] sm:$0xff]  ;;  %v8783_v17 = vld [vmem:[#allocation60_spill] sm:$0xff]  ;;  %v8784_v1 = vld [vmem:[#allocation61_spill] sm:$0xff] }
 0x398   : > { %v3276_v34 = vadd.f32 %v7774_v33, %v3248_v25 }
 0x39a   : > { %v3637_v10 = vpop.permute.xlu1 %3636 }
 0x39b   : > { %v3647_v26 = vadd.f32 %v3637_v10, %v3623_v19  ;;  %v3635_v27 = vpop.permute.xlu0 %3634 }
 0x39c   : > { %v3646_v20 = vadd.f32 %v3635_v27, %v3622_v18  ;;  %v8773_v18 = vld [vmem:[#allocation27_spill] sm:$0xff]  ;;  %v8775_v27 = vld [vmem:[#allocation18_spill] sm:$0xff] }
 0x39d   : > { %3651 = vst.msk [vmem:[#allocation5 + $0x18] sm:$0xff] %vm2529_vm12, %v3647_v26  ;;  %v2082_v10 = vadd.f32 %v8773_v18, %v2054_v4  ;;  %v2081_v26 = vadd.f32 %v8774_v63, %v2053_v3  ;;  %v8786_v18 = vld [vmem:[#allocation25_spill] sm:$0xff] }
 0x39e   : > { %3650 = vst.msk [vmem:[#allocation5 + $0x8] sm:$0xff] %vm2529_vm12, %v3646_v20  ;;  %v1977_v9 = vpop.permute.xlu1 %1976 }
 0x39f   : > { %v1985_v51 = vadd.f32 %v1977_v9, %v1957_v45  ;;  %v1975_v50 = vpop.permute.xlu0 %1974  ;;  %v2110_v59 = vadd.f32 %v8775_v27, %v2082_v10  ;;  %v8776_v45 = vld [vmem:[#allocation21_spill] sm:$0xff]  ;;  %v8787_v27 = vld [vmem:[#allocation58_spill] sm:$0xff] }
 0x3a0   : > { %v1984_v39 = vadd.f32 %v1975_v50, %v1956_v49  ;;  %v2109_v49 = vadd.f32 %v8776_v45, %v2081_v26  ;;  %v8788_v45 = vld [vmem:[#allocation15_spill] sm:$0xff] }
 0x3a1   : > { %1990 = vst.msk [vmem:[#allocation5 + $0x30] sm:$0xff] %vm1986_vm9, %v1985_v51  ;;  %v2138_v9 = vadd.f32 %v7806_v7, %v2110_v59  ;;  %v8777_v51 = vld [vmem:[#allocation90_spill] sm:$0xff]  ;;  %v2388_v59 = vadd.f32 %v8787_v27, %v7113_v6 }
 0x3a2   : > { %1989 = vst.msk [vmem:[#allocation5 + $0x20] sm:$0xff] %vm1986_vm9, %v1984_v39  ;;  %v2311_v43 = vpop.permute.xlu1 %2310  ;;  %v2137_v47 = vadd.f32 %v7809_v2, %v2109_v49  ;;  %v3341_v50 = vadd.f32 %v8777_v51, %v7642_v23  ;;  %v8778_v39 = vld [vmem:[#allocation91_spill] sm:$0xff]  ;;  %v8789_v49 = vld [vmem:[#allocation36_spill] sm:$0xff] }
 0x3a3   : > { %v7883_v5 = vpop.permute.xlu0 %2308  ;;  %v3340_v0 = vadd.f32 %v8778_v39, %v7647_v61 }
 0x3a4   : > { %v7886_v41 = vld [vmem:[#allocation5 + $0x18] sm:$0xff]  ;;  %v3369_v12 = vadd.f32 %v8779_v36, %v3341_v50  ;;  %v8791_v50 = vld [vmem:[#allocation16_spill] sm:$0xff] }
 0x3a5   : > { %4025 = vrot.lane.b32.xlu1 %v7886_v41, %s6162_s26  ;;  %v7893_v28 = vld [vmem:[#allocation5 + $0x8] sm:$0xff]  ;;  %v3368_v25 = vadd.f32 %v8780_v40, %v3340_v0 }
 0x3a6   : > { %v3293_v58 = vpop.permute.xlu1 %3292  ;;  %4023 = vrot.lane.b32.xlu0 %v7893_v28, %s6162_s26  ;;  %v3397_v2 = vadd.f32 %v7702_v15, %v3369_v12  ;;  %v2234_v15 = vadd.f32 %v8784_v1, %v2206_v53 }
 0x3a7   : > { %v3301_v13 = vadd.f32 %v3293_v58, %v3277_v54  ;;  %v3291_v19 = vpop.permute.xlu0 %3290  ;;  %v3396_v23 = vadd.f32 %v7706_v48, %v3368_v25  ;;  %v2207_v54 = vadd.f32 %v8781_v38, %v7113_v6  ;;  %v8794_v6 = vld [vmem:[#allocation107_spill] sm:$0xff] }
 0x3a8   : > { %v3300_v44 = vadd.f32 %v3291_v19, %v3276_v34  ;;  %v3425_v61 = vadd.f32 %v7838_v57, %v3397_v2  ;;  %v2262_v10 = vadd.f32 %v8786_v18, %v2234_v15  ;;  %v6163_v15 = vmov 0.0  }
 0x3a9   : > { %3305 = vst.msk [vmem:[#allocation5 + $0x38] sm:$0xff] %vm1986_vm9, %v3301_v13  ;;  %v3424_v34 = vadd.f32 %v7840_v56, %v3396_v23  ;;  %v2235_v4 = vadd.f32 %v8783_v17, %v2207_v54  ;;  %4142 = vmatprep.mubr.f32.mxu1 %v6163_v15  ;;  %3806 = vmatprep.mubr.f32.mxu0 %v6163_v15 }
 0x3aa   : > { %3304 = vst.msk [vmem:[#allocation5 + $0x28] sm:$0xff] %vm1986_vm9, %v3300_v44  ;;  %v3533_v33 = vpop.permute.xlu1 %3532  ;;  %v8785_v44 = vld [vmem:[#allocation24_spill] sm:$0xff]  ;;  %v2290_v26 = vadd.f32 %v7756_v29, %v2262_v10 }
 0x3ab   : > { %v3531_v20 = vpop.permute.xlu0 %3530  ;;  %v2263_v48 = vadd.f32 %v8785_v44, %v2235_v4 }
 0x3ac   : > { %v2318_v39 = vadd.f32 %v7883_v5, %v2290_v26 }
 0x3ad   : > { %v2291_v63 = vadd.f32 %v7752_v8, %v2263_v48  ;;  %v8793_v8 = vld [vmem:[#allocation41_spill] sm:$0xff] }
 0x3ae   : > { %v2158_v16 = vpop.permute.xlu1 %2157 }
 0x3af   : > { %v2166_v21 = vadd.f32 %v2158_v16, %v2138_v9  ;;  %v2156_v55 = vpop.permute.xlu0 %2155  ;;  %v3489_v9 = vadd.f32 %v8789_v49, %v8788_v45  ;;  %v8790_v16 = vld [vmem:[#allocation59_spill] sm:$0xff] }
 0x3b0   : > { %v2165_v24 = vadd.f32 %v2156_v55, %v2137_v47  ;;  %v2319_v47 = vadd.f32 %v2311_v43, %v2291_v63  ;;  %v2387_v51 = vadd.f32 %v8790_v16, %v8717_v11 }
 0x3b1   : > { %2171 = vst.msk [vmem:[#allocation5 + $0x30] sm:$0xff] %vm2167_vm10, %v2166_v21  ;;  %v8792_v21 = vld [vmem:[#allocation37_spill] sm:$0xff]  ;;  %v3517_v29 = vadd.f32 %v7780_v52, %v3489_v9 }
 0x3b2   : > { %2170 = vst.msk [vmem:[#allocation5 + $0x20] sm:$0xff] %vm2167_vm10, %v2165_v24  ;;  %v2492_v7 = vpop.permute.xlu1 %2491  ;;  %v3488_v55 = vadd.f32 %v8792_v21, %v8791_v50  ;;  %v2416_v24 = vadd.f32 %v8793_v8, %v2388_v59  ;;  %v2415_v40 = vadd.f32 %v8794_v6, %v2387_v51 }
 0x3b3   : > { %v2490_v62 = vpop.permute.xlu0 %2489  ;;  %v3541_v11 = vadd.f32 %v3533_v33, %v3517_v29 }
 0x3b4   : > { %v3516_v25 = vadd.f32 %v7785_v30, %v3488_v55  ;;  %v2444_v2 = vadd.f32 %v7658_v22, %v2416_v24  ;;  %v2443_v23 = vadd.f32 %v7661_v37, %v2415_v40  ;;  %v3601_v37 = vadd.f32 %v7852_v32, %v8788_v45 }
 0x3b6   : > { %v3441_v58 = vpop.permute.xlu1 %3440  ;;  %v3540_v5 = vadd.f32 %v3531_v20, %v3516_v25  ;;  %v2472_v52 = vadd.f32 %v7818_v60, %v2444_v2  ;;  %v2471_v42 = vadd.f32 %v7822_v46, %v2443_v23  ;;  %v3600_v60 = vadd.f32 %v7859_v35, %v8791_v50 }
 0x3b7   : > { %v3449_v13 = vadd.f32 %v3441_v58, %v3425_v61  ;;  %v3439_v19 = vpop.permute.xlu0 %3438 }
 0x3b8   : > { %v3448_v3 = vadd.f32 %v3439_v19, %v3424_v34  ;;  %v2500_v30 = vadd.f32 %v2492_v7, %v2472_v52  ;;  %v2499_v22 = vadd.f32 %v2490_v62, %v2471_v42 }
 0x3b9   : > { %3453 = vst.msk [vmem:[#allocation5 + $0x38] sm:$0xff] %vm2167_vm10, %v3449_v13 }
 0x3ba   : > { %3452 = vst.msk [vmem:[#allocation5 + $0x28] sm:$0xff] %vm2167_vm10, %v3448_v3  ;;  %v3617_v57 = vpop.permute.xlu1 %3616  ;;  %v3694_v3 = vlaneseq }
 0x3bb   : > { %v3615_v56 = vpop.permute.xlu0 %3614  ;;  %v3625_v17 = vadd.f32 %v3617_v57, %v3601_v37  ;;  %v5614_v57 = vld [vmem:[%s8544_s9 + $0x2] ss:$8 sm:$0x3] }
 0x3bc   : > { %v3624_v46 = vadd.f32 %v3615_v56, %v3600_v60  ;;  %v3708_v44 = vshrl.u32 %v3694_v3, 7  ;;  %v8015_v48 = vand.u32 127, %v3694_v3  ;;  %v5615_v37 = vld [vmem:[%s8545_s10 + $0x40] sm:$0xff] }
 0x3be   : > { %v2339_v0 = vpop.permute.xlu1 %2338  ;;  %v8017_v18 = vsub.s32 0, %v3708_v44  ;;  %v8019_v10 = vsub.s32 1, %v3708_v44  ;;  %vm4031_vm13 = vcmp.lt.s32.totalorder %v8015_v48, 15  ;;  %vm4207_vm14 = vcmp.lt.s32.totalorder %v8015_v48, 1  ;;  %v5242_v44 = vld [vmem:[%s8547_s12 + $0x8] sm:$0xff] }
 0x3bf   : > { %v2347_v36 = vadd.f32 %v2339_v0, %v2319_v47  ;;  %v2337_v12 = vpop.permute.xlu0 %2336  ;;  %vm4513_vm0 = vcmp.lt.s32.totalorder %v8015_v48, 127  ;;  %vm4689_vm1 = vcmp.lt.s32.totalorder %v8015_v48, 113  ;;  %vm3696_vm2 = vcmp.lt.s32.totalorder %v8015_v48, 17 }
 0x3c0   : > { %v2346_v43 = vadd.f32 %v2337_v12, %v2318_v39  ;;  %v4046_v26 = vrot.slane %v5614_v57, %v8017_v18  ;;  %v4050_v27 = vrot.slane %v5614_v57, %v8019_v10  ;;  %vm4865_vm3 = vcmp.lt.s32.totalorder %v8015_v48, 112 }
 0x3c1   : > { %2352 = vst.msk [vmem:[#allocation5 + $0x30] sm:$0xff] %vm2348_vm11, %v2347_v36  ;;  %vm3855_vm4 = vcmp.lt.s32.totalorder %v8015_v48, 16  ;;  %vm5041_vm5 = vcmp.lt.s32.totalorder %v8015_v48, 111  ;;  %v5608_v48 = vld [vmem:[%s8545_s10 + $0x30] sm:$0xff] }
 0x3c2   : > { %2351 = vst.msk [vmem:[#allocation5 + $0x20] sm:$0xff] %vm2348_vm11, %v2346_v43  ;;  %v3557_v38 = vpop.permute.xlu1 %3556 }
 0x3c3   : > { %v3565_v54 = vadd.f32 %v3557_v38, %v3541_v11  ;;  %v3555_v61 = vpop.permute.xlu0 %3554 }
 0x3c4   : > { %v3564_v53 = vadd.f32 %v3555_v61, %v3540_v5  ;;  %v5623_v5 = vld [vmem:[%s8544_s9 + $0x3] ss:$8 sm:$0x3] }
 0x3c5   : > { %3569 = vst.msk [vmem:[#allocation5 + $0x38] sm:$0xff] %vm2348_vm11, %v3565_v54  ;;  %v4222_v42 = vrot.slane %v5623_v5, %v8017_v18 }
 0x3c6   : > { %3568 = vst.msk [vmem:[#allocation5 + $0x28] sm:$0xff] %vm2348_vm11, %v3564_v53  ;;  %v2520_v33 = vpop.permute.xlu1 %2519  ;;  %v4226_v53 = vrot.slane %v5623_v5, %v8019_v10 }
 0x3c7   : > { %v2528_v20 = vadd.f32 %v2520_v33, %v2500_v30  ;;  %v2518_v34 = vpop.permute.xlu0 %2517  ;;  %v5210_v30 = vld [vmem:[%s8546_s11 + $0x8] sm:$0xff] }
 0x3c8   : > { %v2527_v58 = vadd.f32 %v2518_v34, %v2499_v22  ;;  %v5209_v22 = vld [vmem:[%s8546_s11] sm:$0xff] }
 0x3c9   : > { %2533 = vst.msk [vmem:[#allocation5 + $0x30] sm:$0xff] %vm2529_vm12, %v2528_v20  ;;  %v6169_v20 = vmov 0  }
 0x3ca   : > { %2532 = vst.msk [vmem:[#allocation5 + $0x20] sm:$0xff] %vm2529_vm12, %v2527_v58  ;;  %v3641_v7 = vpop.permute.xlu1 %3640  ;;  %6055 = vset.pattern.permute.xlu1 %v6169_v20  ;;  %6054 = vset.pattern.permute.xlu0 %v6169_v20 }
 0x3cb   : > { %v3649_v62 = vadd.f32 %v3641_v7, %v3625_v17  ;;  %v3639_v4 = vpop.permute.xlu0 %3638 }
 0x3cc   : > { %v3648_v13 = vadd.f32 %v3639_v4, %v3624_v46  ;;  %v5241_v4 = vld [vmem:[%s8547_s12] sm:$0xff] }
 0x3cd   : > { %3653 = vst.msk [vmem:[#allocation5 + $0x38] sm:$0xff] %vm2529_vm12, %v3649_v62 }
 0x3ce   : > { %3652 = vst.msk [vmem:[#allocation5 + $0x28] sm:$0xff] %vm2529_vm12, %v3648_v13 }
 0x3d0   : > { %v7963_v32 = vld [vmem:[#allocation5 + $0x30] sm:$0xff] }
 0x3d1   : > { %4021 = vrot.lane.b32.xlu1 %v7963_v32, %s6162_s26  ;;  %v7967_v35 = vld [vmem:[#allocation5 + $0x20] sm:$0xff] }
 0x3d2   : > { %4019 = vrot.lane.b32.xlu0 %v7967_v35, %s6162_s26 }
 0x3d4   : > { %v7971_v19 = vld [vmem:[#allocation5 + $0x38] sm:$0xff] }
 0x3d5   : > { %4029 = vrot.lane.b32.xlu1 %v7971_v19, %s6162_s26  ;;  %v7975_v1 = vld [vmem:[#allocation5 + $0x28] sm:$0xff] }
 0x3d6   : > { %4027 = vrot.lane.b32.xlu0 %v7975_v1, %s6162_s26  ;;  %s5687_s26 = sshll.u32 %s6272_s22, 7  ;;  %s6170_s22 = smov [#allocation10]  }
 0x3d7   : > { %s8493_s1 = scalar_lea.hbm %s8550_s15, %s5687_s26 }
 0x3d9   : > { %4193 = vrot.lane.b32.xlu1 %v7842_v14, %s6164_s30 }
 0x3da   : > { %4191 = vrot.lane.b32.xlu0 %v7848_v31, %s6164_s30 }
 0x3dd   : > { %4201 = vrot.lane.b32.xlu1 %v7886_v41, %s6164_s30 }
 0x3de   : > { %4199 = vrot.lane.b32.xlu0 %v7893_v28, %s6164_s30 }
 0x3e1   : > { %4197 = vrot.lane.b32.xlu1 %v7963_v32, %s6164_s30 }
 0x3e2   : > { %4195 = vrot.lane.b32.xlu0 %v7967_v35, %s6164_s30 }
 0x3e5   : > { %4205 = vrot.lane.b32.xlu1 %v7971_v19, %s6164_s30 }
 0x3e6   : > { %4203 = vrot.lane.b32.xlu0 %v7975_v1, %s6164_s30  ;;  %s6168_s30 = smov 111  }
 0x3e9   : > { %4499 = vrot.lane.b32.xlu1 %v7842_v14, %s6165_s23 }
 0x3ea   : > { %4497 = vrot.lane.b32.xlu0 %v7848_v31, %s6165_s23 }
 0x3ed   : > { %4507 = vrot.lane.b32.xlu1 %v7886_v41, %s6165_s23 }
 0x3ee   : > { %4505 = vrot.lane.b32.xlu0 %v7893_v28, %s6165_s23 }
 0x3f1   : > { %4503 = vrot.lane.b32.xlu1 %v7963_v32, %s6165_s23 }
 0x3f2   : > { %4501 = vrot.lane.b32.xlu0 %v7967_v35, %s6165_s23 }
 0x3f5   : > { %4511 = vrot.lane.b32.xlu1 %v7971_v19, %s6165_s23 }
 0x3f6   : > { %4509 = vrot.lane.b32.xlu0 %v7975_v1, %s6165_s23  ;;  %s571_s23 = scalar_lea.vmem %s8795_s2, %s6333_s0 }
 0x3f9   : > { %4675 = vrot.lane.b32.xlu1 %v7842_v14, %s6166_s25 }
 0x3fa   : > { %4673 = vrot.lane.b32.xlu0 %v7848_v31, %s6166_s25 }
 0x3fd   : > { %4683 = vrot.lane.b32.xlu1 %v7886_v41, %s6166_s25 }
 0x3fe   : > { %4681 = vrot.lane.b32.xlu0 %v7893_v28, %s6166_s25 }
 0x401   : > { %4679 = vrot.lane.b32.xlu1 %v7963_v32, %s6166_s25 }
 0x402   : > { %4677 = vrot.lane.b32.xlu0 %v7967_v35, %s6166_s25 }
 0x405   : > { %4687 = vrot.lane.b32.xlu1 %v7971_v19, %s6166_s25 }
 0x406   : > { %4685 = vrot.lane.b32.xlu0 %v7975_v1, %s6166_s25 }
 0x407   : > { %v4018_v63 = vpop.permute.xlu1 %4017 }
 0x408   : > { %v4016_v56 = vpop.permute.xlu0 %4015 }
 0x409   : > { %3680 = vrot.lane.b32.xlu1 %v7842_v14, %s6167_s7 }
 0x40a   : > { %3678 = vrot.lane.b32.xlu0 %v7848_v31, %s6167_s7 }
 0x40d   : > { %3688 = vrot.lane.b32.xlu1 %v7886_v41, %s6167_s7 }
 0x40e   : > { %3686 = vrot.lane.b32.xlu0 %v7893_v28, %s6167_s7 }
 0x411   : > { %4851 = vrot.lane.b32.xlu1 %v7842_v14, %s6161_s17 }
 0x412   : > { %4849 = vrot.lane.b32.xlu0 %v7848_v31, %s6161_s17 }
 0x415   : > { %4859 = vrot.lane.b32.xlu1 %v7886_v41, %s6161_s17 }
 0x416   : > { %4857 = vrot.lane.b32.xlu0 %v7893_v28, %s6161_s17 }
 0x417   : > { %v4026_v59 = vpop.permute.xlu1 %4025 }
 0x418   : > { %v4033_v45 = vsel %vm4031_vm13, %v4018_v63, %v4026_v59  ;;  %v4037_v49 = vsel %vm4031_vm13, %v4026_v59, %v4018_v63  ;;  %v4024_v9 = vpop.permute.xlu0 %4023  ;;  %v5616_v63 = vld [vmem:[%s8545_s10 + $0x48] sm:$0xff]  ;;  %v5211_v59 = vld [vmem:[%s8546_s11 + $0x10] sm:$0xff] }
 0x419   : > { %v4055_v47 = vmul.f32 %v4046_v26, %v4037_v49  ;;  %v4056_v16 = vmul.f32 %v4050_v27, %v4033_v45  ;;  %v4032_v51 = vsel %vm4031_vm13, %v4016_v56, %v4024_v9  ;;  %v4036_v50 = vsel %vm4031_vm13, %v4024_v9, %v4016_v56  ;;  %3684 = vrot.lane.b32.xlu1 %v7963_v32, %s6167_s7  ;;  %v5212_v45 = vld [vmem:[%s8546_s11 + $0x18] sm:$0xff]  ;;  %v5617_v9 = vld [vmem:[%s8545_s10 + $0x50] sm:$0xff] }
 0x41a   : > { %v4053_v21 = vmul.f32 %v4046_v26, %v4036_v50  ;;  %v4054_v55 = vmul.f32 %v4050_v27, %v4032_v51  ;;  %3682 = vrot.lane.b32.xlu0 %v7967_v35, %s6167_s7 }
 0x41c   : > { %v5855_v39 = vpack.c.bf16 %v4055_v47, %v4053_v21  ;;  %v5853_v0 = vpack.c.bf16 %v4056_v16, %v4054_v55 }
 0x41d   : > { %3692 = vrot.lane.b32.xlu1 %v7971_v19, %s6167_s7 }
 0x41e   : > { %3690 = vrot.lane.b32.xlu0 %v7975_v1, %s6167_s7  ;;  %5854 = vmatprep.subr.bf16.mxu1 %v5853_v0  ;;  %v5243_v0 = vld [vmem:[%s8547_s12 + $0x10] sm:$0xff]  ;;  %s559_s7 = sand.u32 1, %s6144_s19  }
 0x41f   : > { %5856 = vmatpush1.bf16.msra.mxu1 %v5855_v39  ;;  %s5532_s16 = sshll.u32 %s559_s7, 3  ;;  %s5393_s0 = scalar_lea.sflag [#allocation8], %s559_s7 }
 0x421   : > { %4855 = vrot.lane.b32.xlu1 %v7963_v32, %s6161_s17 }
 0x422   : > { %4853 = vrot.lane.b32.xlu0 %v7967_v35, %s6161_s17 }
 0x425   : > { %4863 = vrot.lane.b32.xlu1 %v7971_v19, %s6161_s17 }
 0x426   : > { %4861 = vrot.lane.b32.xlu0 %v7975_v1, %s6161_s17 }
 0x429   : > { %3841 = vrot.lane.b32.xlu1 %v7842_v14, %s6155_s6 }
 0x42a   : > { %3839 = vrot.lane.b32.xlu0 %v7848_v31, %s6155_s6 }
 0x42d   : > { %3849 = vrot.lane.b32.xlu1 %v7886_v41, %s6155_s6 }
 0x42e   : > { %3847 = vrot.lane.b32.xlu0 %v7893_v28, %s6155_s6 }
 0x431   : > { %5027 = vrot.lane.b32.xlu1 %v7842_v14, %s6168_s30 }
 0x432   : > { %5025 = vrot.lane.b32.xlu0 %v7848_v31, %s6168_s30 }
 0x435   : > { %5035 = vrot.lane.b32.xlu1 %v7886_v41, %s6168_s30 }
 0x436   : > { %5033 = vrot.lane.b32.xlu0 %v7893_v28, %s6168_s30 }
 0x439   : > { %3845 = vrot.lane.b32.xlu1 %v7963_v32, %s6155_s6 }
 0x43a   : > { %3843 = vrot.lane.b32.xlu0 %v7967_v35, %s6155_s6 }
 0x43d   : > { %3853 = vrot.lane.b32.xlu1 %v7971_v19, %s6155_s6 }
 0x43e   : > { %3851 = vrot.lane.b32.xlu0 %v7975_v1, %s6155_s6 }
 0x441   : > { %5031 = vrot.lane.b32.xlu1 %v7963_v32, %s6168_s30 }
 0x442   : > { %5029 = vrot.lane.b32.xlu0 %v7967_v35, %s6168_s30 }
 0x443   : > { %v4022_v8 = vpop.permute.xlu1 %4021 }
 0x444   : > { %v4020_v24 = vpop.permute.xlu0 %4019 }
 0x445   : > { %5039 = vrot.lane.b32.xlu1 %v7971_v19, %s6168_s30 }
 0x446   : > { %5037 = vrot.lane.b32.xlu0 %v7975_v1, %s6168_s30  ;;  %s561_s30 = scalar_lea.vmem [#allocation10], %s5532_s16  ;;  %s6090_s16 = sshll.u32 %s6170_s22, 4  ;;  %s6091_s16 = int_to_ptr.vmem [resolvable:$false] %s6090_s16 }
 0x447   : > { %v4030_v29 = vpop.permute.xlu1 %4029  ;;  %s5407_s6 = sshll.u32 %s561_s30, 4  ;;  %s6092_s2 = scalar_lea.vmem %s6091_s16, 256  ;;  %s8495_s6 = int_to_ptr.vmem [resolvable:$true] %s5407_s6 }
 0x448   : > { %v4035_v36 = vsel %vm4031_vm13, %v4022_v8, %v4030_v29  ;;  %v4039_v12 = vsel %vm4031_vm13, %v4030_v29, %v4022_v8  ;;  %v4028_v6 = vpop.permute.xlu0 %4027  ;;  %v5244_v29 = vld [vmem:[%s8547_s12 + $0x18] sm:$0xff]  ;;  %s6086_s25 = scalar_lea.vmem %s8495_s6, 128  ;;  %p6093_p13 = scmp.lt.s32.totalorder %s8495_s6, %s6091_s16 }
 0x449   : > { %v4059_v40 = vmul.f32 %v4046_v26, %v4039_v12  ;;  %v4060_v25 = vmul.f32 %v4050_v27, %v4035_v36  ;;  %v4034_v43 = vsel %vm4031_vm13, %v4020_v24, %v4028_v6  ;;  %v4038_v2 = vsel %vm4031_vm13, %v4028_v6, %v4020_v24  ;;  %5220 = vperm.xlu1 %6055, %v5210_v30   ;;  %v5618_v12 = vld [vmem:[%s8545_s10 + $0x58] sm:$0xff]  ;;  %v5640_v6 = vld [vmem:[%s8544_s9 + $0x4] ss:$8 sm:$0x3]  ;;  %p6087_p9 = scmp.ne.s32.totalorder %s8495_s6, %s6086_s25  ;;  %p6094_p0 = scmp.lt.s32.totalorder %s6092_s2, %s6086_s25 }
 0x44a   : > { %v4057_v11 = vmul.f32 %v4046_v26, %v4038_v2  ;;  %v4058_v23 = vmul.f32 %v4050_v27, %v4034_v43  ;;  %5215 = vperm.xlu0 %6054, %v5209_v22   ;;  %v5306_v2 = vld [vmem:[%s8549_s14] sm:$0xf]  ;;  %v5625_v22 = vld [vmem:[%s8545_s10 + $0x68] sm:$0xff] }
 0x44b   : > { %v4194_v38 = vpop.permute.xlu1 %4193  ;;  %p6088_p10 = pnand %p6087_p9, %p6289_p5  ;;  %p6095_p1 = por %p6094_p0, %p6093_p13 }
 0x44c   : > { %v5859_v52 = vpack.c.bf16 %v4059_v40, %v4057_v11  ;;  %v4192_v54 = vpop.permute.xlu0 %4191  ;;  %v5857_v61 = vpack.c.bf16 %v4060_v25, %v4058_v23  ;;  %v4532_v11 = vrot.slane %v5640_v6, %v8019_v10  ;;  %v5869_v23 = vpack.c.bf16 %v7886_v41, %v7893_v28 }
 0x44d   : > { %5247 = vperm.xlu1 %6055, %v5241_v4   ;;  %v5871_v41 = vpack.c.bf16 %v7842_v14, %v7848_v31  ;;  %v5875_v14 = vpack.c.bf16 %v7963_v32, %v7967_v35  ;;  %v5649_v35 = vld [vmem:[%s8544_s9 + $0x5] ss:$8 sm:$0x3]  ;;  %p6089_p12 = pneg %p6088_p10 }
 0x44e   : > { %5858 = vmatprep.subr.bf16.mxu1 %v5857_v61  ;;  %5252 = vperm.xlu0 %6054, %v5242_v44  }
 0x44f   : > { %v4202_v33 = vpop.permute.xlu1 %4201  ;;  %5860 = vmatpush1.bf16.msra.mxu1 %v5859_v52  ;;  %p6096_p2 = pnand %p6095_p1, %p6089_p12 }
 0x450   : > { %v4209_v34 = vsel %vm4207_vm14, %v4194_v38, %v4202_v33  ;;  %v4213_v60 = vsel %vm4207_vm14, %v4202_v33, %v4194_v38  ;;  %v4200_v58 = vpop.permute.xlu0 %4199  ;;  %v5624_v38 = vld [vmem:[%s8545_s10 + $0x60] sm:$0xff] }
 0x451   : > { %v4231_v17 = vmul.f32 %v4222_v42, %v4213_v60  ;;  %v4232_v46 = vmul.f32 %v4226_v53, %v4209_v34  ;;  %v4208_v7 = vsel %vm4207_vm14, %v4192_v54, %v4200_v58  ;;  %v4212_v62 = vsel %vm4207_vm14, %v4200_v58, %v4192_v54  ;;  %5225 = vperm.xlu1 %6055, %v5211_v59  }
 0x452   : > { %v4229_v13 = vmul.f32 %v4222_v42, %v4212_v62  ;;  %v4230_v3 = vmul.f32 %v4226_v53, %v4208_v7  ;;  %5619 = vmatmul.mubr.msk.f32.vlgmr.msra.gmra.mrb[8].mxu1 %vm3729_vm15, %v5615_v37  ;;  %5230 = vperm.xlu0 %6054, %v5212_v45  }
 0x453   : > { %v4198_v57 = vpop.permute.xlu1 %4197  ;;  %4148 = vmatprep.mubr.f32.mxu1 %v6163_v15 }
 0x454   : > { %v5863_v56 = vpack.c.bf16 %v4231_v17, %v4229_v13  ;;  %v4196_v26 = vpop.permute.xlu0 %4195  ;;  %v5861_v27 = vpack.c.bf16 %v4232_v46, %v4230_v3  ;;  %v5627_v46 = vld [vmem:[%s8545_s10 + $0x78] sm:$0xff]  ;;  %v4708_v13 = vrot.slane %v5649_v35, %v8019_v10 }
 0x455   : > { %5257 = vperm.xlu1 %6055, %v5243_v0  }
 0x456   : > { %5620 = vmatmul.mubr.msk.f32.gmra.mrb[10].mxu1 %vm3729_vm15, %v5616_v63  ;;  %5862 = vmatprep.subr.bf16.mxu1 %v5861_v27 }
 0x457   : > { %v4206_v49 = vpop.permute.xlu1 %4205  ;;  %5864 = vmatpush1.bf16.msra.mxu1 %v5863_v56  ;;  %4154 = vmatprep.mubr.f32.mxu1 %v6163_v15 }
 0x458   : > { %v4211_v47 = vsel %vm4207_vm14, %v4198_v57, %v4206_v49  ;;  %v4215_v16 = vsel %vm4207_vm14, %v4206_v49, %v4198_v57  ;;  %v4204_v51 = vpop.permute.xlu0 %4203  ;;  %5262 = vperm.xlu0 %6054, %v5244_v29  }
 0x459   : > { %v4235_v50 = vmul.f32 %v4222_v42, %v4215_v16  ;;  %v4236_v21 = vmul.f32 %v4226_v53, %v4211_v47  ;;  %v4210_v55 = vsel %vm4207_vm14, %v4196_v26, %v4204_v51  ;;  %v4214_v39 = vsel %vm4207_vm14, %v4204_v51, %v4196_v26  ;;  %5309 = vperm.xlu1 %6055, %v5306_v2   ;;  %v5632_v26 = vld [vmem:[%s8545_s10 + $0x80] sm:$0xff] }
 0x45a   : > { %v4233_v8 = vmul.f32 %v4222_v42, %v4214_v39  ;;  %v4234_v24 = vmul.f32 %v4226_v53, %v4210_v55  ;;  %5621 = vmatmul.mubr.msk.f32.gmra.mrb[12].mxu1 %vm3729_vm15, %v5617_v9  ;;  %v5873_v53 = vpack.c.bf16 %v7971_v19, %v7975_v1  ;;  %v5626_v19 = vld [vmem:[%s8545_s10 + $0x70] sm:$0xff]  ;;  %v4528_v1 = vrot.slane %v5640_v6, %v8017_v18  ;;  %v5633_v55 = vld [vmem:[%s8545_s10 + $0x88] sm:$0xff] }
 0x45b   : > { %v4500_v36 = vpop.permute.xlu1 %4499  ;;  %4160 = vmatprep.mubr.f32.mxu1 %v6163_v15 }
 0x45c   : > { %v5867_v40 = vpack.c.bf16 %v4235_v50, %v4233_v8  ;;  %v4498_v25 = vpop.permute.xlu0 %4497  ;;  %v5865_v43 = vpack.c.bf16 %v4236_v21, %v4234_v24  ;;  %v4704_v24 = vrot.slane %v5649_v35, %v8017_v18 }
 0x45e   : > { %5622 = vmatmul.mubr.msk.f32.gmra.mrb[14].mxu1 %vm3729_vm15, %v5618_v12  ;;  %5866 = vmatprep.subr.bf16.mxu1 %v5865_v43 }
 0x45f   : > { %v4508_v5 = vpop.permute.xlu1 %4507  ;;  %5868 = vmatpush1.bf16.msra.mxu1 %v5867_v40  ;;  %4318 = vmatprep.mubr.f32.mxu1 %v6163_v15 }
 0x460   : > { %v4519_v52 = vsel %vm4513_vm0, %v4508_v5, %v4500_v36  ;;  %5870 = vmatprep.subr.bf16.mxu1 %v5869_v23  ;;  %v4506_v54 = vpop.permute.xlu0 %4505  ;;  %v4515_v34 = vsel %vm4513_vm0, %v4500_v36, %v4508_v5  ;;  %v5634_v36 = vld [vmem:[%s8545_s10 + $0x90] sm:$0xff] }
 0x461   : > { %v4518_v61 = vsel %vm4513_vm0, %v4506_v54, %v4498_v25  ;;  %v4538_v28 = vmul.f32 %v4532_v11, %v4519_v52  ;;  %v4514_v32 = vsel %vm4513_vm0, %v4498_v25, %v4506_v54  ;;  %v4537_v7 = vmul.f32 %v4528_v1, %v4515_v34  ;;  %v3705_v25 = vld [vmem:[%s8544_s9] ss:$8 sm:$0x3] }
 0x462   : > { %v4536_v42 = vmul.f32 %v4532_v11, %v4518_v61  ;;  %5628 = vmatmul.mubr.msk.f32.vlgmr.msra.gmra.mrb[8].mxu1 %vm3729_vm15, %v5624_v38  ;;  %v4535_v62 = vmul.f32 %v4528_v1, %v4514_v32  ;;  %v5635_v38 = vld [vmem:[%s8545_s10 + $0x98] sm:$0xff] }
 0x463   : > { %v4504_v30 = vpop.permute.xlu1 %4503  ;;  %5872 = vmatpush1.bf16.msra.mxu1 %v5871_v41  ;;  %4324 = vmatprep.mubr.f32.mxu1 %v6163_v15  ;;  %v8253_v41 = vrot.slane %v3705_v25, %v8017_v18 }
 0x464   : > { %v4502_v33 = vpop.permute.xlu0 %4501  ;;  %5874 = vmatprep.subr.bf16.mxu1 %v5873_v53  ;;  %v5877_v31 = vpack.c.bf16 %v4538_v28, %v4536_v42  ;;  %v5879_v27 = vpack.c.bf16 %v4537_v7, %v4535_v62  ;;  %v8256_v28 = vrot.slane %v3705_v25, %v8019_v10  ;;  %v5642_v62 = vld [vmem:[%s8545_s10 + $0xa8] sm:$0xff] }
 0x466   : > { %5629 = vmatmul.mubr.msk.f32.gmra.mrb[10].mxu1 %vm3729_vm15, %v5625_v22 }
 0x467   : > { %v4512_v37 = vpop.permute.xlu1 %4511  ;;  %5876 = vmatpush1.bf16.msra.mxu1 %v5875_v14  ;;  %4330 = vmatprep.mubr.f32.mxu1 %v6163_v15 }
 0x468   : > { %v4510_v20 = vpop.permute.xlu0 %4509  ;;  %5878 = vmatprep.subr.bf16.mxu1 %v5877_v31  ;;  %v4521_v60 = vsel %vm4513_vm0, %v4512_v37, %v4504_v30  ;;  %v4517_v3 = vsel %vm4513_vm0, %v4504_v30, %v4512_v37 }
 0x469   : > { %v4520_v58 = vsel %vm4513_vm0, %v4510_v20, %v4502_v33  ;;  %v4542_v44 = vmul.f32 %v4532_v11, %v4521_v60  ;;  %v4516_v57 = vsel %vm4513_vm0, %v4502_v33, %v4510_v20  ;;  %v4541_v49 = vmul.f32 %v4528_v1, %v4517_v3  ;;  %v5641_v33 = vld [vmem:[%s8545_s10 + $0xa0] sm:$0xff] }
 0x46a   : > { %5630 = vmatmul.mubr.msk.f32.gmra.mrb[12].mxu1 %vm3729_vm15, %v5626_v19  ;;  %v4540_v63 = vmul.f32 %v4532_v11, %v4520_v58  ;;  %v4539_v9 = vmul.f32 %v4528_v1, %v4516_v57 }
 0x46b   : > { %v4676_v17 = vpop.permute.xlu1 %4675  ;;  %4336 = vmatprep.mubr.f32.mxu1 %v6163_v15 }
 0x46c   : > { %v4674_v4 = vpop.permute.xlu0 %4673  ;;  %v5881_v50 = vpack.c.bf16 %v4542_v44, %v4540_v63  ;;  %v5883_v8 = vpack.c.bf16 %v4541_v49, %v4539_v9 }
 0x46e   : > { %5631 = vmatmul.mubr.msk.f32.gmra.mrb[14].mxu1 %vm3729_vm15, %v5627_v46  ;;  %v5658_v46 = vld [vmem:[%s8544_s9 + $0x6] ss:$8 sm:$0x3] }
 0x46f   : > { %v4684_v56 = vpop.permute.xlu1 %4683  ;;  %4448 = vmatprep.mubr.f32.mxu1 %v6163_v15  ;;  %v4884_v57 = vrot.slane %v5658_v46, %v8019_v10 }
 0x470   : > { %v4695_v59 = vsel %vm4689_vm1, %v4684_v56, %v4676_v17  ;;  %v4682_v45 = vpop.permute.xlu0 %4681  ;;  %v4691_v12 = vsel %vm4689_vm1, %v4676_v17, %v4684_v56  ;;  %v5643_v56 = vld [vmem:[%s8545_s10 + $0xb0] sm:$0xff] }
 0x471   : > { %v4714_v47 = vmul.f32 %v4708_v13, %v4695_v59  ;;  %v4694_v16 = vsel %vm4689_vm1, %v4682_v45, %v4674_v4  ;;  %v4690_v6 = vsel %vm4689_vm1, %v4674_v4, %v4682_v45  ;;  %v4713_v43 = vmul.f32 %v4704_v24, %v4691_v12 }
 0x472   : > { %v4712_v51 = vmul.f32 %v4708_v13, %v4694_v16  ;;  %5636 = vmatmul.mubr.msk.f32.vlgmr.msra.gmra.mrb[8].mxu1 %vm3729_vm15, %v5632_v26  ;;  %v4711_v2 = vmul.f32 %v4704_v24, %v4690_v6  ;;  %v4880_v26 = vrot.slane %v5658_v46, %v8017_v18 }
 0x473   : > { %5880 = vmatpush1.bf16.msra.mxu1 %v5879_v27  ;;  %v4680_v21 = vpop.permute.xlu1 %4679  ;;  %4454 = vmatprep.mubr.f32.mxu1 %v6163_v15 }
 0x474   : > { %5882 = vmatprep.subr.bf16.mxu1 %v5881_v50  ;;  %v4678_v39 = vpop.permute.xlu0 %4677  ;;  %v5885_v0 = vpack.c.bf16 %v4714_v47, %v4712_v51  ;;  %v5887_v30 = vpack.c.bf16 %v4713_v43, %v4711_v2  ;;  %v5644_v50 = vld [vmem:[%s8545_s10 + $0xb8] sm:$0xff] }
 0x476   : > { %5637 = vmatmul.mubr.msk.f32.gmra.mrb[10].mxu1 %vm3729_vm15, %v5633_v55 }
 0x477   : > { %5884 = vmatpush1.bf16.msra.mxu1 %v5883_v8  ;;  %v4688_v29 = vpop.permute.xlu1 %4687  ;;  %4460 = vmatprep.mubr.f32.mxu1 %v6163_v15 }
 0x478   : > { %5886 = vmatprep.subr.bf16.mxu1 %v5885_v0  ;;  %v4686_v40 = vpop.permute.xlu0 %4685  ;;  %v4697_v11 = vsel %vm4689_vm1, %v4688_v29, %v4680_v21  ;;  %v4693_v54 = vsel %vm4689_vm1, %v4680_v21, %v4688_v29 }
 0x479   : > { %v4696_v23 = vsel %vm4689_vm1, %v4686_v40, %v4678_v39  ;;  %v4692_v61 = vsel %vm4689_vm1, %v4678_v39, %v4686_v40  ;;  %v4718_v42 = vmul.f32 %v4708_v13, %v4697_v11  ;;  %v4717_v14 = vmul.f32 %v4704_v24, %v4693_v54 }
 0x47a   : > { %5638 = vmatmul.mubr.msk.f32.gmra.mrb[12].mxu1 %vm3729_vm15, %v5634_v36  ;;  %v4716_v53 = vmul.f32 %v4708_v13, %v4696_v23  ;;  %v4715_v31 = vmul.f32 %v4704_v24, %v4692_v61  ;;  %v5650_v24 = vld [vmem:[%s8545_s10 + $0xc0] sm:$0xff] }
 0x47b   : > { %v3681_v5 = vpop.permute.xlu1 %3680  ;;  %4466 = vmatprep.mubr.f32.mxu1 %v6163_v15 }
 0x47c   : > { %v3679_v52 = vpop.permute.xlu0 %3678  ;;  %v5889_v17 = vpack.c.bf16 %v4718_v42, %v4716_v53  ;;  %v5891_v44 = vpack.c.bf16 %v4717_v14, %v4715_v31 }
 0x47e   : > { %5639 = vmatmul.mubr.msk.f32.gmra.mrb[14].mxu1 %vm3729_vm15, %v5635_v38  ;;  %v5651_v38 = vld [vmem:[%s8545_s10 + $0xc8] sm:$0xff] }
 0x47f   : > { %v3689_v22 = vpop.permute.xlu1 %3688  ;;  %4624 = vmatprep.mubr.f32.mxu1 %v6163_v15 }
 0x480   : > { %v3698_v37 = vsel %vm3696_vm2, %v3681_v5, %v3689_v22  ;;  %v3702_v19 = vsel %vm3696_vm2, %v3689_v22, %v3681_v5  ;;  %v3687_v1 = vpop.permute.xlu0 %3686 }
 0x481   : > { %v3719_v20 = vmul.f32 %v8253_v41, %v3702_v19  ;;  %v3720_v34 = vmul.f32 %v8256_v28, %v3698_v37  ;;  %v3697_v32 = vsel %vm3696_vm2, %v3679_v52, %v3687_v1  ;;  %v3701_v35 = vsel %vm3696_vm2, %v3687_v1, %v3679_v52 }
 0x482   : > { %v3717_v60 = vmul.f32 %v8253_v41, %v3701_v35  ;;  %v3718_v58 = vmul.f32 %v8256_v28, %v3697_v32  ;;  %5645 = vmatmul.mubr.msk.f32.vlgmr.msra.gmra.mrb[8].mxu1 %vm3729_vm15, %v5641_v33  ;;  %v5653_v32 = vld [vmem:[%s8545_s10 + $0xd8] sm:$0xff] }
 0x483   : > { %5888 = vmatpush1.bf16.msra.mxu1 %v5887_v30  ;;  %v4852_v7 = vpop.permute.xlu1 %4851  ;;  %4630 = vmatprep.mubr.f32.mxu1 %v6163_v15 }
 0x484   : > { %v5839_v4 = vpack.c.bf16 %v3719_v20, %v3717_v60  ;;  %5890 = vmatprep.subr.bf16.mxu1 %v5889_v17  ;;  %v4850_v13 = vpop.permute.xlu0 %4849  ;;  %v5837_v3 = vpack.c.bf16 %v3720_v34, %v3718_v58  ;;  %v5605_v20 = vld [vmem:[%s8544_s9 + $0x1] ss:$8 sm:$0x3] }
 0x485   : > { %v3726_v17 = vld [vmem:[%s8545_s10 + $0x8] sm:$0xff]  ;;  %v8357_v46 = vrot.slane %v5605_v20, %v8017_v18 }
 0x486   : > { %5838 = vmatprep.subr.bf16.mxu0 %v5837_v3  ;;  %5646 = vmatmul.mubr.msk.f32.gmra.mrb[10].mxu1 %vm3729_vm15, %v5642_v62 }
 0x487   : > { %5892 = vmatpush1.bf16.msra.mxu1 %v5891_v44  ;;  %v4860_v63 = vpop.permute.xlu1 %4859  ;;  %5840 = vmatpush1.bf16.msra.mxu0 %v5839_v4  ;;  %v5659_v4 = vld [vmem:[%s8545_s10 + $0xe0] sm:$0xff] }
 0x488   : > { %v4871_v27 = vsel %vm4865_vm3, %v4860_v63, %v4852_v7  ;;  %v4858_v59 = vpop.permute.xlu0 %4857  ;;  %4636 = vmatprep.mubr.f32.mxu1 %v6163_v15  ;;  %v4867_v45 = vsel %vm4865_vm3, %v4852_v7, %v4860_v63  ;;  %v8360_v7 = vrot.slane %v5605_v20, %v8019_v10 }
 0x489   : > { %v4890_v49 = vmul.f32 %v4884_v57, %v4871_v27  ;;  %v4866_v9 = vsel %vm4865_vm3, %v4850_v13, %v4858_v59  ;;  %v4870_v47 = vsel %vm4865_vm3, %v4858_v59, %v4850_v13  ;;  %v4889_v21 = vmul.f32 %v4880_v26, %v4867_v45 }
 0x48a   : > { %v4888_v16 = vmul.f32 %v4884_v57, %v4870_v47  ;;  %5647 = vmatmul.mubr.msk.f32.gmra.mrb[12].mxu1 %vm3729_vm15, %v5643_v56  ;;  %v4887_v55 = vmul.f32 %v4880_v26, %v4866_v9  ;;  %v5660_v47 = vld [vmem:[%s8545_s10 + $0xe8] sm:$0xff] }
 0x48b   : > { %v3685_v51 = vpop.permute.xlu1 %3684  ;;  %4642 = vmatprep.mubr.f32.mxu1 %v6163_v15 }
 0x48c   : > { %v3683_v39 = vpop.permute.xlu0 %3682  ;;  %v5893_v0 = vpack.c.bf16 %v4890_v49, %v4888_v16  ;;  %v5895_v29 = vpack.c.bf16 %v4889_v21, %v4887_v55  ;;  %v5667_v49 = vld [vmem:[%s8544_s9 + $0x7] ss:$8 sm:$0x3] }
 0x48d   : > { %v5056_v21 = vrot.slane %v5667_v49, %v8017_v18  ;;  %v5060_v55 = vrot.slane %v5667_v49, %v8019_v10 }
 0x48e   : > { %5648 = vmatmul.mubr.msk.f32.gmra.mrb[14].mxu1 %vm3729_vm15, %v5644_v50  ;;  %5894 = vmatprep.subr.bf16.mxu1 %v5893_v0 }
 0x48f   : > { %v3693_v8 = vpop.permute.xlu1 %3692  ;;  %4800 = vmatprep.mubr.f32.mxu1 %v6163_v15 }
 0x490   : > { %v3700_v36 = vsel %vm3696_vm2, %v3685_v51, %v3693_v8  ;;  %v3704_v12 = vsel %vm3696_vm2, %v3693_v8, %v3685_v51  ;;  %v3691_v6 = vpop.permute.xlu0 %3690  ;;  %v5661_v8 = vld [vmem:[%s8545_s10 + $0xf0] sm:$0xff] }
 0x491   : > { %v3723_v40 = vmul.f32 %v8253_v41, %v3704_v12  ;;  %v3724_v25 = vmul.f32 %v8256_v28, %v3700_v36  ;;  %v3699_v43 = vsel %vm3696_vm2, %v3683_v39, %v3691_v6  ;;  %v3703_v2 = vsel %vm3696_vm2, %v3691_v6, %v3683_v39  ;;  %v3728_v39 = vld [vmem:[%s8545_s10 + $0x18] sm:$0xff] }
 0x492   : > { %v3721_v11 = vmul.f32 %v8253_v41, %v3703_v2  ;;  %v3722_v23 = vmul.f32 %v8256_v28, %v3699_v43  ;;  %5654 = vmatmul.mubr.msk.f32.vlgmr.msra.gmra.mrb[8].mxu1 %vm3729_vm15, %v5650_v24  ;;  %v3725_v41 = vld [vmem:[%s8545_s10] sm:$0xff]  ;;  %v5652_v28 = vld [vmem:[%s8545_s10 + $0xd0] sm:$0xff]  ;;  %v5662_v2 = vld [vmem:[%s8545_s10 + $0xf8] sm:$0xff] }
 0x493   : > { %5896 = vmatpush1.bf16.msra.mxu1 %v5895_v29  ;;  %v4856_v5 = vpop.permute.xlu1 %4855  ;;  %4806 = vmatprep.mubr.f32.mxu1 %v6163_v15 }
 0x494   : > { %v5843_v52 = vpack.c.bf16 %v3723_v40, %v3721_v11  ;;  %v4854_v54 = vpop.permute.xlu0 %4853  ;;  %v5841_v61 = vpack.c.bf16 %v3724_v25, %v3722_v23 }
 0x496   : > { %5842 = vmatprep.subr.bf16.mxu0 %v5841_v61  ;;  %5655 = vmatmul.mubr.msk.f32.gmra.mrb[10].mxu1 %vm3729_vm15, %v5651_v38 }
 0x497   : > { %v4864_v42 = vpop.permute.xlu1 %4863  ;;  %5844 = vmatpush1.bf16.msra.mxu0 %v5843_v52  ;;  %4812 = vmatprep.mubr.f32.mxu1 %v6163_v15 }
 0x498   : > { %v4869_v53 = vsel %vm4865_vm3, %v4856_v5, %v4864_v42  ;;  %v4873_v30 = vsel %vm4865_vm3, %v4864_v42, %v4856_v5  ;;  %v4862_v22 = vpop.permute.xlu0 %4861 }
 0x499   : > { %v4893_v33 = vmul.f32 %v4880_v26, %v4869_v53  ;;  %v4894_v14 = vmul.f32 %v4884_v57, %v4873_v30  ;;  %v4868_v31 = vsel %vm4865_vm3, %v4854_v54, %v4862_v22  ;;  %v4872_v37 = vsel %vm4865_vm3, %v4862_v22, %v4854_v54 }
 0x49a   : > { %v4891_v19 = vmul.f32 %v4880_v26, %v4868_v31  ;;  %v4892_v1 = vmul.f32 %v4884_v57, %v4872_v37  ;;  %5601 = vmatmul.mubr.msk.f32.vlgmr.msra.gmra.mrb[48].mxu0 %vm3729_vm15, %v3725_v41  ;;  %5656 = vmatmul.mubr.msk.f32.gmra.mrb[12].mxu1 %vm3729_vm15, %v5652_v28  ;;  %v3727_v57 = vld [vmem:[%s8545_s10 + $0x10] sm:$0xff] }
 0x49b   : > { %v3842_v34 = vpop.permute.xlu1 %3841  ;;  %4818 = vmatprep.mubr.f32.mxu1 %v6163_v15  ;;  %3812 = vmatprep.mubr.f32.mxu0 %v6163_v15 }
 0x49c   : > { %v5899_v35 = vpack.c.bf16 %v4893_v33, %v4891_v19  ;;  %v3840_v60 = vpop.permute.xlu0 %3839  ;;  %v5897_v58 = vpack.c.bf16 %v4894_v14, %v4892_v1  ;;  %v5606_v1 = vld [vmem:[%s8545_s10 + $0x20] sm:$0xff] }
 0x49e   : > { %5898 = vmatprep.subr.bf16.mxu1 %v5897_v58  ;;  %5657 = vmatmul.mubr.msk.f32.gmra.mrb[14].mxu1 %vm3729_vm15, %v5653_v32 }
 0x49f   : > { %v3850_v62 = vpop.permute.xlu1 %3849  ;;  %5900 = vmatpush1.bf16.msra.mxu1 %v5899_v35  ;;  %5602 = vmatmul.mubr.msk.f32.gmra.mrb[50].mxu0 %vm3729_vm15, %v3726_v17 }
 0x4a0   : > { %v3857_v13 = vsel %vm3855_vm4, %v3842_v34, %v3850_v62  ;;  %v3861_v3 = vsel %vm3855_vm4, %v3850_v62, %v3842_v34  ;;  %v3848_v44 = vpop.permute.xlu0 %3847  ;;  %4976 = vmatprep.mubr.f32.mxu1 %v6163_v15  ;;  %3818 = vmatprep.mubr.f32.mxu0 %v6163_v15  ;;  %v5607_v62 = vld [vmem:[%s8545_s10 + $0x28] sm:$0xff] }
 0x4a1   : > { %v3879_v63 = vmul.f32 %v8357_v46, %v3861_v3  ;;  %v3880_v56 = vmul.f32 %v8360_v7, %v3857_v13  ;;  %v3856_v26 = vsel %vm3855_vm4, %v3840_v60, %v3848_v44  ;;  %v3860_v27 = vsel %vm3855_vm4, %v3848_v44, %v3840_v60  ;;  %v5668_v3 = vld [vmem:[%s8545_s10 + $0x100] sm:$0xff]  ;;  %v5609_v44 = vld [vmem:[%s8545_s10 + $0x38] sm:$0xff] }
 0x4a2   : > { %v3877_v59 = vmul.f32 %v8357_v46, %v3860_v27  ;;  %v3878_v45 = vmul.f32 %v8360_v7, %v3856_v26  ;;  %5663 = vmatmul.mubr.msk.f32.vlgmr.msra.gmra.mrb[8].mxu1 %vm3729_vm15, %v5659_v4 }
 0x4a3   : > { %v5028_v9 = vpop.permute.xlu1 %5027  ;;  %5603 = vmatmul.mubr.msk.f32.gmra.mrb[52].mxu0 %vm3729_vm15, %v3727_v57  ;;  %4982 = vmatprep.mubr.f32.mxu1 %v6163_v15  ;;  %v5669_v57 = vld [vmem:[%s8545_s10 + $0x108] sm:$0xff] }
 0x4a4   : > { %v5847_v16 = vpack.c.bf16 %v3879_v63, %v3877_v59  ;;  %v5026_v51 = vpop.permute.xlu0 %5025  ;;  %v5845_v50 = vpack.c.bf16 %v3880_v56, %v3878_v45  ;;  %3824 = vmatprep.mubr.f32.mxu0 %v6163_v15  ;;  %v5670_v63 = vld [vmem:[%s8545_s10 + $0x110] sm:$0xff]  ;;  %v5671_v56 = vld [vmem:[%s8545_s10 + $0x118] sm:$0xff] }
 0x4a6   : > { %5846 = vmatprep.subr.bf16.mxu0 %v5845_v50  ;;  %5664 = vmatmul.mubr.msk.f32.gmra.mrb[10].mxu1 %vm3729_vm15, %v5660_v47 }
 0x4a7   : > { %v5036_v0 = vpop.permute.xlu1 %5035  ;;  %5848 = vmatpush1.bf16.msra.mxu0 %v5847_v16  ;;  %4988 = vmatprep.mubr.f32.mxu1 %v6163_v15 }
 0x4a8   : > { %v5043_v18 = vsel %vm5041_vm5, %v5028_v9, %v5036_v0  ;;  %v5047_v10 = vsel %vm5041_vm5, %v5036_v0, %v5028_v9  ;;  %v5034_v24 = vpop.permute.xlu0 %5033  ;;  %5604 = vmatmul.mubr.msk.f32.gmra.mrb[54].mxu0 %vm3729_vm15, %v3728_v39 }
 0x4a9   : > { %v5065_v29 = vmul.f32 %v5056_v21, %v5043_v18  ;;  %v5066_v36 = vmul.f32 %v5060_v55, %v5047_v10  ;;  %v5042_v12 = vsel %vm5041_vm5, %v5026_v51, %v5034_v24  ;;  %v5046_v6 = vsel %vm5041_vm5, %v5034_v24, %v5026_v51  ;;  %3966 = vmatprep.mubr.f32.mxu0 %v6163_v15 }
 0x4aa   : > { %v5063_v40 = vmul.f32 %v5056_v21, %v5042_v12  ;;  %v5064_v25 = vmul.f32 %v5060_v55, %v5046_v6  ;;  %5665 = vmatmul.mubr.msk.f32.gmra.mrb[12].mxu1 %vm3729_vm15, %v5661_v8 }
 0x4ab   : > { %v3846_v43 = vpop.permute.xlu1 %3845  ;;  %4994 = vmatprep.mubr.f32.mxu1 %v6163_v15 }
 0x4ac   : > { %v5903_v11 = vpack.c.bf16 %v5065_v29, %v5063_v40  ;;  %v3844_v23 = vpop.permute.xlu0 %3843  ;;  %v5901_v5 = vpack.c.bf16 %v5066_v36, %v5064_v25 }
 0x4ae   : > { %5902 = vmatprep.subr.bf16.mxu1 %v5901_v5  ;;  %5666 = vmatmul.mubr.msk.f32.gmra.mrb[14].mxu1 %vm3729_vm15, %v5662_v2 }
 0x4af   : > { %v3854_v38 = vpop.permute.xlu1 %3853  ;;  %5904 = vmatpush1.bf16.msra.mxu1 %v5903_v11  ;;  %5152 = vmatprep.mubr.f32.mxu1 %v6163_v15 }
 0x4b0   : > { %v3859_v52 = vsel %vm3855_vm4, %v3846_v43, %v3854_v38  ;;  %v3863_v54 = vsel %vm3855_vm4, %v3854_v38, %v3846_v43  ;;  %v3852_v61 = vpop.permute.xlu0 %3851 }
 0x4b1   : > { %v3883_v42 = vmul.f32 %v8357_v46, %v3863_v54  ;;  %v3884_v41 = vmul.f32 %v8360_v7, %v3859_v52  ;;  %v3858_v28 = vsel %vm3855_vm4, %v3844_v23, %v3852_v61  ;;  %v3862_v53 = vsel %vm3855_vm4, %v3852_v61, %v3844_v23 }
 0x4b2   : > { %v3881_v30 = vmul.f32 %v8357_v46, %v3862_v53  ;;  %v3882_v22 = vmul.f32 %v8360_v7, %v3858_v28 }
 0x4b3   : > { %v5032_v33 = vpop.permute.xlu1 %5031 }
 0x4b4   : > { %v5851_v14 = vpack.c.bf16 %v3883_v42, %v3881_v30  ;;  %v5030_v31 = vpop.permute.xlu0 %5029  ;;  %v5849_v37 = vpack.c.bf16 %v3884_v41, %v3882_v22 }
 0x4b6   : > { %5850 = vmatprep.subr.bf16.mxu0 %v5849_v37 }
 0x4b7   : > { %v5040_v19 = vpop.permute.xlu1 %5039  ;;  %5852 = vmatpush1.bf16.msra.mxu0 %v5851_v14 }
 0x4b8   : > { %v5045_v20 = vsel %vm5041_vm5, %v5032_v33, %v5040_v19  ;;  %v5049_v34 = vsel %vm5041_vm5, %v5040_v19, %v5032_v33  ;;  %v5038_v32 = vpop.permute.xlu0 %5037 }
 0x4b9   : > { %v5069_v35 = vmul.f32 %v5056_v21, %v5045_v20  ;;  %v5070_v60 = vmul.f32 %v5060_v55, %v5049_v34  ;;  %v5044_v58 = vsel %vm5041_vm5, %v5030_v31, %v5038_v32  ;;  %v5048_v17 = vsel %vm5041_vm5, %v5038_v32, %v5030_v31 }
 0x4ba   : > { %v5067_v46 = vmul.f32 %v5056_v21, %v5044_v58  ;;  %v5068_v7 = vmul.f32 %v5060_v55, %v5048_v17  ;;  %5610 = vmatmul.mubr.msk.f32.vlgmr.msra.gmra.mrb[48].mxu0 %vm3729_vm15, %v5606_v1 }
 0x4bb   : > { %3972 = vmatprep.mubr.f32.mxu0 %v6163_v15 }
 0x4bc   : > { %v5907_v4 = vpack.c.bf16 %v5069_v35, %v5067_v46  ;;  %v5905_v13 = vpack.c.bf16 %v5070_v60, %v5068_v7 }
 0x4be   : > { %5611 = vmatmul.mubr.msk.f32.gmra.mrb[50].mxu0 %vm3729_vm15, %v5607_v62  ;;  %5906 = vmatprep.subr.bf16.mxu1 %v5905_v13  ;;  %v3665_v13 = vld [vmem:[%s571_s23 + $0x18] sm:$0xff] }
 0x4bf   : > { %5908 = vmatpush1.bf16.msra.mxu1 %v5907_v4  ;;  %3978 = vmatprep.mubr.f32.mxu0 %v6163_v15  ;;  %v3663_v4 = vld [vmem:[%s571_s23 + $0x8] sm:$0xff] }
 0x4c2   : > { %5612 = vmatmul.mubr.msk.f32.gmra.mrb[52].mxu0 %vm3729_vm15, %v5608_v48  ;;  %5672 = vmatmul.mubr.msk.f32.vlgmr.msra.gmra.mrb[8].mxu1 %vm3729_vm15, %v5668_v3 }
 0x4c3   : > { %3984 = vmatprep.mubr.f32.mxu0 %v6163_v15  ;;  %5158 = vmatprep.mubr.f32.mxu1 %v6163_v15 }
 0x4c6   : > { %5613 = vmatmul.mubr.msk.f32.gmra.mrb[54].mxu0 %vm3729_vm15, %v5609_v44  ;;  %5673 = vmatmul.mubr.msk.f32.gmra.mrb[10].mxu1 %vm3729_vm15, %v5669_v57 }
 0x4c7   : > { %5164 = vmatprep.mubr.f32.mxu1 %v6163_v15  ;;  %5380 = vmatprep.mubr.f32.mxu0 %v6163_v15 }
 0x4c8   : > { %v5221_v59 = vpop.permute.xlu1 %5220 }
 0x4c9   : > { %v5216_v9 = vpop.permute.xlu0 %5215 }
 0x4ca   : > { %5674 = vmatmul.mubr.msk.f32.gmra.mrb[12].mxu1 %vm3729_vm15, %v5670_v63  ;;  %v5917_v63 = vpack.c.bf16 %v3665_v13, %v3663_v4 }
 0x4cb   : > { %5170 = vmatprep.mubr.f32.mxu1 %v6163_v15 }
 0x4cc   : > { %v5248_v55 = vpop.permute.xlu1 %5247 }
 0x4cd   : > { %v5253_v0 = vpop.permute.xlu0 %5252 }
 0x4ce   : > { %5675 = vmatmul.mubr.msk.f32.gmra.mrb[14].mxu1 %vm3729_vm15, %v5671_v56  ;;  %v3662_v56 = vld [vmem:[%s571_s23] sm:$0xff] }
 0x4d0   : > { %v5226_v25 = vpop.permute.xlu1 %5225 }
 0x4d1   : > { %v5231_v52 = vpop.permute.xlu0 %5230 }
 0x4d4   : > { %v5258_v19 = vpop.permute.xlu1 %5257 }
 0x4d7   : > { %v5263_v35 = vpop.permute.xlu0 %5262 }
 0x58d   : > { %v3968_v26 = vpop.f32.mrb[48].mxu0 }
 0x58e   : > { %v3970_v27 = vpop.f32.mrb[49].mxu0 }
 0x591   : > { %v3974_v45 = vpop.f32.mrb[50].mxu0 }
 0x592   : > { %v3976_v49 = vpop.f32.mrb[51].mxu0 }
 0x595   : > { %v3980_v47 = vpop.f32.mrb[52].mxu0  ;;  %v5154_v16 = vpop.f32.mrb[8].mxu1 }
 0x596   : > { %v5925_v51 = vadd.f32 %v5154_v16, %v3968_v26  ;;  %v3982_v50 = vpop.f32.mrb[53].mxu0  ;;  %v5156_v21 = vpop.f32.mrb[9].mxu1  ;;  %v3664_v26 = vld [vmem:[%s571_s23 + $0x10] sm:$0xff] }
 0x597   : > { %v5926_v39 = vadd.f32 %v5156_v21, %v3970_v27  ;;  %v3667_v27 = vld [vmem:[%s571_s23 + $0x28] sm:$0xff] }
 0x598   : > { %v5233_v15 = vmul.f32 %v5925_v51, %v5216_v9  ;;  %v5289_v51 = vld [vmem:[%s8548_s13] sm:$0xf] }
 0x599   : > { %v5234_v8 = vmul.f32 %v5926_v39, %v5216_v9  ;;  %v3986_v18 = vpop.f32.mrb[54].mxu0  ;;  %v5160_v10 = vpop.f32.mrb[10].mxu1  ;;  %v3666_v9 = vld [vmem:[%s571_s23 + $0x20] sm:$0xff] }
 0x59a   : > { %v5927_v24 = vadd.f32 %v5160_v10, %v3974_v45  ;;  %v3988_v29 = vpop.f32.mrb[55].mxu0  ;;  %v5162_v36 = vpop.f32.mrb[11].mxu1  ;;  %v5265_v6 = vadd.f32 %v5248_v55, %v5233_v15  ;;  %v5919_v45 = vpack.c.bf16 %v3664_v26, %v3662_v56 }
 0x59b   : > { %v5928_v12 = vadd.f32 %v5162_v36, %v3976_v49  ;;  %v5266_v43 = vadd.f32 %v5248_v55, %v5234_v8 }
 0x59c   : > { %v5235_v40 = vmul.f32 %v5927_v24, %v5221_v59  ;;  %v5273_v42 = vmax.f32 %v5265_v6, 0.0 }
 0x59d   : > { %v5236_v2 = vmul.f32 %v5928_v12, %v5221_v59  ;;  %v5166_v11 = vpop.f32.mrb[12].mxu1  ;;  %v5274_v53 = vmax.f32 %v5266_v43, 0.0  ;;  %v3669_v59 = vld [vmem:[%s571_s23 + $0x38] sm:$0xff] }
 0x59e   : > { %v5267_v23 = vadd.f32 %v5253_v0, %v5235_v40  ;;  %v5929_v5 = vadd.f32 %v5166_v11, %v3980_v47  ;;  %v5168_v38 = vpop.f32.mrb[13].mxu1  ;;  %v5921_v49 = vpack.c.bf16 %v3669_v59, %v3667_v27  ;;  %v3668_v47 = vld [vmem:[%s571_s23 + $0x30] sm:$0xff] }
 0x59f   : > { %v5268_v54 = vadd.f32 %v5253_v0, %v5236_v2  ;;  %v5930_v61 = vadd.f32 %v5168_v38, %v3982_v50  ;;  %v5923_v16 = vpack.c.bf16 %v3668_v47, %v3666_v9  ;;  %v5310_v50 = vpop.permute.xlu1 %5309 }
 0x5a0   : > { %v5275_v41 = vmax.f32 %v5267_v23, 0.0  ;;  %v5237_v28 = vmul.f32 %v5929_v5, %v5226_v25 }
 0x5a1   : > { %v5276_v30 = vmax.f32 %v5268_v54, 0.0  ;;  %v5238_v22 = vmul.f32 %v5930_v61, %v5226_v25  ;;  %v5172_v33 = vpop.f32.mrb[14].mxu1 }
 0x5a2   : > { %v5911_v14 = vpack.c.bf16 %v5275_v41, %v5273_v42  ;;  %v5931_v31 = vadd.f32 %v5172_v33, %v3986_v18  ;;  %v5174_v37 = vpop.f32.mrb[15].mxu1  ;;  %v5269_v34 = vadd.f32 %v5258_v19, %v5237_v28 }
 0x5a3   : > { %v5932_v1 = vadd.f32 %v5174_v37, %v3988_v29  ;;  %v5909_v20 = vpack.c.bf16 %v5276_v30, %v5274_v53  ;;  %v5270_v60 = vadd.f32 %v5258_v19, %v5238_v22 }
 0x5a4   : > { %v5239_v32 = vmul.f32 %v5931_v31, %v5231_v52  ;;  %v5277_v7 = vmax.f32 %v5269_v34, 0.0 }
 0x5a5   : > { %v5240_v58 = vmul.f32 %v5932_v1, %v5231_v52  ;;  %5910 = vmatprep.subr.bf16.mxu0 %v5909_v20  ;;  %v5278_v48 = vmax.f32 %v5270_v60, 0.0 }
 0x5a6   : > { %v5271_v17 = vadd.f32 %v5263_v35, %v5239_v32  ;;  %5912 = vmatpush1.bf16.msra.mxu0 %v5911_v14 }
 0x5a7   : > { %v5272_v46 = vadd.f32 %v5263_v35, %v5240_v58 }
 0x5a8   : > { %v5279_v62 = vmax.f32 %v5271_v17, 0.0 }
 0x5a9   : > { %v5280_v3 = vmax.f32 %v5272_v46, 0.0 }
 0x5aa   : > { %v5915_v44 = vpack.c.bf16 %v5279_v62, %v5277_v7 }
 0x5ab   : > { %v5913_v57 = vpack.c.bf16 %v5280_v3, %v5278_v48 }
 0x5ad   : > { %5914 = vmatprep.subr.bf16.mxu0 %v5913_v57 }
 0x5ae   : > { %5916 = vmatpush1.bf16.msra.mxu0 %v5915_v44 }
 0x5af   : > { %5918 = vmatprep.subr.bf16.mxu0 %v5917_v63 }
 0x5b2   : > { %5920 = vmatpush1.bf16.msra.mxu0 %v5919_v45 }
 0x5b3   : > { %5922 = vmatprep.subr.bf16.mxu0 %v5921_v49 }
 0x5b6   : > { %5924 = vmatpush1.bf16.msra.mxu0 %v5923_v16 }
 0x5b9   : > { %5676 = vmatmul.mubr.msk.f32.vlgmr.msra.gmra.mrb[56].mxu0 %vm5312_vm6, %v5289_v51 }
 0x68c   : > { %v5382_v21 = vpop.f32.mrb[56].mxu0 }
 0x68d   : > { %v5383_v55 = vadd.f32 %v5382_v21, %v5310_v50  ;;  %v5384_v39 = vpop.f32.mrb[57].mxu0 }
 0x68e   : > { %v5385_v15 = vadd.f32 %v5384_v39, %v5310_v50 }
 0x690   : > { %v5389_v0 = vcombine.low %v5383_v55, %v5385_v15 }
 0x692   : > { %5391 = vst [vmem:[%s561_s30] sm:$0xff] %v5389_v0 }
 0x693   : > { %6099 = shalt.err (!%p6096_p2)
}
 0x694   : > { %s6100_s7 = scalar_lea.hbm %s8493_s1, 128  ;;  %s6104_s17 = scalar_lea.hbm %s8550_s15, 256 }
 0x695   : > { %p6101_p3 = scmp.ne.s32.totalorder %s8493_s1, %s6100_s7  ;;  %p6105_p8 = scmp.lt.u32.totalorder %s8493_s1, %s8550_s15 }
 0x696   : > { %p6106_p11 = scmp.lt.u32.totalorder %s6104_s17, %s6100_s7  ;;  %p6108_p10 = scmp.lt.u32.totalorder %s6100_s7, %s8493_s1 }
 0x697   : > { %p6102_p4 = pnand %p6101_p3, %p6289_p5 }
 0x698   : > { %p6107_p9 = por %p6106_p11, %p6105_p8 }
 0x699   : > { %p6103_p7 = pneg %p6102_p4 }
 0x69a   : > { %p6109_p12 = por %p6108_p10, %p6107_p9 }
 0x69c   : > { %p6110_p13 = pnand %p6109_p12, %p6103_p7 }
 0x69e   : > { %6113 = shalt.err (!%p6110_p13)
}
 0x69f   : > { %5993 = dma.vmem_to_hbm [thread:$0]  (%p6289_p5), %s8495_s6, 128, %s8493_s1, %s5393_s0  }
 0x6a0 PF: > { %p6005_p0 = scmp.ge.s32.totalorder %s6152_s21, 2  ;;  %s5419_s2 = sand.u32 1, %s6140_s18  }
 0x6a1   : > { %s5420_s25 = scalar_lea.sflag [#allocation8], %s5419_s2 }
 0x6a2   : > { %p6000_p1 = pnand %p6005_p0, %p6293_p6 }
 0x6a4   : > { %6135 = dma.done.wait (!%p6000_p1), %s5420_s25, 128  }
 0x6a5   : > { %6137 = vsyncadd (!%p6000_p1), %s5420_s25, 4294967168  ;;  %p26_p2 = scmp.ge.s32.totalorder %s6276_s24, 4   ;;  %s8796_s18 = smov %s6144_s19 }
 0x6a6   : > { %s8797_s19 = smov %s6148_s20  ;;  %s8798_s20 = smov %s6287_s27 }
 0x6a7   : > { %s8799_s21 = smov %s6276_s24  ;;  %28 = sbr.rel (!%p26_p2) target bundleno = 10 (0xa), region = 147 }
 0x6ae   :  { %5425 = vsyncpa [#allocation8], 1 }
 0x6af   :  { %5427 = vsyncpa [#allocation8 + $0x1], 1 }
 0x6b0   :  { %5428 = vsyncpa [#allocation9], 1 }
 0x6b1   :  { %5430 = vsyncpa [#allocation9 + $0x1], 1 }

</bundles_post_ra>
